<compile_context>
chip_gen: v7x
topology: tpu7x:2x2x1
jax: 0.10.0
libtpu: 0.0.40
codegen_flags: <defaults>
</compile_context>

<pallas_src>
import functools

import jax
import jax.numpy as jnp
from jax.experimental import pallas as pl
from jax.experimental.pallas import tpu as pltpu

_LN_EPS = 1e-5          # torch.nn.LayerNorm default
_SLOT_EPS = 1e-8        # SlotAttention.eps


def _ln(x, g, b):
    m = jnp.mean(x, axis=-1, keepdims=True)
    v = jnp.mean((x - m) ** 2, axis=-1, keepdims=True)
    return (x - m) * jax.lax.rsqrt(v + _LN_EPS) * g + b


def _mm(a, b):
    return jnp.dot(a, b, preferred_element_type=jnp.float32)


def _bmm(eq, a, b):
    return jnp.einsum(eq, a, b, preferred_element_type=jnp.float32)


# ----------------------------------------------------------------------------
# Fused kernel: encoder + slot attention + stretch + selections.
# One grid step == one batch tile of TB sequences.
# ----------------------------------------------------------------------------
def _fused_kernel(x_ref, xf_ref, mask_ref, noise_ref, expand_ref,
                  enc_wqkv_ref, enc_wm_ref, enc_bqkv_ref, enc_vecs_ref,
                  sa_wq_ref, sa_wkv_ref, sa_bkv_ref, sa_wm_ref, sa_vecs_ref,
                  gru_wx_ref, gru_wh_ref, gru_b_ref,
                  sel_ref, nda_ref, fa_ref,
                  *, num_iters, eps, stretch):
    x = x_ref[...]            # (TB, L, D)
    m = mask_ref[...]         # (TB, 1, L)
    noise = noise_ref[...]    # (TB, num_slots, D)
    TB, L, D = x.shape
    num_slots = noise.shape[1]
    scale = D ** -0.5

    # ------------------ synthetic single-layer transformer encoder ----------
    x2 = x.reshape(TB * L, D)                                   # leading-dim collapse (L % 8 == 0)
    qkv = _mm(x2, enc_wqkv_ref[...]) + enc_bqkv_ref[...]        # fused QKV, (TB*L, 3D)
    qkv3 = qkv.reshape(TB, L, 3 * D)
    q = qkv3[:, :, :D]
    k = qkv3[:, :, D:2 * D]
    v = qkv3[:, :, 2 * D:]

    neg_mask = (m - 1.0) * 1e9                                  # 0 where valid, -1e9 where masked
    scores = _bmm('bqd,bkd->bqk', q, k) * scale + neg_mask      # (TB, L, L)
    scores = scores - jnp.max(scores, axis=-1, keepdims=True)
    e = jnp.exp(scores)
    attn = e * pl.reciprocal(jnp.sum(e, axis=-1, keepdims=True), approx=True)
    ctx = _bmm('bqk,bkd->bqd', attn, v).reshape(TB * L, D)

    bo, bff1, bff2 = enc_vecs_ref[0:1], enc_vecs_ref[1:2], enc_vecs_ref[2:3]
    g1, be1 = enc_vecs_ref[3:4], enc_vecs_ref[4:5]
    g2, be2 = enc_vecs_ref[5:6], enc_vecs_ref[6:7]

    ao = _mm(ctx, enc_wm_ref[0]) + bo
    h1 = _ln(x2 + ao, g1, be1)
    ff = jnp.maximum(_mm(h1, enc_wm_ref[1]) + bff1, 0.0)
    ff = _mm(ff, enc_wm_ref[2]) + bff2
    h = _ln(h1 + ff, g2, be2)                                   # (TB*L, D)

    # ------------------------------ slot attention ---------------------------
    bq, b1, b2 = sa_vecs_ref[0:1], sa_vecs_ref[1:2], sa_vecs_ref[2:3]
    g_in, be_in = sa_vecs_ref[3:4], sa_vecs_ref[4:5]
    g_sl, be_sl = sa_vecs_ref[5:6], sa_vecs_ref[6:7]
    g_ff, be_ff = sa_vecs_ref[7:8], sa_vecs_ref[8:9]
    mu, logsig, default_slot = sa_vecs_ref[9:10], sa_vecs_ref[10:11], sa_vecs_ref[11:12]

    rand_slots = mu + jnp.exp(logsig) * noise                   # (TB, num_slots, D)
    default = jnp.broadcast_to(default_slot[None], (TB, 1, D))
    slots = jnp.concatenate([default, rand_slots], axis=1)      # (TB, S, D)

    xn = _ln(h, g_in, be_in)                                    # (TB*L, D)
    kv = (_mm(xn, sa_wkv_ref[...]) + sa_bkv_ref[...]).reshape(TB, L, 2 * D)  # fused K|V
    k_sa = kv[:, :, :D]
    v_sa = kv[:, :, D:]

    # loop-invariant weight broadcasts, hoisted out of the iteration loop
    wq_b = jnp.broadcast_to(sa_wq_ref[...][None], (TB, D, D))
    wx_b = jnp.broadcast_to(gru_wx_ref[...][None], (TB, D, 3 * D))
    wh_b = jnp.broadcast_to(gru_wh_ref[...][None], (TB, D, 3 * D))
    wm1_b = jnp.broadcast_to(sa_wm_ref[0][None], (TB, D, D))
    wm2_b = jnp.broadcast_to(sa_wm_ref[1][None], (TB, D, D))
    gbx = gru_b_ref[0:1]                                        # (1, 3D)
    gbh = gru_b_ref[1:2]

    attention = jnp.zeros((TB, 1 + num_slots, L), jnp.float32)
    # num_iters is small and static -> fully unrolled on purpose (LLO visibility).
    for _ in range(num_iters):
        slots_prev = slots
        sn = _ln(slots, g_sl, be_sl)
        q_sa = _bmm('bsd,bde->bse', sn, wq_b) + bq              # (TB, S, D)
        dots = _bmm('bid,bjd->bij', q_sa, k_sa) * scale         # (TB, S, L)
        # softmax over the SLOT dimension (torch dim=1)
        dmax = jnp.max(dots, axis=1, keepdims=True)
        e2 = jnp.exp(dots - dmax)
        soft = e2 * pl.reciprocal(jnp.sum(e2, axis=1, keepdims=True), approx=True)
        attention = (soft + eps) * m                            # (TB, S, L)
        weights = attention * pl.reciprocal(
            jnp.sum(attention, axis=-1, keepdims=True), approx=True)
        updates = _bmm('bij,bjd->bid', weights, v_sa)           # (TB, S, D)

        # GRUCell (PyTorch semantics), fused gate projections (r|z|n).
        gx = _bmm('bsd,bde->bse', updates, wx_b) + gbx          # (TB, S, 3D)
        gh = _bmm('bsd,bde->bse', slots_prev, wh_b) + gbh       # (TB, S, 3D)
        r = jax.nn.sigmoid(gx[:, :, :D] + gh[:, :, :D])
        z = jax.nn.sigmoid(gx[:, :, D:2 * D] + gh[:, :, D:2 * D])
        n = jnp.tanh(gx[:, :, 2 * D:] + r * gh[:, :, 2 * D:])
        slots = (1.0 - z) * n + z * slots_prev

        # residual MLP
        sf = _ln(slots, g_ff, be_ff)
        hmid = jnp.maximum(_bmm('bsd,bde->bse', sf, wm1_b) + b1, 0.0)
        slots = slots + _bmm('bsd,bde->bse', hmid, wm2_b) + b2

    # -------------------- epilogue: stretch, slice, selections ---------------
    full_attention = attention
    if stretch:
        full_attention = jnp.clip(full_attention * 1.2 - 0.1, 0.0, 1.0)
    fa_ref[...] = full_attention

    nda = full_attention[:, 1:]                                 # (TB, num_slots, L)
    nda_ref[...] = nda

    # Lane-dense selections: expand attention along D with a (L, L*D) 0/1 matrix
    # (exactly one 1.0 per contraction -> bitwise exact), then multiply by the
    # flattened inputs; (TB, num_slots, L*D) minor dim is a multiple of 128-friendly.
    exp_b = jnp.broadcast_to(expand_ref[...][None], (TB, L, L * D))
    a_full = _bmm('bsl,blf->bsf', nda, exp_b)                   # (TB, num_slots, L*D)
    sel_ref[...] = a_full * xf_ref[...][:, None, :]


# ----------------------------------------------------------------------------
# Parameter init (deterministic, synthetic) -- already in fused layouts.
# ----------------------------------------------------------------------------
def init_params(key, D):
    ks = jax.random.split(key, 10)
    s = D ** -0.5

    enc_wqkv = jax.random.normal(ks[0], (D, 3 * D), jnp.float32) * s   # Wq|Wk|Wv
    enc_wm = jax.random.normal(ks[1], (3, D, D), jnp.float32) * s      # Wo, Wff1, Wff2
    enc_bqkv = jnp.zeros((1, 3 * D), jnp.float32)
    enc_vecs = jnp.concatenate([
        jnp.zeros((3, D), jnp.float32),                                # bo, bff1, bff2
        jnp.ones((1, D), jnp.float32), jnp.zeros((1, D), jnp.float32), # ln1
        jnp.ones((1, D), jnp.float32), jnp.zeros((1, D), jnp.float32), # ln2
    ], axis=0)                                                         # (7, D)

    sa_wq = jax.random.normal(ks[2], (D, D), jnp.float32) * s
    sa_wkv = jax.random.normal(ks[3], (D, 2 * D), jnp.float32) * s     # Wk|Wv
    sa_bkv = jnp.zeros((1, 2 * D), jnp.float32)
    sa_wm = jax.random.normal(ks[4], (2, D, D), jnp.float32) * s       # Wmlp1, Wmlp2
    mu = jax.random.normal(ks[5], (1, D), jnp.float32)
    bound = (6.0 / (1.0 + D)) ** 0.5                                   # xavier_uniform-like
    logsig = jax.random.uniform(ks[6], (1, D), jnp.float32, -bound, bound)
    default_slot = jax.random.normal(ks[7], (1, D), jnp.float32)
    sa_vecs = jnp.concatenate([
        jnp.zeros((3, D), jnp.float32),                                # bq, b1, b2
        jnp.ones((1, D), jnp.float32), jnp.zeros((1, D), jnp.float32), # norm_input
        jnp.ones((1, D), jnp.float32), jnp.zeros((1, D), jnp.float32), # norm_slots
        jnp.ones((1, D), jnp.float32), jnp.zeros((1, D), jnp.float32), # norm_pre_ff
        mu, logsig, default_slot,
    ], axis=0)                                                         # (12, D)

    gru_wx = jax.random.normal(ks[8], (D, 3 * D), jnp.float32) * s     # r|z|n input weights
    gru_wh = jax.random.normal(ks[9], (D, 3 * D), jnp.float32) * s     # r|z|n hidden weights
    gru_b = jnp.zeros((2, 3 * D), jnp.float32)                         # bx, bh

    return dict(enc_wqkv=enc_wqkv, enc_wm=enc_wm, enc_bqkv=enc_bqkv, enc_vecs=enc_vecs,
                sa_wq=sa_wq, sa_wkv=sa_wkv, sa_bkv=sa_bkv, sa_wm=sa_wm, sa_vecs=sa_vecs,
                gru_wx=gru_wx, gru_wh=gru_wh, gru_b=gru_b)


# ----------------------------------------------------------------------------
# Forward wrapper (only free reshapes / constant prep stay in plain JAX)
# ----------------------------------------------------------------------------
def entity_extractor_forward(params, input_embeds, mask, noise, *,
                             num_iters, stretch, batch_tile=None):
    B, L, D = input_embeds.shape
    num_slots = noise.shape[1]
    S = 1 + num_slots
    assert num_iters >= 1
    assert L % 8 == 0, "fused kernel requires seq length to be a multiple of 8"

    if batch_tile is None:
        batch_tile = B if B <= 8 else 8
    TB = batch_tile
    assert B % TB == 0

    x = input_embeds.astype(jnp.float32)
    x_flat = x.reshape(B, L * D)                        # free metadata reshape
    mask3 = mask.astype(jnp.float32).reshape(B, 1, L)
    noise = noise.astype(jnp.float32)
    expand = jnp.repeat(jnp.eye(L, dtype=jnp.float32), D, axis=1)   # (L, L*D)

    kernel = functools.partial(_fused_kernel, num_iters=num_iters,
                               eps=_SLOT_EPS, stretch=stretch)

    def const_spec(shape):   # replicated (grid-invariant) parameter block
        return pl.BlockSpec(shape, lambda b: (0,) * len(shape))

    sel_flat, nda, fa = pl.pallas_call(
        kernel,
        out_shape=(
            jax.ShapeDtypeStruct((B, num_slots, L * D), jnp.float32),
            jax.ShapeDtypeStruct((B, num_slots, L), jnp.float32),
            jax.ShapeDtypeStruct((B, S, L), jnp.float32),
        ),
        grid=(B // TB,),
        in_specs=[
            pl.BlockSpec((TB, L, D), lambda b: (b, 0, 0)),          # x
            pl.BlockSpec((TB, L * D), lambda b: (b, 0)),            # x flat (lane-dense)
            pl.BlockSpec((TB, 1, L), lambda b: (b, 0, 0)),          # mask
            pl.BlockSpec((TB, num_slots, D), lambda b: (b, 0, 0)),  # noise
            const_spec((L, L * D)),                                 # expansion matrix
            const_spec((D, 3 * D)),                                 # enc_wqkv
            const_spec((3, D, D)),                                  # enc_wm
            const_spec((1, 3 * D)),                                 # enc_bqkv
            const_spec((7, D)),                                     # enc_vecs
            const_spec((D, D)),                                     # sa_wq
            const_spec((D, 2 * D)),                                 # sa_wkv
            const_spec((1, 2 * D)),                                 # sa_bkv
            const_spec((2, D, D)),                                  # sa_wm
            const_spec((12, D)),                                    # sa_vecs
            const_spec((D, 3 * D)),                                 # gru_wx
            const_spec((D, 3 * D)),                                 # gru_wh
            const_spec((2, 3 * D)),                                 # gru_b
        ],
        out_specs=(
            pl.BlockSpec((TB, num_slots, L * D), lambda b: (b, 0, 0)),
            pl.BlockSpec((TB, num_slots, L), lambda b: (b, 0, 0)),
            pl.BlockSpec((TB, S, L), lambda b: (b, 0, 0)),
        ),
        compiler_params=pltpu.CompilerParams(
            dimension_semantics=("parallel",)),   # batch tiles are independent (v7x 2 TCs)
    )(x, x_flat, mask3, noise, expand,
      params["enc_wqkv"], params["enc_wm"], params["enc_bqkv"], params["enc_vecs"],
      params["sa_wq"], params["sa_wkv"], params["sa_bkv"], params["sa_wm"], params["sa_vecs"],
      params["gru_wx"], params["gru_wh"], params["gru_b"])

    selections = sel_flat.reshape(B, num_slots, L, D)   # free metadata reshape
    return selections, nda, fa


if __name__ == "__main__":
    B, L, D = 2, 8, 32
    num_slots, num_iters, stretch = 3, 3, True

    key = jax.random.PRNGKey(0)
    k_params, k_x, k_noise = jax.random.split(key, 3)

    params = init_params(k_params, D)
    input_embeds = jax.random.normal(k_x, (B, L, D), jnp.float32)
    mask = jnp.ones((B, L), jnp.float32).at[1, L - 2:].set(0.0)
    # reparameterized Gaussian noise for the random slots (torch.randn in forward)
    noise = jax.random.normal(k_noise, (B, num_slots, D), jnp.float32)

    selections, non_default_attention, full_attention = entity_extractor_forward(
        params, input_embeds, mask, noise, num_iters=num_iters, stretch=stretch)
    jax.block_until_ready((selections, non_default_attention, full_attention))

    assert selections.shape == (B, num_slots, L, D)
    assert non_default_attention.shape == (B, num_slots, L)
    assert full_attention.shape == (B, 1 + num_slots, L)

    # internal consistency: selections must equal attention-weighted inputs
    ref_sel = non_default_attention[..., None] * input_embeds[:, None]
    assert bool(jnp.allclose(selections, ref_sel, atol=1e-5))

    # masked key positions must receive (near-)zero attention mass pre-stretch
    assert bool(jnp.all(full_attention[1, :, L - 2:] <= 1e-6 * 1.2))

    print("KERNEL_OK")
</pallas_src>

<mosaic_0001>
module attributes {stable_mosaic.version = 11 : i64} {
  func.func @_fused_kernel(%arg0: i32, %arg1: memref<2x8x32xf32, #tpu.memory_space<vmem>>, %arg2: memref<2x256xf32, #tpu.memory_space<vmem>>, %arg3: memref<2x1x8xf32, #tpu.memory_space<vmem>>, %arg4: memref<2x3x32xf32, #tpu.memory_space<vmem>>, %arg5: memref<8x256xf32, #tpu.memory_space<vmem>>, %arg6: memref<32x96xf32, #tpu.memory_space<vmem>>, %arg7: memref<3x32x32xf32, #tpu.memory_space<vmem>>, %arg8: memref<1x96xf32, #tpu.memory_space<vmem>>, %arg9: memref<7x32xf32, #tpu.memory_space<vmem>>, %arg10: memref<32x32xf32, #tpu.memory_space<vmem>>, %arg11: memref<32x64xf32, #tpu.memory_space<vmem>>, %arg12: memref<1x64xf32, #tpu.memory_space<vmem>>, %arg13: memref<2x32x32xf32, #tpu.memory_space<vmem>>, %arg14: memref<12x32xf32, #tpu.memory_space<vmem>>, %arg15: memref<32x96xf32, #tpu.memory_space<vmem>>, %arg16: memref<32x96xf32, #tpu.memory_space<vmem>>, %arg17: memref<2x96xf32, #tpu.memory_space<vmem>>, %arg18: memref<2x3x256xf32, #tpu.memory_space<vmem>>, %arg19: memref<2x3x8xf32, #tpu.memory_space<vmem>>, %arg20: memref<2x4x8xf32, #tpu.memory_space<vmem>>) attributes {dimension_semantics = [#tpu.dimension_semantics<parallel>], iteration_bounds = array<i64: 1>, scalar_prefetch = 0 : i64, scratch_operands = 0 : i64, tpu.core_type = #tpu.core_type<tc>, window_params = [{transform_indices = @transform_0, window_bounds = array<i64: 2, 8, 32>}, {transform_indices = @transform_1, window_bounds = array<i64: 2, 256>}, {transform_indices = @transform_2, window_bounds = array<i64: 2, 1, 8>}, {transform_indices = @transform_3, window_bounds = array<i64: 2, 3, 32>}, {pipeline_mode = #tpu.pipeline_mode<synchronous>, transform_indices = @transform_4, window_bounds = array<i64: 8, 256>}, {pipeline_mode = #tpu.pipeline_mode<synchronous>, transform_indices = @transform_5, window_bounds = array<i64: 32, 96>}, {pipeline_mode = #tpu.pipeline_mode<synchronous>, transform_indices = @transform_6, window_bounds = array<i64: 3, 32, 32>}, {pipeline_mode = #tpu.pipeline_mode<synchronous>, transform_indices = @transform_7, window_bounds = array<i64: 1, 96>}, {pipeline_mode = #tpu.pipeline_mode<synchronous>, transform_indices = @transform_8, window_bounds = array<i64: 7, 32>}, {pipeline_mode = #tpu.pipeline_mode<synchronous>, transform_indices = @transform_9, window_bounds = array<i64: 32, 32>}, {pipeline_mode = #tpu.pipeline_mode<synchronous>, transform_indices = @transform_10, window_bounds = array<i64: 32, 64>}, {pipeline_mode = #tpu.pipeline_mode<synchronous>, transform_indices = @transform_11, window_bounds = array<i64: 1, 64>}, {pipeline_mode = #tpu.pipeline_mode<synchronous>, transform_indices = @transform_12, window_bounds = array<i64: 2, 32, 32>}, {pipeline_mode = #tpu.pipeline_mode<synchronous>, transform_indices = @transform_13, window_bounds = array<i64: 12, 32>}, {pipeline_mode = #tpu.pipeline_mode<synchronous>, transform_indices = @transform_14, window_bounds = array<i64: 32, 96>}, {pipeline_mode = #tpu.pipeline_mode<synchronous>, transform_indices = @transform_15, window_bounds = array<i64: 32, 96>}, {pipeline_mode = #tpu.pipeline_mode<synchronous>, transform_indices = @transform_16, window_bounds = array<i64: 2, 96>}, {transform_indices = @transform_17, window_bounds = array<i64: 2, 3, 256>}, {transform_indices = @transform_18, window_bounds = array<i64: 2, 3, 8>}, {transform_indices = @transform_19, window_bounds = array<i64: 2, 4, 8>}]} {
    %c0 = arith.constant 0 : index
    %c0_0 = arith.constant 0 : index
    %c0_1 = arith.constant 0 : index
    %0 = vector.load %arg1[%c0, %c0_0, %c0_1] : memref<2x8x32xf32, #tpu.memory_space<vmem>>, vector<2x8x32xf32>
    %c0_2 = arith.constant 0 : index
    %c0_3 = arith.constant 0 : index
    %c0_4 = arith.constant 0 : index
    %1 = vector.load %arg3[%c0_2, %c0_3, %c0_4] : memref<2x1x8xf32, #tpu.memory_space<vmem>>, vector<2x1x8xf32>
    %c0_5 = arith.constant 0 : index
    %c0_6 = arith.constant 0 : index
    %c0_7 = arith.constant 0 : index
    %2 = vector.load %arg4[%c0_5, %c0_6, %c0_7] : memref<2x3x32xf32, #tpu.memory_space<vmem>>, vector<2x3x32xf32>
    %3 = vector.shape_cast %0 : vector<2x8x32xf32> to vector<16x32xf32>
    %c0_8 = arith.constant 0 : index
    %c0_9 = arith.constant 0 : index
    %4 = vector.load %arg6[%c0_8, %c0_9] : memref<32x96xf32, #tpu.memory_space<vmem>>, vector<32x96xf32>
    %cst = arith.constant dense<0.000000e+00> : vector<16x96xf32>
    %5 = tpu.matmul %3, %4, %cst {dimension_numbers = #tpu.dot_dimension_numbers<[1], [0], [0], [1], [0, 0, 1, 1], [], []>} : vector<16x32xf32>, vector<32x96xf32>, vector<16x96xf32> -> vector<16x96xf32>
    %c0_10 = arith.constant 0 : index
    %c0_11 = arith.constant 0 : index
    %6 = vector.load %arg8[%c0_10, %c0_11] : memref<1x96xf32, #tpu.memory_space<vmem>>, vector<1x96xf32>
    %7 = vector.broadcast %6 : vector<1x96xf32> to vector<16x96xf32>
    %8 = arith.addf %5, %7 : vector<16x96xf32>
    %9 = vector.shape_cast %8 : vector<16x96xf32> to vector<2x8x96xf32>
    %10 = vector.extract_strided_slice %9 {offsets = [0, 0, 0], sizes = [2, 8, 32], strides = [1, 1, 1]} : vector<2x8x96xf32> to vector<2x8x32xf32>
    %11 = vector.extract_strided_slice %9 {offsets = [0, 0, 32], sizes = [2, 8, 32], strides = [1, 1, 1]} : vector<2x8x96xf32> to vector<2x8x32xf32>
    %12 = vector.extract_strided_slice %9 {offsets = [0, 0, 64], sizes = [2, 8, 32], strides = [1, 1, 1]} : vector<2x8x96xf32> to vector<2x8x32xf32>
    %cst_12 = arith.constant 1.000000e+00 : f32
    %13 = vector.broadcast %cst_12 : f32 to vector<2x1x8xf32>
    %14 = arith.subf %1, %13 : vector<2x1x8xf32>
    %cst_13 = arith.constant 1.000000e+09 : f32
    %15 = vector.broadcast %cst_13 : f32 to vector<2x1x8xf32>
    %16 = arith.mulf %14, %15 : vector<2x1x8xf32>
    "tpu.trace_start"() <{level = 10 : i32, message = "bqd,bkd->bqk"}> : () -> ()
    %cst_14 = arith.constant dense<0.000000e+00> : vector<2x8x8xf32>
    %17 = tpu.matmul %10, %11, %cst_14 {dimension_numbers = #tpu.dot_dimension_numbers<[2], [2], [1], [1], [0, 0, 0, 1, 1, 1], [0], [0]>} : vector<2x8x32xf32>, vector<2x8x32xf32>, vector<2x8x8xf32> -> vector<2x8x8xf32>
    "tpu.trace_stop"() : () -> ()
    %cst_15 = arith.constant 0.176776692 : f32
    %18 = vector.broadcast %cst_15 : f32 to vector<2x8x8xf32>
    %19 = arith.mulf %17, %18 : vector<2x8x8xf32>
    %20 = vector.broadcast %16 : vector<2x1x8xf32> to vector<2x8x8xf32>
    %21 = arith.addf %19, %20 : vector<2x8x8xf32>
    %cst_16 = arith.constant dense<0xFF800000> : vector<2x8xf32>
    %22 = vector.multi_reduction <maximumf>, %21, %cst_16 [2] : vector<2x8x8xf32> to vector<2x8xf32>
    %23 = vector.shape_cast %22 : vector<2x8xf32> to vector<2x8x1xf32>
    %24 = vector.broadcast %23 : vector<2x8x1xf32> to vector<2x8x8xf32>
    %25 = arith.subf %21, %24 : vector<2x8x8xf32>
    %26 = math.exp %25 : vector<2x8x8xf32>
    %cst_17 = arith.constant dense<0.000000e+00> : vector<2x8xf32>
    %27 = vector.multi_reduction <add>, %26, %cst_17 [2] : vector<2x8x8xf32> to vector<2x8xf32>
    %28 = vector.shape_cast %27 : vector<2x8xf32> to vector<2x8x1xf32>
    %29 = tpu.reciprocal %28 {approx = true} : vector<2x8x1xf32> -> vector<2x8x1xf32>
    %30 = vector.broadcast %29 : vector<2x8x1xf32> to vector<2x8x8xf32>
    %31 = arith.mulf %26, %30 : vector<2x8x8xf32>
    "tpu.trace_start"() <{level = 10 : i32, message = "bqk,bkd->bqd"}> : () -> ()
    %cst_18 = arith.constant dense<0.000000e+00> : vector<2x8x32xf32>
    %32 = tpu.matmul %31, %12, %cst_18 {dimension_numbers = #tpu.dot_dimension_numbers<[2], [1], [1], [2], [0, 0, 0, 1, 1, 2], [0], [0]>} : vector<2x8x8xf32>, vector<2x8x32xf32>, vector<2x8x32xf32> -> vector<2x8x32xf32>
    "tpu.trace_stop"() : () -> ()
    %33 = vector.shape_cast %32 : vector<2x8x32xf32> to vector<16x32xf32>
    %c0_19 = arith.constant 0 : index
    %c0_20 = arith.constant 0 : index
    %34 = vector.load %arg9[%c0_19, %c0_20] : memref<7x32xf32, #tpu.memory_space<vmem>>, vector<1x32xf32>
    %c1 = arith.constant 1 : index
    %c0_21 = arith.constant 0 : index
    %35 = vector.load %arg9[%c1, %c0_21] : memref<7x32xf32, #tpu.memory_space<vmem>>, vector<1x32xf32>
    %c2 = arith.constant 2 : index
    %c0_22 = arith.constant 0 : index
    %36 = vector.load %arg9[%c2, %c0_22] : memref<7x32xf32, #tpu.memory_space<vmem>>, vector<1x32xf32>
    %c3 = arith.constant 3 : index
    %c0_23 = arith.constant 0 : index
    %37 = vector.load %arg9[%c3, %c0_23] : memref<7x32xf32, #tpu.memory_space<vmem>>, vector<1x32xf32>
    %c4 = arith.constant 4 : index
    %c0_24 = arith.constant 0 : index
    %38 = vector.load %arg9[%c4, %c0_24] : memref<7x32xf32, #tpu.memory_space<vmem>>, vector<1x32xf32>
    %c5 = arith.constant 5 : index
    %c0_25 = arith.constant 0 : index
    %39 = vector.load %arg9[%c5, %c0_25] : memref<7x32xf32, #tpu.memory_space<vmem>>, vector<1x32xf32>
    %c6 = arith.constant 6 : index
    %c0_26 = arith.constant 0 : index
    %40 = vector.load %arg9[%c6, %c0_26] : memref<7x32xf32, #tpu.memory_space<vmem>>, vector<1x32xf32>
    %c0_27 = arith.constant 0 : index
    %c0_28 = arith.constant 0 : index
    %c0_29 = arith.constant 0 : index
    %41 = vector.load %arg7[%c0_27, %c0_28, %c0_29] : memref<3x32x32xf32, #tpu.memory_space<vmem>>, vector<1x32x32xf32>
    %42 = vector.shape_cast %41 : vector<1x32x32xf32> to vector<32x32xf32>
    %cst_30 = arith.constant dense<0.000000e+00> : vector<16x32xf32>
    %43 = tpu.matmul %33, %42, %cst_30 {dimension_numbers = #tpu.dot_dimension_numbers<[1], [0], [0], [1], [0, 0, 1, 1], [], []>} : vector<16x32xf32>, vector<32x32xf32>, vector<16x32xf32> -> vector<16x32xf32>
    %44 = vector.broadcast %34 : vector<1x32xf32> to vector<16x32xf32>
    %45 = arith.addf %43, %44 : vector<16x32xf32>
    %46 = arith.addf %3, %45 : vector<16x32xf32>
    %cst_31 = arith.constant dense<0.000000e+00> : vector<16xf32>
    %47 = vector.multi_reduction <add>, %46, %cst_31 [1] : vector<16x32xf32> to vector<16xf32>
    %48 = vector.shape_cast %47 : vector<16xf32> to vector<16x1xf32>
    %cst_32 = arith.constant 3.200000e+01 : f32
    %49 = vector.broadcast %cst_32 : f32 to vector<16x1xf32>
    %50 = arith.divf %48, %49 : vector<16x1xf32>
    %51 = vector.broadcast %50 : vector<16x1xf32> to vector<16x32xf32>
    %52 = arith.subf %46, %51 : vector<16x32xf32>
    %53 = arith.mulf %52, %52 : vector<16x32xf32>
    %cst_33 = arith.constant dense<0.000000e+00> : vector<16xf32>
    %54 = vector.multi_reduction <add>, %53, %cst_33 [1] : vector<16x32xf32> to vector<16xf32>
    %55 = vector.shape_cast %54 : vector<16xf32> to vector<16x1xf32>
    %cst_34 = arith.constant 3.200000e+01 : f32
    %56 = vector.broadcast %cst_34 : f32 to vector<16x1xf32>
    %57 = arith.divf %55, %56 : vector<16x1xf32>
    %58 = vector.broadcast %50 : vector<16x1xf32> to vector<16x32xf32>
    %59 = arith.subf %46, %58 : vector<16x32xf32>
    %cst_35 = arith.constant 9.99999974E-6 : f32
    %60 = vector.broadcast %cst_35 : f32 to vector<16x1xf32>
    %61 = arith.addf %57, %60 : vector<16x1xf32>
    %62 = math.rsqrt %61 : vector<16x1xf32>
    %63 = vector.broadcast %62 : vector<16x1xf32> to vector<16x32xf32>
    %64 = arith.mulf %59, %63 : vector<16x32xf32>
    %65 = vector.broadcast %37 : vector<1x32xf32> to vector<16x32xf32>
    %66 = arith.mulf %64, %65 : vector<16x32xf32>
    %67 = vector.broadcast %38 : vector<1x32xf32> to vector<16x32xf32>
    %68 = arith.addf %66, %67 : vector<16x32xf32>
    %c1_36 = arith.constant 1 : index
    %c0_37 = arith.constant 0 : index
    %c0_38 = arith.constant 0 : index
    %69 = vector.load %arg7[%c1_36, %c0_37, %c0_38] : memref<3x32x32xf32, #tpu.memory_space<vmem>>, vector<1x32x32xf32>
    %70 = vector.shape_cast %69 : vector<1x32x32xf32> to vector<32x32xf32>
    %cst_39 = arith.constant dense<0.000000e+00> : vector<16x32xf32>
    %71 = tpu.matmul %68, %70, %cst_39 {dimension_numbers = #tpu.dot_dimension_numbers<[1], [0], [0], [1], [0, 0, 1, 1], [], []>} : vector<16x32xf32>, vector<32x32xf32>, vector<16x32xf32> -> vector<16x32xf32>
    %72 = vector.broadcast %35 : vector<1x32xf32> to vector<16x32xf32>
    %73 = arith.addf %71, %72 : vector<16x32xf32>
    %cst_40 = arith.constant 0.000000e+00 : f32
    %74 = vector.broadcast %cst_40 : f32 to vector<16x32xf32>
    %75 = arith.maximumf %73, %74 : vector<16x32xf32>
    %c2_41 = arith.constant 2 : index
    %c0_42 = arith.constant 0 : index
    %c0_43 = arith.constant 0 : index
    %76 = vector.load %arg7[%c2_41, %c0_42, %c0_43] : memref<3x32x32xf32, #tpu.memory_space<vmem>>, vector<1x32x32xf32>
    %77 = vector.shape_cast %76 : vector<1x32x32xf32> to vector<32x32xf32>
    %cst_44 = arith.constant dense<0.000000e+00> : vector<16x32xf32>
    %78 = tpu.matmul %75, %77, %cst_44 {dimension_numbers = #tpu.dot_dimension_numbers<[1], [0], [0], [1], [0, 0, 1, 1], [], []>} : vector<16x32xf32>, vector<32x32xf32>, vector<16x32xf32> -> vector<16x32xf32>
    %79 = vector.broadcast %36 : vector<1x32xf32> to vector<16x32xf32>
    %80 = arith.addf %78, %79 : vector<16x32xf32>
    %81 = arith.addf %68, %80 : vector<16x32xf32>
    %cst_45 = arith.constant dense<0.000000e+00> : vector<16xf32>
    %82 = vector.multi_reduction <add>, %81, %cst_45 [1] : vector<16x32xf32> to vector<16xf32>
    %83 = vector.shape_cast %82 : vector<16xf32> to vector<16x1xf32>
    %cst_46 = arith.constant 3.200000e+01 : f32
    %84 = vector.broadcast %cst_46 : f32 to vector<16x1xf32>
    %85 = arith.divf %83, %84 : vector<16x1xf32>
    %86 = vector.broadcast %85 : vector<16x1xf32> to vector<16x32xf32>
    %87 = arith.subf %81, %86 : vector<16x32xf32>
    %88 = arith.mulf %87, %87 : vector<16x32xf32>
    %cst_47 = arith.constant dense<0.000000e+00> : vector<16xf32>
    %89 = vector.multi_reduction <add>, %88, %cst_47 [1] : vector<16x32xf32> to vector<16xf32>
    %90 = vector.shape_cast %89 : vector<16xf32> to vector<16x1xf32>
    %cst_48 = arith.constant 3.200000e+01 : f32
    %91 = vector.broadcast %cst_48 : f32 to vector<16x1xf32>
    %92 = arith.divf %90, %91 : vector<16x1xf32>
    %93 = vector.broadcast %85 : vector<16x1xf32> to vector<16x32xf32>
    %94 = arith.subf %81, %93 : vector<16x32xf32>
    %cst_49 = arith.constant 9.99999974E-6 : f32
    %95 = vector.broadcast %cst_49 : f32 to vector<16x1xf32>
    %96 = arith.addf %92, %95 : vector<16x1xf32>
    %97 = math.rsqrt %96 : vector<16x1xf32>
    %98 = vector.broadcast %97 : vector<16x1xf32> to vector<16x32xf32>
    %99 = arith.mulf %94, %98 : vector<16x32xf32>
    %100 = vector.broadcast %39 : vector<1x32xf32> to vector<16x32xf32>
    %101 = arith.mulf %99, %100 : vector<16x32xf32>
    %102 = vector.broadcast %40 : vector<1x32xf32> to vector<16x32xf32>
    %103 = arith.addf %101, %102 : vector<16x32xf32>
    %c0_50 = arith.constant 0 : index
    %c0_51 = arith.constant 0 : index
    %104 = vector.load %arg14[%c0_50, %c0_51] : memref<12x32xf32, #tpu.memory_space<vmem>>, vector<1x32xf32>
    %c1_52 = arith.constant 1 : index
    %c0_53 = arith.constant 0 : index
    %105 = vector.load %arg14[%c1_52, %c0_53] : memref<12x32xf32, #tpu.memory_space<vmem>>, vector<1x32xf32>
    %c2_54 = arith.constant 2 : index
    %c0_55 = arith.constant 0 : index
    %106 = vector.load %arg14[%c2_54, %c0_55] : memref<12x32xf32, #tpu.memory_space<vmem>>, vector<1x32xf32>
    %c3_56 = arith.constant 3 : index
    %c0_57 = arith.constant 0 : index
    %107 = vector.load %arg14[%c3_56, %c0_57] : memref<12x32xf32, #tpu.memory_space<vmem>>, vector<1x32xf32>
    %c4_58 = arith.constant 4 : index
    %c0_59 = arith.constant 0 : index
    %108 = vector.load %arg14[%c4_58, %c0_59] : memref<12x32xf32, #tpu.memory_space<vmem>>, vector<1x32xf32>
    %c5_60 = arith.constant 5 : index
    %c0_61 = arith.constant 0 : index
    %109 = vector.load %arg14[%c5_60, %c0_61] : memref<12x32xf32, #tpu.memory_space<vmem>>, vector<1x32xf32>
    %c6_62 = arith.constant 6 : index
    %c0_63 = arith.constant 0 : index
    %110 = vector.load %arg14[%c6_62, %c0_63] : memref<12x32xf32, #tpu.memory_space<vmem>>, vector<1x32xf32>
    %c7 = arith.constant 7 : index
    %c0_64 = arith.constant 0 : index
    %111 = vector.load %arg14[%c7, %c0_64] : memref<12x32xf32, #tpu.memory_space<vmem>>, vector<1x32xf32>
    %c8 = arith.constant 8 : index
    %c0_65 = arith.constant 0 : index
    %112 = vector.load %arg14[%c8, %c0_65] : memref<12x32xf32, #tpu.memory_space<vmem>>, vector<1x32xf32>
    %c9 = arith.constant 9 : index
    %c0_66 = arith.constant 0 : index
    %113 = vector.load %arg14[%c9, %c0_66] : memref<12x32xf32, #tpu.memory_space<vmem>>, vector<1x32xf32>
    %c10 = arith.constant 10 : index
    %c0_67 = arith.constant 0 : index
    %114 = vector.load %arg14[%c10, %c0_67] : memref<12x32xf32, #tpu.memory_space<vmem>>, vector<1x32xf32>
    %c11 = arith.constant 11 : index
    %c0_68 = arith.constant 0 : index
    %115 = vector.load %arg14[%c11, %c0_68] : memref<12x32xf32, #tpu.memory_space<vmem>>, vector<1x32xf32>
    %116 = math.exp %114 : vector<1x32xf32>
    %117 = vector.shape_cast %116 : vector<1x32xf32> to vector<1x1x32xf32>
    %118 = vector.broadcast %117 : vector<1x1x32xf32> to vector<2x3x32xf32>
    %119 = arith.mulf %118, %2 : vector<2x3x32xf32>
    %120 = vector.shape_cast %113 : vector<1x32xf32> to vector<1x1x32xf32>
    %121 = vector.broadcast %120 : vector<1x1x32xf32> to vector<2x3x32xf32>
    %122 = arith.addf %121, %119 : vector<2x3x32xf32>
    %123 = vector.shape_cast %115 : vector<1x32xf32> to vector<1x1x32xf32>
    %124 = vector.shape_cast %123 : vector<1x1x32xf32> to vector<1x1x32xf32>
    %125 = vector.broadcast %124 : vector<1x1x32xf32> to vector<2x1x32xf32>
    %126 = tpu.concatenate %125, %122 in 1 : vector<2x1x32xf32>, vector<2x3x32xf32> -> vector<2x4x32xf32>
    %cst_69 = arith.constant dense<0.000000e+00> : vector<16xf32>
    %127 = vector.multi_reduction <add>, %103, %cst_69 [1] : vector<16x32xf32> to vector<16xf32>
    %128 = vector.shape_cast %127 : vector<16xf32> to vector<16x1xf32>
    %cst_70 = arith.constant 3.200000e+01 : f32
    %129 = vector.broadcast %cst_70 : f32 to vector<16x1xf32>
    %130 = arith.divf %128, %129 : vector<16x1xf32>
    %131 = vector.broadcast %130 : vector<16x1xf32> to vector<16x32xf32>
    %132 = arith.subf %103, %131 : vector<16x32xf32>
    %133 = arith.mulf %132, %132 : vector<16x32xf32>
    %cst_71 = arith.constant dense<0.000000e+00> : vector<16xf32>
    %134 = vector.multi_reduction <add>, %133, %cst_71 [1] : vector<16x32xf32> to vector<16xf32>
    %135 = vector.shape_cast %134 : vector<16xf32> to vector<16x1xf32>
    %cst_72 = arith.constant 3.200000e+01 : f32
    %136 = vector.broadcast %cst_72 : f32 to vector<16x1xf32>
    %137 = arith.divf %135, %136 : vector<16x1xf32>
    %138 = vector.broadcast %130 : vector<16x1xf32> to vector<16x32xf32>
    %139 = arith.subf %103, %138 : vector<16x32xf32>
    %cst_73 = arith.constant 9.99999974E-6 : f32
    %140 = vector.broadcast %cst_73 : f32 to vector<16x1xf32>
    %141 = arith.addf %137, %140 : vector<16x1xf32>
    %142 = math.rsqrt %141 : vector<16x1xf32>
    %143 = vector.broadcast %142 : vector<16x1xf32> to vector<16x32xf32>
    %144 = arith.mulf %139, %143 : vector<16x32xf32>
    %145 = vector.broadcast %107 : vector<1x32xf32> to vector<16x32xf32>
    %146 = arith.mulf %144, %145 : vector<16x32xf32>
    %147 = vector.broadcast %108 : vector<1x32xf32> to vector<16x32xf32>
    %148 = arith.addf %146, %147 : vector<16x32xf32>
    %c0_74 = arith.constant 0 : index
    %c0_75 = arith.constant 0 : index
    %149 = vector.load %arg11[%c0_74, %c0_75] : memref<32x64xf32, #tpu.memory_space<vmem>>, vector<32x64xf32>
    %cst_76 = arith.constant dense<0.000000e+00> : vector<16x64xf32>
    %150 = tpu.matmul %148, %149, %cst_76 {dimension_numbers = #tpu.dot_dimension_numbers<[1], [0], [0], [1], [0, 0, 1, 1], [], []>} : vector<16x32xf32>, vector<32x64xf32>, vector<16x64xf32> -> vector<16x64xf32>
    %c0_77 = arith.constant 0 : index
    %c0_78 = arith.constant 0 : index
    %151 = vector.load %arg12[%c0_77, %c0_78] : memref<1x64xf32, #tpu.memory_space<vmem>>, vector<1x64xf32>
    %152 = vector.broadcast %151 : vector<1x64xf32> to vector<16x64xf32>
    %153 = arith.addf %150, %152 : vector<16x64xf32>
    %154 = vector.shape_cast %153 : vector<16x64xf32> to vector<2x8x64xf32>
    %155 = vector.extract_strided_slice %154 {offsets = [0, 0, 0], sizes = [2, 8, 32], strides = [1, 1, 1]} : vector<2x8x64xf32> to vector<2x8x32xf32>
    %156 = vector.extract_strided_slice %154 {offsets = [0, 0, 32], sizes = [2, 8, 32], strides = [1, 1, 1]} : vector<2x8x64xf32> to vector<2x8x32xf32>
    %c0_79 = arith.constant 0 : index
    %c0_80 = arith.constant 0 : index
    %157 = vector.load %arg10[%c0_79, %c0_80] : memref<32x32xf32, #tpu.memory_space<vmem>>, vector<32x32xf32>
    %158 = vector.shape_cast %157 : vector<32x32xf32> to vector<1x32x32xf32>
    %159 = vector.shape_cast %158 : vector<1x32x32xf32> to vector<1x32x32xf32>
    %160 = vector.broadcast %159 : vector<1x32x32xf32> to vector<2x32x32xf32>
    %c0_81 = arith.constant 0 : index
    %c0_82 = arith.constant 0 : index
    %161 = vector.load %arg15[%c0_81, %c0_82] : memref<32x96xf32, #tpu.memory_space<vmem>>, vector<32x96xf32>
    %162 = vector.shape_cast %161 : vector<32x96xf32> to vector<1x32x96xf32>
    %163 = vector.shape_cast %162 : vector<1x32x96xf32> to vector<1x32x96xf32>
    %164 = vector.broadcast %163 : vector<1x32x96xf32> to vector<2x32x96xf32>
    %c0_83 = arith.constant 0 : index
    %c0_84 = arith.constant 0 : index
    %165 = vector.load %arg16[%c0_83, %c0_84] : memref<32x96xf32, #tpu.memory_space<vmem>>, vector<32x96xf32>
    %166 = vector.shape_cast %165 : vector<32x96xf32> to vector<1x32x96xf32>
    %167 = vector.shape_cast %166 : vector<1x32x96xf32> to vector<1x32x96xf32>
    %168 = vector.broadcast %167 : vector<1x32x96xf32> to vector<2x32x96xf32>
    %c0_85 = arith.constant 0 : index
    %c0_86 = arith.constant 0 : index
    %c0_87 = arith.constant 0 : index
    %169 = vector.load %arg13[%c0_85, %c0_86, %c0_87] : memref<2x32x32xf32, #tpu.memory_space<vmem>>, vector<1x32x32xf32>
    %170 = vector.shape_cast %169 : vector<1x32x32xf32> to vector<32x32xf32>
    %171 = vector.shape_cast %170 : vector<32x32xf32> to vector<1x32x32xf32>
    %172 = vector.shape_cast %171 : vector<1x32x32xf32> to vector<1x32x32xf32>
    %173 = vector.broadcast %172 : vector<1x32x32xf32> to vector<2x32x32xf32>
    %c1_88 = arith.constant 1 : index
    %c0_89 = arith.constant 0 : index
    %c0_90 = arith.constant 0 : index
    %174 = vector.load %arg13[%c1_88, %c0_89, %c0_90] : memref<2x32x32xf32, #tpu.memory_space<vmem>>, vector<1x32x32xf32>
    %175 = vector.shape_cast %174 : vector<1x32x32xf32> to vector<32x32xf32>
    %176 = vector.shape_cast %175 : vector<32x32xf32> to vector<1x32x32xf32>
    %177 = vector.shape_cast %176 : vector<1x32x32xf32> to vector<1x32x32xf32>
    %178 = vector.broadcast %177 : vector<1x32x32xf32> to vector<2x32x32xf32>
    %c0_91 = arith.constant 0 : index
    %c0_92 = arith.constant 0 : index
    %179 = vector.load %arg17[%c0_91, %c0_92] : memref<2x96xf32, #tpu.memory_space<vmem>>, vector<1x96xf32>
    %c1_93 = arith.constant 1 : index
    %c0_94 = arith.constant 0 : index
    %180 = vector.load %arg17[%c1_93, %c0_94] : memref<2x96xf32, #tpu.memory_space<vmem>>, vector<1x96xf32>
    %cst_95 = arith.constant dense<0.000000e+00> : vector<2x4xf32>
    %181 = vector.multi_reduction <add>, %126, %cst_95 [2] : vector<2x4x32xf32> to vector<2x4xf32>
    %182 = vector.shape_cast %181 : vector<2x4xf32> to vector<2x4x1xf32>
    %cst_96 = arith.constant 3.200000e+01 : f32
    %183 = vector.broadcast %cst_96 : f32 to vector<2x4x1xf32>
    %184 = arith.divf %182, %183 : vector<2x4x1xf32>
    %185 = vector.broadcast %184 : vector<2x4x1xf32> to vector<2x4x32xf32>
    %186 = arith.subf %126, %185 : vector<2x4x32xf32>
    %187 = arith.mulf %186, %186 : vector<2x4x32xf32>
    %cst_97 = arith.constant dense<0.000000e+00> : vector<2x4xf32>
    %188 = vector.multi_reduction <add>, %187, %cst_97 [2] : vector<2x4x32xf32> to vector<2x4xf32>
    %189 = vector.shape_cast %188 : vector<2x4xf32> to vector<2x4x1xf32>
    %cst_98 = arith.constant 3.200000e+01 : f32
    %190 = vector.broadcast %cst_98 : f32 to vector<2x4x1xf32>
    %191 = arith.divf %189, %190 : vector<2x4x1xf32>
    %192 = vector.broadcast %184 : vector<2x4x1xf32> to vector<2x4x32xf32>
    %193 = arith.subf %126, %192 : vector<2x4x32xf32>
    %cst_99 = arith.constant 9.99999974E-6 : f32
    %194 = vector.broadcast %cst_99 : f32 to vector<2x4x1xf32>
    %195 = arith.addf %191, %194 : vector<2x4x1xf32>
    %196 = math.rsqrt %195 : vector<2x4x1xf32>
    %197 = vector.broadcast %196 : vector<2x4x1xf32> to vector<2x4x32xf32>
    %198 = arith.mulf %193, %197 : vector<2x4x32xf32>
    %199 = vector.shape_cast %109 : vector<1x32xf32> to vector<1x1x32xf32>
    %200 = vector.broadcast %199 : vector<1x1x32xf32> to vector<2x4x32xf32>
    %201 = arith.mulf %198, %200 : vector<2x4x32xf32>
    %202 = vector.shape_cast %110 : vector<1x32xf32> to vector<1x1x32xf32>
    %203 = vector.broadcast %202 : vector<1x1x32xf32> to vector<2x4x32xf32>
    %204 = arith.addf %201, %203 : vector<2x4x32xf32>
    "tpu.trace_start"() <{level = 10 : i32, message = "bsd,bde->bse"}> : () -> ()
    %cst_100 = arith.constant dense<0.000000e+00> : vector<2x4x32xf32>
    %205 = tpu.matmul %204, %160, %cst_100 {dimension_numbers = #tpu.dot_dimension_numbers<[2], [1], [1], [2], [0, 0, 0, 1, 1, 2], [0], [0]>} : vector<2x4x32xf32>, vector<2x32x32xf32>, vector<2x4x32xf32> -> vector<2x4x32xf32>
    "tpu.trace_stop"() : () -> ()
    %206 = vector.shape_cast %104 : vector<1x32xf32> to vector<1x1x32xf32>
    %207 = vector.broadcast %206 : vector<1x1x32xf32> to vector<2x4x32xf32>
    %208 = arith.addf %205, %207 : vector<2x4x32xf32>
    "tpu.trace_start"() <{level = 10 : i32, message = "bid,bjd->bij"}> : () -> ()
    %cst_101 = arith.constant dense<0.000000e+00> : vector<2x4x8xf32>
    %209 = tpu.matmul %208, %155, %cst_101 {dimension_numbers = #tpu.dot_dimension_numbers<[2], [2], [1], [1], [0, 0, 0, 1, 1, 1], [0], [0]>} : vector<2x4x32xf32>, vector<2x8x32xf32>, vector<2x4x8xf32> -> vector<2x4x8xf32>
    "tpu.trace_stop"() : () -> ()
    %cst_102 = arith.constant 0.176776692 : f32
    %210 = vector.broadcast %cst_102 : f32 to vector<2x4x8xf32>
    %211 = arith.mulf %209, %210 : vector<2x4x8xf32>
    %cst_103 = arith.constant dense<0xFF800000> : vector<2x8xf32>
    %212 = vector.multi_reduction <maximumf>, %211, %cst_103 [1] : vector<2x4x8xf32> to vector<2x8xf32>
    %213 = vector.shape_cast %212 : vector<2x8xf32> to vector<2x1x8xf32>
    %214 = vector.broadcast %213 : vector<2x1x8xf32> to vector<2x4x8xf32>
    %215 = arith.subf %211, %214 : vector<2x4x8xf32>
    %216 = math.exp %215 : vector<2x4x8xf32>
    %cst_104 = arith.constant dense<0.000000e+00> : vector<2x8xf32>
    %217 = vector.multi_reduction <add>, %216, %cst_104 [1] : vector<2x4x8xf32> to vector<2x8xf32>
    %218 = vector.shape_cast %217 : vector<2x8xf32> to vector<2x1x8xf32>
    %219 = tpu.reciprocal %218 {approx = true} : vector<2x1x8xf32> -> vector<2x1x8xf32>
    %220 = vector.broadcast %219 : vector<2x1x8xf32> to vector<2x4x8xf32>
    %221 = arith.mulf %216, %220 : vector<2x4x8xf32>
    %cst_105 = arith.constant 9.99999993E-9 : f32
    %222 = vector.broadcast %cst_105 : f32 to vector<2x4x8xf32>
    %223 = arith.addf %221, %222 : vector<2x4x8xf32>
    %224 = vector.broadcast %1 : vector<2x1x8xf32> to vector<2x4x8xf32>
    %225 = arith.mulf %223, %224 : vector<2x4x8xf32>
    %cst_106 = arith.constant dense<0.000000e+00> : vector<2x4xf32>
    %226 = vector.multi_reduction <add>, %225, %cst_106 [2] : vector<2x4x8xf32> to vector<2x4xf32>
    %227 = vector.shape_cast %226 : vector<2x4xf32> to vector<2x4x1xf32>
    %228 = tpu.reciprocal %227 {approx = true} : vector<2x4x1xf32> -> vector<2x4x1xf32>
    %229 = vector.broadcast %228 : vector<2x4x1xf32> to vector<2x4x8xf32>
    %230 = arith.mulf %225, %229 : vector<2x4x8xf32>
    "tpu.trace_start"() <{level = 10 : i32, message = "bij,bjd->bid"}> : () -> ()
    %cst_107 = arith.constant dense<0.000000e+00> : vector<2x4x32xf32>
    %231 = tpu.matmul %230, %156, %cst_107 {dimension_numbers = #tpu.dot_dimension_numbers<[2], [1], [1], [2], [0, 0, 0, 1, 1, 2], [0], [0]>} : vector<2x4x8xf32>, vector<2x8x32xf32>, vector<2x4x32xf32> -> vector<2x4x32xf32>
    "tpu.trace_stop"() : () -> ()
    "tpu.trace_start"() <{level = 10 : i32, message = "bsd,bde->bse"}> : () -> ()
    %cst_108 = arith.constant dense<0.000000e+00> : vector<2x4x96xf32>
    %232 = tpu.matmul %231, %164, %cst_108 {dimension_numbers = #tpu.dot_dimension_numbers<[2], [1], [1], [2], [0, 0, 0, 1, 1, 2], [0], [0]>} : vector<2x4x32xf32>, vector<2x32x96xf32>, vector<2x4x96xf32> -> vector<2x4x96xf32>
    "tpu.trace_stop"() : () -> ()
    %233 = vector.shape_cast %179 : vector<1x96xf32> to vector<1x1x96xf32>
    %234 = vector.broadcast %233 : vector<1x1x96xf32> to vector<2x4x96xf32>
    %235 = arith.addf %232, %234 : vector<2x4x96xf32>
    "tpu.trace_start"() <{level = 10 : i32, message = "bsd,bde->bse"}> : () -> ()
    %cst_109 = arith.constant dense<0.000000e+00> : vector<2x4x96xf32>
    %236 = tpu.matmul %126, %168, %cst_109 {dimension_numbers = #tpu.dot_dimension_numbers<[2], [1], [1], [2], [0, 0, 0, 1, 1, 2], [0], [0]>} : vector<2x4x32xf32>, vector<2x32x96xf32>, vector<2x4x96xf32> -> vector<2x4x96xf32>
    "tpu.trace_stop"() : () -> ()
    %237 = vector.shape_cast %180 : vector<1x96xf32> to vector<1x1x96xf32>
    %238 = vector.broadcast %237 : vector<1x1x96xf32> to vector<2x4x96xf32>
    %239 = arith.addf %236, %238 : vector<2x4x96xf32>
    %240 = vector.extract_strided_slice %235 {offsets = [0, 0, 0], sizes = [2, 4, 32], strides = [1, 1, 1]} : vector<2x4x96xf32> to vector<2x4x32xf32>
    %241 = vector.extract_strided_slice %239 {offsets = [0, 0, 0], sizes = [2, 4, 32], strides = [1, 1, 1]} : vector<2x4x96xf32> to vector<2x4x32xf32>
    %242 = arith.addf %240, %241 : vector<2x4x32xf32>
    %243 = arith.negf %242 : vector<2x4x32xf32>
    %244 = math.exp %243 : vector<2x4x32xf32>
    %cst_110 = arith.constant 1.000000e+00 : f32
    %245 = vector.broadcast %cst_110 : f32 to vector<2x4x32xf32>
    %246 = arith.addf %245, %244 : vector<2x4x32xf32>
    %247 = arith.divf %245, %246 : vector<2x4x32xf32>
    %248 = vector.extract_strided_slice %235 {offsets = [0, 0, 32], sizes = [2, 4, 32], strides = [1, 1, 1]} : vector<2x4x96xf32> to vector<2x4x32xf32>
    %249 = vector.extract_strided_slice %239 {offsets = [0, 0, 32], sizes = [2, 4, 32], strides = [1, 1, 1]} : vector<2x4x96xf32> to vector<2x4x32xf32>
    %250 = arith.addf %248, %249 : vector<2x4x32xf32>
    %251 = arith.negf %250 : vector<2x4x32xf32>
    %252 = math.exp %251 : vector<2x4x32xf32>
    %cst_111 = arith.constant 1.000000e+00 : f32
    %253 = vector.broadcast %cst_111 : f32 to vector<2x4x32xf32>
    %254 = arith.addf %253, %252 : vector<2x4x32xf32>
    %255 = arith.divf %253, %254 : vector<2x4x32xf32>
    %256 = vector.extract_strided_slice %235 {offsets = [0, 0, 64], sizes = [2, 4, 32], strides = [1, 1, 1]} : vector<2x4x96xf32> to vector<2x4x32xf32>
    %257 = vector.extract_strided_slice %239 {offsets = [0, 0, 64], sizes = [2, 4, 32], strides = [1, 1, 1]} : vector<2x4x96xf32> to vector<2x4x32xf32>
    %258 = arith.mulf %247, %257 : vector<2x4x32xf32>
    %259 = arith.addf %256, %258 : vector<2x4x32xf32>
    %260 = math.tanh %259 : vector<2x4x32xf32>
    %cst_112 = arith.constant 1.000000e+00 : f32
    %261 = vector.broadcast %cst_112 : f32 to vector<2x4x32xf32>
    %262 = arith.subf %261, %255 : vector<2x4x32xf32>
    %263 = arith.mulf %262, %260 : vector<2x4x32xf32>
    %264 = arith.mulf %255, %126 : vector<2x4x32xf32>
    %265 = arith.addf %263, %264 : vector<2x4x32xf32>
    %cst_113 = arith.constant dense<0.000000e+00> : vector<2x4xf32>
    %266 = vector.multi_reduction <add>, %265, %cst_113 [2] : vector<2x4x32xf32> to vector<2x4xf32>
    %267 = vector.shape_cast %266 : vector<2x4xf32> to vector<2x4x1xf32>
    %cst_114 = arith.constant 3.200000e+01 : f32
    %268 = vector.broadcast %cst_114 : f32 to vector<2x4x1xf32>
    %269 = arith.divf %267, %268 : vector<2x4x1xf32>
    %270 = vector.broadcast %269 : vector<2x4x1xf32> to vector<2x4x32xf32>
    %271 = arith.subf %265, %270 : vector<2x4x32xf32>
    %272 = arith.mulf %271, %271 : vector<2x4x32xf32>
    %cst_115 = arith.constant dense<0.000000e+00> : vector<2x4xf32>
    %273 = vector.multi_reduction <add>, %272, %cst_115 [2] : vector<2x4x32xf32> to vector<2x4xf32>
    %274 = vector.shape_cast %273 : vector<2x4xf32> to vector<2x4x1xf32>
    %cst_116 = arith.constant 3.200000e+01 : f32
    %275 = vector.broadcast %cst_116 : f32 to vector<2x4x1xf32>
    %276 = arith.divf %274, %275 : vector<2x4x1xf32>
    %277 = vector.broadcast %269 : vector<2x4x1xf32> to vector<2x4x32xf32>
    %278 = arith.subf %265, %277 : vector<2x4x32xf32>
    %cst_117 = arith.constant 9.99999974E-6 : f32
    %279 = vector.broadcast %cst_117 : f32 to vector<2x4x1xf32>
    %280 = arith.addf %276, %279 : vector<2x4x1xf32>
    %281 = math.rsqrt %280 : vector<2x4x1xf32>
    %282 = vector.broadcast %281 : vector<2x4x1xf32> to vector<2x4x32xf32>
    %283 = arith.mulf %278, %282 : vector<2x4x32xf32>
    %284 = vector.shape_cast %111 : vector<1x32xf32> to vector<1x1x32xf32>
    %285 = vector.broadcast %284 : vector<1x1x32xf32> to vector<2x4x32xf32>
    %286 = arith.mulf %283, %285 : vector<2x4x32xf32>
    %287 = vector.shape_cast %112 : vector<1x32xf32> to vector<1x1x32xf32>
    %288 = vector.broadcast %287 : vector<1x1x32xf32> to vector<2x4x32xf32>
    %289 = arith.addf %286, %288 : vector<2x4x32xf32>
    "tpu.trace_start"() <{level = 10 : i32, message = "bsd,bde->bse"}> : () -> ()
    %cst_118 = arith.constant dense<0.000000e+00> : vector<2x4x32xf32>
    %290 = tpu.matmul %289, %173, %cst_118 {dimension_numbers = #tpu.dot_dimension_numbers<[2], [1], [1], [2], [0, 0, 0, 1, 1, 2], [0], [0]>} : vector<2x4x32xf32>, vector<2x32x32xf32>, vector<2x4x32xf32> -> vector<2x4x32xf32>
    "tpu.trace_stop"() : () -> ()
    %291 = vector.shape_cast %105 : vector<1x32xf32> to vector<1x1x32xf32>
    %292 = vector.broadcast %291 : vector<1x1x32xf32> to vector<2x4x32xf32>
    %293 = arith.addf %290, %292 : vector<2x4x32xf32>
    %cst_119 = arith.constant 0.000000e+00 : f32
    %294 = vector.broadcast %cst_119 : f32 to vector<2x4x32xf32>
    %295 = arith.maximumf %293, %294 : vector<2x4x32xf32>
    "tpu.trace_start"() <{level = 10 : i32, message = "bsd,bde->bse"}> : () -> ()
    %cst_120 = arith.constant dense<0.000000e+00> : vector<2x4x32xf32>
    %296 = tpu.matmul %295, %178, %cst_120 {dimension_numbers = #tpu.dot_dimension_numbers<[2], [1], [1], [2], [0, 0, 0, 1, 1, 2], [0], [0]>} : vector<2x4x32xf32>, vector<2x32x32xf32>, vector<2x4x32xf32> -> vector<2x4x32xf32>
    "tpu.trace_stop"() : () -> ()
    %297 = arith.addf %265, %296 : vector<2x4x32xf32>
    %298 = vector.shape_cast %106 : vector<1x32xf32> to vector<1x1x32xf32>
    %299 = vector.broadcast %298 : vector<1x1x32xf32> to vector<2x4x32xf32>
    %300 = arith.addf %297, %299 : vector<2x4x32xf32>
    %cst_121 = arith.constant dense<0.000000e+00> : vector<2x4xf32>
    %301 = vector.multi_reduction <add>, %300, %cst_121 [2] : vector<2x4x32xf32> to vector<2x4xf32>
    %302 = vector.shape_cast %301 : vector<2x4xf32> to vector<2x4x1xf32>
    %cst_122 = arith.constant 3.200000e+01 : f32
    %303 = vector.broadcast %cst_122 : f32 to vector<2x4x1xf32>
    %304 = arith.divf %302, %303 : vector<2x4x1xf32>
    %305 = vector.broadcast %304 : vector<2x4x1xf32> to vector<2x4x32xf32>
    %306 = arith.subf %300, %305 : vector<2x4x32xf32>
    %307 = arith.mulf %306, %306 : vector<2x4x32xf32>
    %cst_123 = arith.constant dense<0.000000e+00> : vector<2x4xf32>
    %308 = vector.multi_reduction <add>, %307, %cst_123 [2] : vector<2x4x32xf32> to vector<2x4xf32>
    %309 = vector.shape_cast %308 : vector<2x4xf32> to vector<2x4x1xf32>
    %cst_124 = arith.constant 3.200000e+01 : f32
    %310 = vector.broadcast %cst_124 : f32 to vector<2x4x1xf32>
    %311 = arith.divf %309, %310 : vector<2x4x1xf32>
    %312 = vector.broadcast %304 : vector<2x4x1xf32> to vector<2x4x32xf32>
    %313 = arith.subf %300, %312 : vector<2x4x32xf32>
    %cst_125 = arith.constant 9.99999974E-6 : f32
    %314 = vector.broadcast %cst_125 : f32 to vector<2x4x1xf32>
    %315 = arith.addf %311, %314 : vector<2x4x1xf32>
    %316 = math.rsqrt %315 : vector<2x4x1xf32>
    %317 = vector.broadcast %316 : vector<2x4x1xf32> to vector<2x4x32xf32>
    %318 = arith.mulf %313, %317 : vector<2x4x32xf32>
    %319 = vector.shape_cast %109 : vector<1x32xf32> to vector<1x1x32xf32>
    %320 = vector.broadcast %319 : vector<1x1x32xf32> to vector<2x4x32xf32>
    %321 = arith.mulf %318, %320 : vector<2x4x32xf32>
    %322 = vector.shape_cast %110 : vector<1x32xf32> to vector<1x1x32xf32>
    %323 = vector.broadcast %322 : vector<1x1x32xf32> to vector<2x4x32xf32>
    %324 = arith.addf %321, %323 : vector<2x4x32xf32>
    "tpu.trace_start"() <{level = 10 : i32, message = "bsd,bde->bse"}> : () -> ()
    %cst_126 = arith.constant dense<0.000000e+00> : vector<2x4x32xf32>
    %325 = tpu.matmul %324, %160, %cst_126 {dimension_numbers = #tpu.dot_dimension_numbers<[2], [1], [1], [2], [0, 0, 0, 1, 1, 2], [0], [0]>} : vector<2x4x32xf32>, vector<2x32x32xf32>, vector<2x4x32xf32> -> vector<2x4x32xf32>
    "tpu.trace_stop"() : () -> ()
    %326 = vector.shape_cast %104 : vector<1x32xf32> to vector<1x1x32xf32>
    %327 = vector.broadcast %326 : vector<1x1x32xf32> to vector<2x4x32xf32>
    %328 = arith.addf %325, %327 : vector<2x4x32xf32>
    "tpu.trace_start"() <{level = 10 : i32, message = "bid,bjd->bij"}> : () -> ()
    %cst_127 = arith.constant dense<0.000000e+00> : vector<2x4x8xf32>
    %329 = tpu.matmul %328, %155, %cst_127 {dimension_numbers = #tpu.dot_dimension_numbers<[2], [2], [1], [1], [0, 0, 0, 1, 1, 1], [0], [0]>} : vector<2x4x32xf32>, vector<2x8x32xf32>, vector<2x4x8xf32> -> vector<2x4x8xf32>
    "tpu.trace_stop"() : () -> ()
    %cst_128 = arith.constant 0.176776692 : f32
    %330 = vector.broadcast %cst_128 : f32 to vector<2x4x8xf32>
    %331 = arith.mulf %329, %330 : vector<2x4x8xf32>
    %cst_129 = arith.constant dense<0xFF800000> : vector<2x8xf32>
    %332 = vector.multi_reduction <maximumf>, %331, %cst_129 [1] : vector<2x4x8xf32> to vector<2x8xf32>
    %333 = vector.shape_cast %332 : vector<2x8xf32> to vector<2x1x8xf32>
    %334 = vector.broadcast %333 : vector<2x1x8xf32> to vector<2x4x8xf32>
    %335 = arith.subf %331, %334 : vector<2x4x8xf32>
    %336 = math.exp %335 : vector<2x4x8xf32>
    %cst_130 = arith.constant dense<0.000000e+00> : vector<2x8xf32>
    %337 = vector.multi_reduction <add>, %336, %cst_130 [1] : vector<2x4x8xf32> to vector<2x8xf32>
    %338 = vector.shape_cast %337 : vector<2x8xf32> to vector<2x1x8xf32>
    %339 = tpu.reciprocal %338 {approx = true} : vector<2x1x8xf32> -> vector<2x1x8xf32>
    %340 = vector.broadcast %339 : vector<2x1x8xf32> to vector<2x4x8xf32>
    %341 = arith.mulf %336, %340 : vector<2x4x8xf32>
    %cst_131 = arith.constant 9.99999993E-9 : f32
    %342 = vector.broadcast %cst_131 : f32 to vector<2x4x8xf32>
    %343 = arith.addf %341, %342 : vector<2x4x8xf32>
    %344 = vector.broadcast %1 : vector<2x1x8xf32> to vector<2x4x8xf32>
    %345 = arith.mulf %343, %344 : vector<2x4x8xf32>
    %cst_132 = arith.constant dense<0.000000e+00> : vector<2x4xf32>
    %346 = vector.multi_reduction <add>, %345, %cst_132 [2] : vector<2x4x8xf32> to vector<2x4xf32>
    %347 = vector.shape_cast %346 : vector<2x4xf32> to vector<2x4x1xf32>
    %348 = tpu.reciprocal %347 {approx = true} : vector<2x4x1xf32> -> vector<2x4x1xf32>
    %349 = vector.broadcast %348 : vector<2x4x1xf32> to vector<2x4x8xf32>
    %350 = arith.mulf %345, %349 : vector<2x4x8xf32>
    "tpu.trace_start"() <{level = 10 : i32, message = "bij,bjd->bid"}> : () -> ()
    %cst_133 = arith.constant dense<0.000000e+00> : vector<2x4x32xf32>
    %351 = tpu.matmul %350, %156, %cst_133 {dimension_numbers = #tpu.dot_dimension_numbers<[2], [1], [1], [2], [0, 0, 0, 1, 1, 2], [0], [0]>} : vector<2x4x8xf32>, vector<2x8x32xf32>, vector<2x4x32xf32> -> vector<2x4x32xf32>
    "tpu.trace_stop"() : () -> ()
    "tpu.trace_start"() <{level = 10 : i32, message = "bsd,bde->bse"}> : () -> ()
    %cst_134 = arith.constant dense<0.000000e+00> : vector<2x4x96xf32>
    %352 = tpu.matmul %351, %164, %cst_134 {dimension_numbers = #tpu.dot_dimension_numbers<[2], [1], [1], [2], [0, 0, 0, 1, 1, 2], [0], [0]>} : vector<2x4x32xf32>, vector<2x32x96xf32>, vector<2x4x96xf32> -> vector<2x4x96xf32>
    "tpu.trace_stop"() : () -> ()
    %353 = vector.shape_cast %179 : vector<1x96xf32> to vector<1x1x96xf32>
    %354 = vector.broadcast %353 : vector<1x1x96xf32> to vector<2x4x96xf32>
    %355 = arith.addf %352, %354 : vector<2x4x96xf32>
    "tpu.trace_start"() <{level = 10 : i32, message = "bsd,bde->bse"}> : () -> ()
    %cst_135 = arith.constant dense<0.000000e+00> : vector<2x4x96xf32>
    %356 = tpu.matmul %300, %168, %cst_135 {dimension_numbers = #tpu.dot_dimension_numbers<[2], [1], [1], [2], [0, 0, 0, 1, 1, 2], [0], [0]>} : vector<2x4x32xf32>, vector<2x32x96xf32>, vector<2x4x96xf32> -> vector<2x4x96xf32>
    "tpu.trace_stop"() : () -> ()
    %357 = vector.shape_cast %180 : vector<1x96xf32> to vector<1x1x96xf32>
    %358 = vector.broadcast %357 : vector<1x1x96xf32> to vector<2x4x96xf32>
    %359 = arith.addf %356, %358 : vector<2x4x96xf32>
    %360 = vector.extract_strided_slice %355 {offsets = [0, 0, 0], sizes = [2, 4, 32], strides = [1, 1, 1]} : vector<2x4x96xf32> to vector<2x4x32xf32>
    %361 = vector.extract_strided_slice %359 {offsets = [0, 0, 0], sizes = [2, 4, 32], strides = [1, 1, 1]} : vector<2x4x96xf32> to vector<2x4x32xf32>
    %362 = arith.addf %360, %361 : vector<2x4x32xf32>
    %363 = arith.negf %362 : vector<2x4x32xf32>
    %364 = math.exp %363 : vector<2x4x32xf32>
    %cst_136 = arith.constant 1.000000e+00 : f32
    %365 = vector.broadcast %cst_136 : f32 to vector<2x4x32xf32>
    %366 = arith.addf %365, %364 : vector<2x4x32xf32>
    %367 = arith.divf %365, %366 : vector<2x4x32xf32>
    %368 = vector.extract_strided_slice %355 {offsets = [0, 0, 32], sizes = [2, 4, 32], strides = [1, 1, 1]} : vector<2x4x96xf32> to vector<2x4x32xf32>
    %369 = vector.extract_strided_slice %359 {offsets = [0, 0, 32], sizes = [2, 4, 32], strides = [1, 1, 1]} : vector<2x4x96xf32> to vector<2x4x32xf32>
    %370 = arith.addf %368, %369 : vector<2x4x32xf32>
    %371 = arith.negf %370 : vector<2x4x32xf32>
    %372 = math.exp %371 : vector<2x4x32xf32>
    %cst_137 = arith.constant 1.000000e+00 : f32
    %373 = vector.broadcast %cst_137 : f32 to vector<2x4x32xf32>
    %374 = arith.addf %373, %372 : vector<2x4x32xf32>
    %375 = arith.divf %373, %374 : vector<2x4x32xf32>
    %376 = vector.extract_strided_slice %355 {offsets = [0, 0, 64], sizes = [2, 4, 32], strides = [1, 1, 1]} : vector<2x4x96xf32> to vector<2x4x32xf32>
    %377 = vector.extract_strided_slice %359 {offsets = [0, 0, 64], sizes = [2, 4, 32], strides = [1, 1, 1]} : vector<2x4x96xf32> to vector<2x4x32xf32>
    %378 = arith.mulf %367, %377 : vector<2x4x32xf32>
    %379 = arith.addf %376, %378 : vector<2x4x32xf32>
    %380 = math.tanh %379 : vector<2x4x32xf32>
    %cst_138 = arith.constant 1.000000e+00 : f32
    %381 = vector.broadcast %cst_138 : f32 to vector<2x4x32xf32>
    %382 = arith.subf %381, %375 : vector<2x4x32xf32>
    %383 = arith.mulf %382, %380 : vector<2x4x32xf32>
    %384 = arith.mulf %375, %300 : vector<2x4x32xf32>
    %385 = arith.addf %383, %384 : vector<2x4x32xf32>
    %cst_139 = arith.constant dense<0.000000e+00> : vector<2x4xf32>
    %386 = vector.multi_reduction <add>, %385, %cst_139 [2] : vector<2x4x32xf32> to vector<2x4xf32>
    %387 = vector.shape_cast %386 : vector<2x4xf32> to vector<2x4x1xf32>
    %cst_140 = arith.constant 3.200000e+01 : f32
    %388 = vector.broadcast %cst_140 : f32 to vector<2x4x1xf32>
    %389 = arith.divf %387, %388 : vector<2x4x1xf32>
    %390 = vector.broadcast %389 : vector<2x4x1xf32> to vector<2x4x32xf32>
    %391 = arith.subf %385, %390 : vector<2x4x32xf32>
    %392 = arith.mulf %391, %391 : vector<2x4x32xf32>
    %cst_141 = arith.constant dense<0.000000e+00> : vector<2x4xf32>
    %393 = vector.multi_reduction <add>, %392, %cst_141 [2] : vector<2x4x32xf32> to vector<2x4xf32>
    %394 = vector.shape_cast %393 : vector<2x4xf32> to vector<2x4x1xf32>
    %cst_142 = arith.constant 3.200000e+01 : f32
    %395 = vector.broadcast %cst_142 : f32 to vector<2x4x1xf32>
    %396 = arith.divf %394, %395 : vector<2x4x1xf32>
    %397 = vector.broadcast %389 : vector<2x4x1xf32> to vector<2x4x32xf32>
    %398 = arith.subf %385, %397 : vector<2x4x32xf32>
    %cst_143 = arith.constant 9.99999974E-6 : f32
    %399 = vector.broadcast %cst_143 : f32 to vector<2x4x1xf32>
    %400 = arith.addf %396, %399 : vector<2x4x1xf32>
    %401 = math.rsqrt %400 : vector<2x4x1xf32>
    %402 = vector.broadcast %401 : vector<2x4x1xf32> to vector<2x4x32xf32>
    %403 = arith.mulf %398, %402 : vector<2x4x32xf32>
    %404 = vector.shape_cast %111 : vector<1x32xf32> to vector<1x1x32xf32>
    %405 = vector.broadcast %404 : vector<1x1x32xf32> to vector<2x4x32xf32>
    %406 = arith.mulf %403, %405 : vector<2x4x32xf32>
    %407 = vector.shape_cast %112 : vector<1x32xf32> to vector<1x1x32xf32>
    %408 = vector.broadcast %407 : vector<1x1x32xf32> to vector<2x4x32xf32>
    %409 = arith.addf %406, %408 : vector<2x4x32xf32>
    "tpu.trace_start"() <{level = 10 : i32, message = "bsd,bde->bse"}> : () -> ()
    %cst_144 = arith.constant dense<0.000000e+00> : vector<2x4x32xf32>
    %410 = tpu.matmul %409, %173, %cst_144 {dimension_numbers = #tpu.dot_dimension_numbers<[2], [1], [1], [2], [0, 0, 0, 1, 1, 2], [0], [0]>} : vector<2x4x32xf32>, vector<2x32x32xf32>, vector<2x4x32xf32> -> vector<2x4x32xf32>
    "tpu.trace_stop"() : () -> ()
    %411 = vector.shape_cast %105 : vector<1x32xf32> to vector<1x1x32xf32>
    %412 = vector.broadcast %411 : vector<1x1x32xf32> to vector<2x4x32xf32>
    %413 = arith.addf %410, %412 : vector<2x4x32xf32>
    %cst_145 = arith.constant 0.000000e+00 : f32
    %414 = vector.broadcast %cst_145 : f32 to vector<2x4x32xf32>
    %415 = arith.maximumf %413, %414 : vector<2x4x32xf32>
    "tpu.trace_start"() <{level = 10 : i32, message = "bsd,bde->bse"}> : () -> ()
    %cst_146 = arith.constant dense<0.000000e+00> : vector<2x4x32xf32>
    %416 = tpu.matmul %415, %178, %cst_146 {dimension_numbers = #tpu.dot_dimension_numbers<[2], [1], [1], [2], [0, 0, 0, 1, 1, 2], [0], [0]>} : vector<2x4x32xf32>, vector<2x32x32xf32>, vector<2x4x32xf32> -> vector<2x4x32xf32>
    "tpu.trace_stop"() : () -> ()
    %417 = arith.addf %385, %416 : vector<2x4x32xf32>
    %418 = vector.shape_cast %106 : vector<1x32xf32> to vector<1x1x32xf32>
    %419 = vector.broadcast %418 : vector<1x1x32xf32> to vector<2x4x32xf32>
    %420 = arith.addf %417, %419 : vector<2x4x32xf32>
    %cst_147 = arith.constant dense<0.000000e+00> : vector<2x4xf32>
    %421 = vector.multi_reduction <add>, %420, %cst_147 [2] : vector<2x4x32xf32> to vector<2x4xf32>
    %422 = vector.shape_cast %421 : vector<2x4xf32> to vector<2x4x1xf32>
    %cst_148 = arith.constant 3.200000e+01 : f32
    %423 = vector.broadcast %cst_148 : f32 to vector<2x4x1xf32>
    %424 = arith.divf %422, %423 : vector<2x4x1xf32>
    %425 = vector.broadcast %424 : vector<2x4x1xf32> to vector<2x4x32xf32>
    %426 = arith.subf %420, %425 : vector<2x4x32xf32>
    %427 = arith.mulf %426, %426 : vector<2x4x32xf32>
    %cst_149 = arith.constant dense<0.000000e+00> : vector<2x4xf32>
    %428 = vector.multi_reduction <add>, %427, %cst_149 [2] : vector<2x4x32xf32> to vector<2x4xf32>
    %429 = vector.shape_cast %428 : vector<2x4xf32> to vector<2x4x1xf32>
    %cst_150 = arith.constant 3.200000e+01 : f32
    %430 = vector.broadcast %cst_150 : f32 to vector<2x4x1xf32>
    %431 = arith.divf %429, %430 : vector<2x4x1xf32>
    %432 = vector.broadcast %424 : vector<2x4x1xf32> to vector<2x4x32xf32>
    %433 = arith.subf %420, %432 : vector<2x4x32xf32>
    %cst_151 = arith.constant 9.99999974E-6 : f32
    %434 = vector.broadcast %cst_151 : f32 to vector<2x4x1xf32>
    %435 = arith.addf %431, %434 : vector<2x4x1xf32>
    %436 = math.rsqrt %435 : vector<2x4x1xf32>
    %437 = vector.broadcast %436 : vector<2x4x1xf32> to vector<2x4x32xf32>
    %438 = arith.mulf %433, %437 : vector<2x4x32xf32>
    %439 = vector.shape_cast %109 : vector<1x32xf32> to vector<1x1x32xf32>
    %440 = vector.broadcast %439 : vector<1x1x32xf32> to vector<2x4x32xf32>
    %441 = arith.mulf %438, %440 : vector<2x4x32xf32>
    %442 = vector.shape_cast %110 : vector<1x32xf32> to vector<1x1x32xf32>
    %443 = vector.broadcast %442 : vector<1x1x32xf32> to vector<2x4x32xf32>
    %444 = arith.addf %441, %443 : vector<2x4x32xf32>
    "tpu.trace_start"() <{level = 10 : i32, message = "bsd,bde->bse"}> : () -> ()
    %cst_152 = arith.constant dense<0.000000e+00> : vector<2x4x32xf32>
    %445 = tpu.matmul %444, %160, %cst_152 {dimension_numbers = #tpu.dot_dimension_numbers<[2], [1], [1], [2], [0, 0, 0, 1, 1, 2], [0], [0]>} : vector<2x4x32xf32>, vector<2x32x32xf32>, vector<2x4x32xf32> -> vector<2x4x32xf32>
    "tpu.trace_stop"() : () -> ()
    %446 = vector.shape_cast %104 : vector<1x32xf32> to vector<1x1x32xf32>
    %447 = vector.broadcast %446 : vector<1x1x32xf32> to vector<2x4x32xf32>
    %448 = arith.addf %445, %447 : vector<2x4x32xf32>
    "tpu.trace_start"() <{level = 10 : i32, message = "bid,bjd->bij"}> : () -> ()
    %cst_153 = arith.constant dense<0.000000e+00> : vector<2x4x8xf32>
    %449 = tpu.matmul %448, %155, %cst_153 {dimension_numbers = #tpu.dot_dimension_numbers<[2], [2], [1], [1], [0, 0, 0, 1, 1, 1], [0], [0]>} : vector<2x4x32xf32>, vector<2x8x32xf32>, vector<2x4x8xf32> -> vector<2x4x8xf32>
    "tpu.trace_stop"() : () -> ()
    %cst_154 = arith.constant 0.176776692 : f32
    %450 = vector.broadcast %cst_154 : f32 to vector<2x4x8xf32>
    %451 = arith.mulf %449, %450 : vector<2x4x8xf32>
    %cst_155 = arith.constant dense<0xFF800000> : vector<2x8xf32>
    %452 = vector.multi_reduction <maximumf>, %451, %cst_155 [1] : vector<2x4x8xf32> to vector<2x8xf32>
    %453 = vector.shape_cast %452 : vector<2x8xf32> to vector<2x1x8xf32>
    %454 = vector.broadcast %453 : vector<2x1x8xf32> to vector<2x4x8xf32>
    %455 = arith.subf %451, %454 : vector<2x4x8xf32>
    %456 = math.exp %455 : vector<2x4x8xf32>
    %cst_156 = arith.constant dense<0.000000e+00> : vector<2x8xf32>
    %457 = vector.multi_reduction <add>, %456, %cst_156 [1] : vector<2x4x8xf32> to vector<2x8xf32>
    %458 = vector.shape_cast %457 : vector<2x8xf32> to vector<2x1x8xf32>
    %459 = tpu.reciprocal %458 {approx = true} : vector<2x1x8xf32> -> vector<2x1x8xf32>
    %460 = vector.broadcast %459 : vector<2x1x8xf32> to vector<2x4x8xf32>
    %461 = arith.mulf %456, %460 : vector<2x4x8xf32>
    %cst_157 = arith.constant 9.99999993E-9 : f32
    %462 = vector.broadcast %cst_157 : f32 to vector<2x4x8xf32>
    %463 = arith.addf %461, %462 : vector<2x4x8xf32>
    %464 = vector.broadcast %1 : vector<2x1x8xf32> to vector<2x4x8xf32>
    %465 = arith.mulf %463, %464 : vector<2x4x8xf32>
    %cst_158 = arith.constant 1.200000e+00 : f32
    %466 = vector.broadcast %cst_158 : f32 to vector<2x4x8xf32>
    %467 = arith.mulf %465, %466 : vector<2x4x8xf32>
    %cst_159 = arith.constant 1.000000e-01 : f32
    %468 = vector.broadcast %cst_159 : f32 to vector<2x4x8xf32>
    %469 = arith.subf %467, %468 : vector<2x4x8xf32>
    %cst_160 = arith.constant 0.000000e+00 : f32
    %cst_161 = arith.constant 1.000000e+00 : f32
    %470 = vector.broadcast %cst_160 : f32 to vector<2x4x8xf32>
    %471 = arith.maximumf %470, %469 : vector<2x4x8xf32>
    %472 = vector.broadcast %cst_161 : f32 to vector<2x4x8xf32>
    %473 = arith.minimumf %472, %471 : vector<2x4x8xf32>
    %c0_162 = arith.constant 0 : index
    %c0_163 = arith.constant 0 : index
    %c0_164 = arith.constant 0 : index
    %474 = vector.load %arg20[%c0_162, %c0_163, %c0_164] : memref<2x4x8xf32, #tpu.memory_space<vmem>>, vector<2x4x8xf32>
    tpu.vector_store %arg20[%c0_162, %c0_163, %c0_164], %473 {strides = array<i32>} : memref<2x4x8xf32, #tpu.memory_space<vmem>>, vector<2x4x8xf32>,
    %475 = vector.extract_strided_slice %473 {offsets = [0, 1, 0], sizes = [2, 3, 8], strides = [1, 1, 1]} : vector<2x4x8xf32> to vector<2x3x8xf32>
    %c0_165 = arith.constant 0 : index
    %c0_166 = arith.constant 0 : index
    %c0_167 = arith.constant 0 : index
    %476 = vector.load %arg19[%c0_165, %c0_166, %c0_167] : memref<2x3x8xf32, #tpu.memory_space<vmem>>, vector<2x3x8xf32>
    tpu.vector_store %arg19[%c0_165, %c0_166, %c0_167], %475 {strides = array<i32>} : memref<2x3x8xf32, #tpu.memory_space<vmem>>, vector<2x3x8xf32>,
    %c0_168 = arith.constant 0 : index
    %c0_169 = arith.constant 0 : index
    %477 = vector.load %arg5[%c0_168, %c0_169] : memref<8x256xf32, #tpu.memory_space<vmem>>, vector<8x256xf32>
    %478 = vector.shape_cast %477 : vector<8x256xf32> to vector<1x8x256xf32>
    %479 = vector.shape_cast %478 : vector<1x8x256xf32> to vector<1x8x256xf32>
    %480 = vector.broadcast %479 : vector<1x8x256xf32> to vector<2x8x256xf32>
    "tpu.trace_start"() <{level = 10 : i32, message = "bsl,blf->bsf"}> : () -> ()
    %cst_170 = arith.constant dense<0.000000e+00> : vector<2x3x256xf32>
    %481 = tpu.matmul %475, %480, %cst_170 {dimension_numbers = #tpu.dot_dimension_numbers<[2], [1], [1], [2], [0, 0, 0, 1, 1, 2], [0], [0]>} : vector<2x3x8xf32>, vector<2x8x256xf32>, vector<2x3x256xf32> -> vector<2x3x256xf32>
    "tpu.trace_stop"() : () -> ()
    %c0_171 = arith.constant 0 : index
    %c0_172 = arith.constant 0 : index
    %482 = vector.load %arg2[%c0_171, %c0_172] : memref<2x256xf32, #tpu.memory_space<vmem>>, vector<2x256xf32>
    %483 = vector.shape_cast %482 : vector<2x256xf32> to vector<2x1x256xf32>
    %484 = vector.broadcast %483 : vector<2x1x256xf32> to vector<2x3x256xf32>
    %485 = arith.mulf %481, %484 : vector<2x3x256xf32>
    %c0_173 = arith.constant 0 : index
    %c0_174 = arith.constant 0 : index
    %c0_175 = arith.constant 0 : index
    %486 = vector.load %arg18[%c0_173, %c0_174, %c0_175] : memref<2x3x256xf32, #tpu.memory_space<vmem>>, vector<2x3x256xf32>
    tpu.vector_store %arg18[%c0_173, %c0_174, %c0_175], %485 {strides = array<i32>} : memref<2x3x256xf32, #tpu.memory_space<vmem>>, vector<2x3x256xf32>,
    return
  }
  func.func @transform_0(%arg0: i32) -> (i32, i32, i32) {
    %c0_i32 = arith.constant 0 : i32
    %c0_i32_0 = arith.constant 0 : i32
    %c0_i32_1 = arith.constant 0 : i32
    return %arg0, %c0_i32, %c0_i32_0 : i32, i32, i32
  }
  func.func @transform_1(%arg0: i32) -> (i32, i32) {
    %c0_i32 = arith.constant 0 : i32
    %c0_i32_0 = arith.constant 0 : i32
    return %arg0, %c0_i32 : i32, i32
  }
  func.func @transform_2(%arg0: i32) -> (i32, i32, i32) {
    %c0_i32 = arith.constant 0 : i32
    %c0_i32_0 = arith.constant 0 : i32
    %c0_i32_1 = arith.constant 0 : i32
    return %arg0, %c0_i32, %c0_i32_0 : i32, i32, i32
  }
  func.func @transform_3(%arg0: i32) -> (i32, i32, i32) {
    %c0_i32 = arith.constant 0 : i32
    %c0_i32_0 = arith.constant 0 : i32
    %c0_i32_1 = arith.constant 0 : i32
    return %arg0, %c0_i32, %c0_i32_0 : i32, i32, i32
  }
  func.func @transform_4(%arg0: i32) -> (i32, i32) {
    %c0_i32 = arith.constant 0 : i32
    %c0_i32_0 = arith.constant 0 : i32
    %c0_i32_1 = arith.constant 0 : i32
    return %c0_i32, %c0_i32_0 : i32, i32
  }
  func.func @transform_5(%arg0: i32) -> (i32, i32) {
    %c0_i32 = arith.constant 0 : i32
    %c0_i32_0 = arith.constant 0 : i32
    %c0_i32_1 = arith.constant 0 : i32
    return %c0_i32, %c0_i32_0 : i32, i32
  }
  func.func @transform_6(%arg0: i32) -> (i32, i32, i32) {
    %c0_i32 = arith.constant 0 : i32
    %c0_i32_0 = arith.constant 0 : i32
    %c0_i32_1 = arith.constant 0 : i32
    %c0_i32_2 = arith.constant 0 : i32
    return %c0_i32, %c0_i32_0, %c0_i32_1 : i32, i32, i32
  }
  func.func @transform_7(%arg0: i32) -> (i32, i32) {
    %c0_i32 = arith.constant 0 : i32
    %c0_i32_0 = arith.constant 0 : i32
    %c0_i32_1 = arith.constant 0 : i32
    return %c0_i32, %c0_i32_0 : i32, i32
  }
  func.func @transform_8(%arg0: i32) -> (i32, i32) {
    %c0_i32 = arith.constant 0 : i32
    %c0_i32_0 = arith.constant 0 : i32
    %c0_i32_1 = arith.constant 0 : i32
    return %c0_i32, %c0_i32_0 : i32, i32
  }
  func.func @transform_9(%arg0: i32) -> (i32, i32) {
    %c0_i32 = arith.constant 0 : i32
    %c0_i32_0 = arith.constant 0 : i32
    %c0_i32_1 = arith.constant 0 : i32
    return %c0_i32, %c0_i32_0 : i32, i32
  }
  func.func @transform_10(%arg0: i32) -> (i32, i32) {
    %c0_i32 = arith.constant 0 : i32
    %c0_i32_0 = arith.constant 0 : i32
    %c0_i32_1 = arith.constant 0 : i32
    return %c0_i32, %c0_i32_0 : i32, i32
  }
  func.func @transform_11(%arg0: i32) -> (i32, i32) {
    %c0_i32 = arith.constant 0 : i32
    %c0_i32_0 = arith.constant 0 : i32
    %c0_i32_1 = arith.constant 0 : i32
    return %c0_i32, %c0_i32_0 : i32, i32
  }
  func.func @transform_12(%arg0: i32) -> (i32, i32, i32) {
    %c0_i32 = arith.constant 0 : i32
    %c0_i32_0 = arith.constant 0 : i32
    %c0_i32_1 = arith.constant 0 : i32
    %c0_i32_2 = arith.constant 0 : i32
    return %c0_i32, %c0_i32_0, %c0_i32_1 : i32, i32, i32
  }
  func.func @transform_13(%arg0: i32) -> (i32, i32) {
    %c0_i32 = arith.constant 0 : i32
    %c0_i32_0 = arith.constant 0 : i32
    %c0_i32_1 = arith.constant 0 : i32
    return %c0_i32, %c0_i32_0 : i32, i32
  }
  func.func @transform_14(%arg0: i32) -> (i32, i32) {
    %c0_i32 = arith.constant 0 : i32
    %c0_i32_0 = arith.constant 0 : i32
    %c0_i32_1 = arith.constant 0 : i32
    return %c0_i32, %c0_i32_0 : i32, i32
  }
  func.func @transform_15(%arg0: i32) -> (i32, i32) {
    %c0_i32 = arith.constant 0 : i32
    %c0_i32_0 = arith.constant 0 : i32
    %c0_i32_1 = arith.constant 0 : i32
    return %c0_i32, %c0_i32_0 : i32, i32
  }
  func.func @transform_16(%arg0: i32) -> (i32, i32) {
    %c0_i32 = arith.constant 0 : i32
    %c0_i32_0 = arith.constant 0 : i32
    %c0_i32_1 = arith.constant 0 : i32
    return %c0_i32, %c0_i32_0 : i32, i32
  }
  func.func @transform_17(%arg0: i32) -> (i32, i32, i32) {
    %c0_i32 = arith.constant 0 : i32
    %c0_i32_0 = arith.constant 0 : i32
    %c0_i32_1 = arith.constant 0 : i32
    return %arg0, %c0_i32, %c0_i32_0 : i32, i32, i32
  }
  func.func @transform_18(%arg0: i32) -> (i32, i32, i32) {
    %c0_i32 = arith.constant 0 : i32
    %c0_i32_0 = arith.constant 0 : i32
    %c0_i32_1 = arith.constant 0 : i32
    return %arg0, %c0_i32, %c0_i32_0 : i32, i32, i32
  }
  func.func @transform_19(%arg0: i32) -> (i32, i32, i32) {
    %c0_i32 = arith.constant 0 : i32
    %c0_i32_0 = arith.constant 0 : i32
    %c0_i32_1 = arith.constant 0 : i32
    return %arg0, %c0_i32, %c0_i32_0 : i32, i32, i32
  }
}

</mosaic_0001>

<bundles_post_ra>
// kernel: tpu_custom_call.1
= control target key start
LH: loop header
LB: loop body
LE: loop exit
PB: predicated region body
PF: predicated region fallthrough
CT: control target
= control target key end

     0   :  { %s6556_s0 = inlined_call_operand.hbm [shape: f32[2,8,32], index: 0, kind: input, shape index: {}]   ;;  %s6557_s1 = inlined_call_operand.hbm [shape: f32[2,256], index: 1, kind: input, shape index: {}]   ;;  %s6558_s2 = inlined_call_operand.hbm [shape: f32[2,1,8], index: 2, kind: input, shape index: {}]   ;;  %s6559_s3 = inlined_call_operand.vmem [shape: f32[2,3,32], index: 3, kind: input, shape index: {}]   ;;  %s6560_s4 = inlined_call_operand.hbm [shape: f32[8,256], index: 4, kind: input, shape index: {}]   ;;  %s6561_s5 = inlined_call_operand.vmem [shape: f32[32,96], index: 5, kind: input, shape index: {}]   ;;  %s6562_s6 = inlined_call_operand.hbm [shape: f32[3,32,32], index: 6, kind: input, shape index: {}]   ;;  %s6563_s7 = inlined_call_operand.hbm [shape: f32[1,96], index: 7, kind: input, shape index: {}]   ;;  %s6564_s8 = inlined_call_operand.hbm [shape: f32[7,32], index: 8, kind: input, shape index: {}]   ;;  %s6565_s9 = inlined_call_operand.hbm [shape: f32[32,32], index: 9, kind: input, shape index: {}]   ;;  %s6566_s10 = inlined_call_operand.hbm [shape: f32[32,64], index: 10, kind: input, shape index: {}]   ;;  %s6567_s11 = inlined_call_operand.hbm [shape: f32[1,64], index: 11, kind: input, shape index: {}]   ;;  %s6568_s12 = inlined_call_operand.hbm [shape: f32[2,32,32], index: 12, kind: input, shape index: {}]   ;;  %s6569_s13 = inlined_call_operand.hbm [shape: f32[12,32], index: 13, kind: input, shape index: {}]   ;;  %s6570_s14 = inlined_call_operand.vmem [shape: f32[32,96], index: 14, kind: input, shape index: {}]   ;;  %s6571_s15 = inlined_call_operand.hbm [shape: f32[32,96], index: 15, kind: input, shape index: {}]   ;;  %s6572_s16 = inlined_call_operand.vmem [shape: f32[2,96], index: 16, kind: input, shape index: {}]   ;;  %s6573_s17 = inlined_call_operand.vmem [shape: f32[2,3,256], index: 17, kind: output, shape index: {0}]   ;;  %s6574_s18 = inlined_call_operand.vmem [shape: f32[2,3,8], index: 18, kind: output, shape index: {1}]   ;;  %s6575_s19 = inlined_call_operand.hbm [shape: f32[2,4,8], index: 19, kind: output, shape index: {2}]  }
   0x1   :  { %6580 = sst [smem:[#allocation32_spill]] %s6556_s0 }
   0x2   :  { %6581 = sst [smem:[#allocation33_spill]] %s6557_s1 }
   0x3   :  { %6582 = sst [smem:[#allocation34_spill]] %s6558_s2 }
   0x4   :  { %6583 = sst [smem:[#allocation35_spill]] %s6559_s3 }
   0x5   :  { %25 = vsyncpa [#allocation3], 0 }
   0x6   :  { %26 = vsyncpa [#allocation6], 0 }
   0x7   :  { %27 = vsyncpa [#allocation9], 0 }
   0x8   :  { %28 = vsyncpa [#allocation12], 0 }
   0x9   :  { %29 = vsyncpa [#allocation15], 0 }
   0xa   :  { %30 = vsyncpa [#allocation18], 0 }
   0xb   :  { %31 = vsyncpa [#allocation21], 0 }
   0xc   :  { %32 = vsyncpa [#allocation4], 0  ;;  %s5638_s0 = smov [#allocation5]   ;;  %s5639_s20 = smov [#allocation8]  }
   0xd   :  { %s51_s30 = sshll.u32 %s5638_s0, 4  ;;  %s75_s21 = sshll.u32 %s5639_s20, 4  ;;  %s52_s30 = int_to_ptr.vmem [resolvable:$true] %s51_s30  ;;  %s76_s21 = int_to_ptr.vmem [resolvable:$true] %s75_s21 }
   0xe   :  { %s6584_s2 = sld [smem:[#allocation33_spill]] }
  0x14   :  { %s5314_s23 = scalar_lea.hbm %s6584_s2, 64 }
  0x15   :  { %p5315_p0 = scmp.ne.s32.totalorder %s6584_s2, %s5314_s23  ;;  %p5318_p1 = scmp.lt.u32.totalorder %s5314_s23, %s6584_s2 }
  0x17   :  { %p5320_p2 = pnand %p5318_p1, %p5315_p0 }
  0x19   :  { %5323 = shalt.err (!%p5320_p2)
}
  0x1a   :  { %s5324_s27 = scalar_lea.vmem %s52_s30, 64  ;;  %p5329_p4 = scmp.lt.s32.totalorder %s52_s30, %s52_s30 }
  0x1b   :  { %p5325_p3 = scmp.ne.s32.totalorder %s52_s30, %s5324_s27  ;;  %p5330_p5 = scmp.lt.s32.totalorder %s5324_s27, %s5324_s27 }
  0x1d   :  { %p5331_p6 = por %p5330_p5, %p5329_p4 }
  0x1f   :  { %p5332_p7 = pnand %p5331_p6, %p5325_p3 }
  0x21   :  { %5335 = shalt.err (!%p5332_p7)
}
  0x22   :  { %54 = dma.hbm_to_vmem [thread:$0]  %s6584_s2, 64, %s52_s30, [#allocation6]  }
  0x23   :  { %s5336_s1 = scalar_lea.hbm %s6560_s4, 256 }
  0x24   :  { %p5337_p8 = scmp.ne.s32.totalorder %s6560_s4, %s5336_s1  ;;  %p5340_p9 = scmp.lt.u32.totalorder %s5336_s1, %s6560_s4 }
  0x26   :  { %p5342_p10 = pnand %p5340_p9, %p5337_p8 }
  0x28   :  { %5345 = shalt.err (!%p5342_p10)
}
  0x29   :  { %s5346_s3 = scalar_lea.vmem %s76_s21, 256  ;;  %p5351_p12 = scmp.lt.s32.totalorder %s76_s21, %s76_s21 }
  0x2a   :  { %p5347_p11 = scmp.ne.s32.totalorder %s76_s21, %s5346_s3  ;;  %p5352_p13 = scmp.lt.s32.totalorder %s5346_s3, %s5346_s3 }
  0x2c   :  { %p5353_p0 = por %p5352_p13, %p5351_p12 }
  0x2e   :  { %p5354_p1 = pnand %p5353_p0, %p5347_p11 }
  0x30   :  { %5357 = shalt.err (!%p5354_p1)
}
  0x31   :  { %78 = dma.hbm_to_vmem [thread:$0]  %s6560_s4, 256, %s76_s21, [#allocation9]  }
  0x32   :  { %s5640_s26 = smov [#allocation11]   ;;  %s5358_s0 = scalar_lea.hbm %s6563_s7, 16 }
  0x33   :  { %s99_s27 = sshll.u32 %s5640_s26, 4  ;;  %p5359_p2 = scmp.ne.s32.totalorder %s6563_s7, %s5358_s0  ;;  %s100_s27 = int_to_ptr.vmem [resolvable:$true] %s99_s27 }
  0x34   :  { %p5362_p3 = scmp.lt.u32.totalorder %s5358_s0, %s6563_s7 }
  0x36   :  { %p5364_p4 = pnand %p5362_p3, %p5359_p2 }
  0x38   :  { %5367 = shalt.err (!%p5364_p4)
}
  0x39   :  { %s5368_s23 = scalar_lea.vmem %s100_s27, 16  ;;  %s5372_s4 = scalar_lea.vmem %s100_s27, 32 }
  0x3a   :  { %p5369_p5 = scmp.ne.s32.totalorder %s100_s27, %s5368_s23  ;;  %p5373_p6 = scmp.lt.s32.totalorder %s100_s27, %s100_s27 }
  0x3b   :  { %p5374_p7 = scmp.lt.s32.totalorder %s5372_s4, %s5368_s23 }
  0x3d   :  { %p5375_p8 = por %p5374_p7, %p5373_p6 }
  0x3f   :  { %p5376_p9 = pnand %p5375_p8, %p5369_p5 }
  0x41   :  { %5379 = shalt.err (!%p5376_p9)
}
  0x42   :  { %102 = dma.hbm_to_vmem [thread:$0]  %s6563_s7, 16, %s100_s27, [#allocation12]  }
  0x43   :  { %s5641_s3 = smov [#allocation14]   ;;  %s5642_s2 = smov [#allocation17]  }
  0x44   :  { %s118_s30 = sshll.u32 %s5641_s3, 4  ;;  %s143_s26 = sshll.u32 %s5642_s2, 4  ;;  %s119_s30 = int_to_ptr.vmem [resolvable:$true] %s118_s30  ;;  %s144_s26 = int_to_ptr.vmem [resolvable:$true] %s143_s26 }
  0x45   :  { %s5380_s0 = scalar_lea.hbm %s6565_s9, 512 }
  0x46   :  { %p5381_p10 = scmp.ne.s32.totalorder %s6565_s9, %s5380_s0  ;;  %p5384_p11 = scmp.lt.u32.totalorder %s5380_s0, %s6565_s9 }
  0x48   :  { %p5386_p12 = pnand %p5384_p11, %p5381_p10 }
  0x4a   :  { %5389 = shalt.err (!%p5386_p12)
}
  0x4b   :  { %s5390_s7 = scalar_lea.vmem %s119_s30, 512  ;;  %p5395_p0 = scmp.lt.s32.totalorder %s119_s30, %s119_s30 }
  0x4c   :  { %p5391_p13 = scmp.ne.s32.totalorder %s119_s30, %s5390_s7  ;;  %p5396_p1 = scmp.lt.s32.totalorder %s5390_s7, %s5390_s7 }
  0x4e   :  { %p5397_p2 = por %p5396_p1, %p5395_p0 }
  0x50   :  { %p5398_p3 = pnand %p5397_p2, %p5391_p13 }
  0x52   :  { %5401 = shalt.err (!%p5398_p3)
}
  0x53   :  { %s5643_s27 = smov 128   ;;  %s5644_s23 = smov 8  }
  0x54   :  { %124 = dma.hbm_to_vmem [thread:$0]  %s6565_s9, 512, %s119_s30, [#allocation15], %s5643_s27, %s5643_s27, %s5644_s23  }
  0x55   :  { %s5402_s2 = scalar_lea.hbm %s6567_s11, 16 }
  0x56   :  { %p5403_p4 = scmp.ne.s32.totalorder %s6567_s11, %s5402_s2  ;;  %p5406_p5 = scmp.lt.u32.totalorder %s5402_s2, %s6567_s11 }
  0x58   :  { %p5408_p6 = pnand %p5406_p5, %p5403_p4 }
  0x5a   :  { %5411 = shalt.err (!%p5408_p6)
}
  0x5b   :  { %s5412_s1 = scalar_lea.vmem %s144_s26, 16  ;;  %s5416_s22 = scalar_lea.vmem %s144_s26, 32 }
  0x5c   :  { %p5413_p7 = scmp.ne.s32.totalorder %s144_s26, %s5412_s1  ;;  %p5417_p8 = scmp.lt.s32.totalorder %s144_s26, %s144_s26 }
  0x5d   :  { %p5418_p9 = scmp.lt.s32.totalorder %s5416_s22, %s5412_s1 }
  0x5f   :  { %p5419_p10 = por %p5418_p9, %p5417_p8 }
  0x61   :  { %p5420_p11 = pnand %p5419_p10, %p5413_p7 }
  0x63   :  { %5423 = shalt.err (!%p5420_p11)
}
  0x64   :  { %146 = dma.hbm_to_vmem [thread:$0]  %s6567_s11, 16, %s144_s26, [#allocation18]  }
  0x65   :  { %s5645_s24 = smov [#allocation20]   ;;  %s5646_s4 = smov [#allocation2]  }
  0x66   :  { %s164_s7 = sshll.u32 %s5645_s24, 4  ;;  %s38_s21 = sshll.u32 %s5646_s4, 4  ;;  %s165_s7 = int_to_ptr.vmem [resolvable:$true] %s164_s7  ;;  %s39_s21 = int_to_ptr.vmem [resolvable:$true] %s38_s21 }
  0x67   :  { %s5424_s2 = scalar_lea.hbm %s6569_s13, 256 }
  0x68   :  { %p5425_p12 = scmp.ne.s32.totalorder %s6569_s13, %s5424_s2  ;;  %p5428_p13 = scmp.lt.u32.totalorder %s5424_s2, %s6569_s13 }
  0x6a   :  { %p5430_p0 = pnand %p5428_p13, %p5425_p12 }
  0x6c   :  { %5433 = shalt.err (!%p5430_p0)
}
  0x6d   :  { %s5434_s11 = scalar_lea.vmem %s165_s7, 256  ;;  %p5439_p2 = scmp.lt.s32.totalorder %s165_s7, %s165_s7 }
  0x6e   :  { %p5435_p1 = scmp.ne.s32.totalorder %s165_s7, %s5434_s11  ;;  %p5440_p3 = scmp.lt.s32.totalorder %s5434_s11, %s5434_s11 }
  0x70   :  { %p5441_p4 = por %p5440_p3, %p5439_p2 }
  0x72   :  { %p5442_p5 = pnand %p5441_p4, %p5435_p1 }
  0x74   :  { %5445 = shalt.err (!%p5442_p5)
}
  0x75   :  { %170 = dma.hbm_to_vmem [thread:$0]  %s6569_s13, 256, %s165_s7, [#allocation21], %s5643_s27, %s5643_s27, %s5644_s23  }
  0x76   :  { %s6585_s30 = sld [smem:[#allocation32_spill]] }
  0x7c   :  { %s5446_s24 = scalar_lea.hbm %s6585_s30, 256 }
  0x7d   :  { %p5447_p6 = scmp.ne.s32.totalorder %s6585_s30, %s5446_s24  ;;  %p5450_p7 = scmp.lt.u32.totalorder %s5446_s24, %s6585_s30 }
  0x7f   :  { %p5452_p8 = pnand %p5450_p7, %p5447_p6 }
  0x81   :  { %5455 = shalt.err (!%p5452_p8)
}
  0x82   :  { %s5456_s28 = scalar_lea.vmem %s39_s21, 256  ;;  %p5461_p10 = scmp.lt.s32.totalorder %s39_s21, %s39_s21 }
  0x83   :  { %p5457_p9 = scmp.ne.s32.totalorder %s39_s21, %s5456_s28  ;;  %p5462_p11 = scmp.lt.s32.totalorder %s5456_s28, %s5456_s28 }
  0x85   :  { %p5463_p12 = por %p5462_p11, %p5461_p10 }
  0x87   :  { %p5464_p13 = pnand %p5463_p12, %p5457_p9 }
  0x89   :  { %5467 = shalt.err (!%p5464_p13)
}
  0x8a   :  { %44 = dma.hbm_to_vmem [thread:$0]  %s6585_s30, 256, %s39_s21, [#allocation3], %s5643_s27, %s5643_s27, %s5644_s23  }
  0x8b   :  { %s5647_s29 = smov [#allocation7]   ;;  %s6586_s26 = sld [smem:[#allocation34_spill]] }
  0x8c   :  { %s60_s0 = sshll.u32 %s5647_s29, 4  ;;  %s61_s0 = int_to_ptr.vmem [resolvable:$true] %s60_s0 }
  0x91   :  { %s5468_s1 = scalar_lea.hbm %s6586_s26, 32 }
  0x92   :  { %p5469_p0 = scmp.ne.s32.totalorder %s6586_s26, %s5468_s1  ;;  %p5472_p1 = scmp.lt.u32.totalorder %s5468_s1, %s6586_s26 }
  0x94   :  { %p5474_p2 = pnand %p5472_p1, %p5469_p0 }
  0x96   :  { %5477 = shalt.err (!%p5474_p2)
}
  0x97   :  { %s5478_s25 = scalar_lea.vmem %s61_s0, 32  ;;  %p5483_p4 = scmp.lt.s32.totalorder %s61_s0, %s61_s0 }
  0x98   :  { %p5479_p3 = scmp.ne.s32.totalorder %s61_s0, %s5478_s25  ;;  %p5484_p5 = scmp.lt.s32.totalorder %s5478_s25, %s5478_s25 }
  0x9a   :  { %p5485_p6 = por %p5484_p5, %p5483_p4 }
  0x9c   :  { %p5486_p7 = pnand %p5485_p6, %p5479_p3 }
  0x9e   :  { %5489 = shalt.err (!%p5486_p7)
}
  0x9f   :  { %s5648_s21 = smov 16   ;;  %s5649_s30 = smov 1  }
  0xa0   :  { %66 = dma.hbm_to_vmem [thread:$0]  %s6586_s26, 32, %s61_s0, [#allocation6], %s5648_s21, %s5648_s21, %s5649_s30  }
  0xa1   :  { %s5650_s28 = smov [#allocation10]   ;;  %s5651_s7 = smov [#allocation13]  }
  0xa2   :  { %s86_s13 = sshll.u32 %s5650_s28, 4  ;;  %s109_s29 = sshll.u32 %s5651_s7, 4  ;;  %s87_s13 = int_to_ptr.vmem [resolvable:$true] %s86_s13  ;;  %s110_s29 = int_to_ptr.vmem [resolvable:$true] %s109_s29 }
  0xa3   :  { %s5490_s1 = scalar_lea.hbm %s6562_s6, 1536 }
  0xa4   :  { %p5491_p8 = scmp.ne.s32.totalorder %s6562_s6, %s5490_s1  ;;  %p5494_p9 = scmp.lt.u32.totalorder %s5490_s1, %s6562_s6 }
  0xa6   :  { %p5496_p10 = pnand %p5494_p9, %p5491_p8 }
  0xa8   :  { %5499 = shalt.err (!%p5496_p10)
}
  0xa9   :  { %s5500_s0 = scalar_lea.vmem %s87_s13, 1536  ;;  %p5505_p12 = scmp.lt.s32.totalorder %s87_s13, %s87_s13 }
  0xaa   :  { %p5501_p11 = scmp.ne.s32.totalorder %s87_s13, %s5500_s0  ;;  %p5506_p13 = scmp.lt.s32.totalorder %s5500_s0, %s5500_s0 }
  0xac   :  { %p5507_p0 = por %p5506_p13, %p5505_p12 }
  0xae   :  { %p5508_p1 = pnand %p5507_p0, %p5501_p11 }
  0xb0   :  { %5511 = shalt.err (!%p5508_p1)
}
  0xb1   :  { %92 = dma.hbm_to_vmem [thread:$0]  %s6562_s6, 1536, %s87_s13, [#allocation9], %s5643_s27, %s5643_s27, %s5644_s23  }
  0xb2   :  { %s5512_s3 = scalar_lea.hbm %s6564_s8, 128 }
  0xb3   :  { %p5513_p2 = scmp.ne.s32.totalorder %s6564_s8, %s5512_s3  ;;  %p5516_p3 = scmp.lt.u32.totalorder %s5512_s3, %s6564_s8 }
  0xb5   :  { %p5518_p4 = pnand %p5516_p3, %p5513_p2 }
  0xb7   :  { %5521 = shalt.err (!%p5518_p4)
}
  0xb8   :  { %s5522_s11 = scalar_lea.vmem %s110_s29, 128  ;;  %p5527_p6 = scmp.lt.s32.totalorder %s110_s29, %s110_s29 }
  0xb9   :  { %p5523_p5 = scmp.ne.s32.totalorder %s110_s29, %s5522_s11  ;;  %p5528_p7 = scmp.lt.s32.totalorder %s5522_s11, %s5522_s11 }
  0xbb   :  { %p5529_p8 = por %p5528_p7, %p5527_p6 }
  0xbd   :  { %p5530_p9 = pnand %p5529_p8, %p5523_p5 }
  0xbf   :  { %5533 = shalt.err (!%p5530_p9)
}
  0xc0   :  { %112 = dma.hbm_to_vmem [thread:$0]  %s6564_s8, 128, %s110_s29, [#allocation12]  }
  0xc1   :  { %s5652_s1 = smov [#allocation16]   ;;  %s5653_s9 = smov [#allocation19]  }
  0xc2   :  { %s130_s22 = sshll.u32 %s5652_s1, 4  ;;  %s152_s24 = sshll.u32 %s5653_s9, 4  ;;  %s131_s22 = int_to_ptr.vmem [resolvable:$true] %s130_s22  ;;  %s5895_s24 = int_to_ptr.vmem [resolvable:$true] %s152_s24 }
  0xc3   :  { %s5534_s26 = scalar_lea.hbm %s6566_s10, 512 }
  0xc4   :  { %p5535_p10 = scmp.ne.s32.totalorder %s6566_s10, %s5534_s26  ;;  %p5538_p11 = scmp.lt.u32.totalorder %s5534_s26, %s6566_s10 }
  0xc6   :  { %p5540_p12 = pnand %p5538_p11, %p5535_p10 }
  0xc8   :  { %5543 = shalt.err (!%p5540_p12)
}
  0xc9   :  { %s5544_s8 = scalar_lea.vmem %s131_s22, 512  ;;  %p5549_p0 = scmp.lt.s32.totalorder %s131_s22, %s131_s22 }
  0xca   :  { %p5545_p13 = scmp.ne.s32.totalorder %s131_s22, %s5544_s8  ;;  %p5550_p1 = scmp.lt.s32.totalorder %s5544_s8, %s5544_s8 }
  0xcc   :  { %p5551_p2 = por %p5550_p1, %p5549_p0 }
  0xce   :  { %p5552_p3 = pnand %p5551_p2, %p5545_p13 }
  0xd0   :  { %5555 = shalt.err (!%p5552_p3)
}
  0xd1   :  { %136 = dma.hbm_to_vmem [thread:$0]  %s6566_s10, 512, %s131_s22, [#allocation15], %s5643_s27, %s5643_s27, %s5644_s23  }
  0xd2   :  { %s5556_s20 = scalar_lea.hbm %s6568_s12, 1024 }
  0xd3   :  { %p5557_p4 = scmp.ne.s32.totalorder %s6568_s12, %s5556_s20  ;;  %p5560_p5 = scmp.lt.u32.totalorder %s5556_s20, %s6568_s12 }
  0xd5   :  { %p5562_p6 = pnand %p5560_p5, %p5557_p4 }
  0xd7   :  { %5565 = shalt.err (!%p5562_p6)
}
  0xd8   :  { %s5566_s9 = scalar_lea.vmem %s5895_s24, 1024  ;;  %p5571_p8 = scmp.lt.s32.totalorder %s5895_s24, %s5895_s24 }
  0xd9   :  { %p5567_p7 = scmp.ne.s32.totalorder %s5895_s24, %s5566_s9  ;;  %p5572_p9 = scmp.lt.s32.totalorder %s5566_s9, %s5566_s9 }
  0xdb   :  { %p5573_p10 = por %p5572_p9, %p5571_p8 }
  0xdd   :  { %p5574_p11 = pnand %p5573_p10, %p5567_p7 }
  0xdf   :  { %5577 = shalt.err (!%p5574_p11)
}
  0xe0   :  { %158 = dma.hbm_to_vmem [thread:$0]  %s6568_s12, 1024, %s5895_s24, [#allocation18], %s5643_s27, %s5643_s27, %s5644_s23  }
  0xe1   :  { %s5654_s4 = smov [#allocation22]   ;;  %s5578_s21 = scalar_lea.hbm %s6571_s15, 512 }
  0xe2   :  { %s178_s0 = sshll.u32 %s5654_s4, 4  ;;  %p5579_p12 = scmp.ne.s32.totalorder %s6571_s15, %s5578_s21  ;;  %s179_s0 = int_to_ptr.vmem [resolvable:$true] %s178_s0 }
  0xe3   :  { %p5582_p13 = scmp.lt.u32.totalorder %s5578_s21, %s6571_s15 }
  0xe5   :  { %p5584_p0 = pnand %p5582_p13, %p5579_p12 }
  0xe7   :  { %5587 = shalt.err (!%p5584_p0)
}
  0xe8   :  { %s5588_s2 = scalar_lea.vmem %s179_s0, 512  ;;  %p5593_p2 = scmp.lt.s32.totalorder %s179_s0, %s179_s0 }
  0xe9   :  { %p5589_p1 = scmp.ne.s32.totalorder %s179_s0, %s5588_s2  ;;  %p5594_p3 = scmp.lt.s32.totalorder %s5588_s2, %s5588_s2 }
  0xeb   :  { %p5595_p4 = por %p5594_p3, %p5593_p2 }
  0xed   :  { %p5596_p5 = pnand %p5595_p4, %p5589_p1 }
  0xef   :  { %5599 = shalt.err (!%p5596_p5)
}
  0xf0   :  { %184 = dma.hbm_to_vmem [thread:$0]  %s6571_s15, 512, %s179_s0, [#allocation21], %s5643_s27, %s5643_s27, %s5644_s23  }
  0xf1   :  { %5622 = dma.done.wait [#allocation3], 256  }
  0xf2   :  { %5623 = vsyncadd [#allocation3], 4294967040 }
  0xf3   :  { %5624 = dma.done.wait [#allocation6], 96  }
  0xf4   :  { %5625 = vsyncadd [#allocation6], 4294967200 }
  0xf5   :  { %5626 = dma.done.wait [#allocation9], 1792  }
  0xf6   :  { %5627 = vsyncadd [#allocation9], 4294965504 }
  0xf7   :  { %5628 = dma.done.wait [#allocation12], 144  }
  0xf8   :  { %5629 = vsyncadd [#allocation12], 4294967152 }
  0xf9   :  { %5630 = dma.done.wait [#allocation15], 1024  }
  0xfa   :  { %5631 = vsyncadd [#allocation15], 4294966272 }
  0xfb   :  { %5632 = dma.done.wait [#allocation18], 1040  }
  0xfc   :  { %5633 = vsyncadd [#allocation18], 4294966256 }
  0xfd   :  { %5634 = dma.done.wait [#allocation21], 768  }
  0xfe   :  { %5635 = vsyncadd [#allocation21], 4294966528  ;;  %vm243_vm0 = vcmask 261120   ;;  %v232_v0 = vld [vmem:[%s6561_s5] sm:$0xff]  ;;  %v233_v1 = vld [vmem:[%s6561_s5 + $0x8] sm:$0xff]  ;;  %v5655_v8 = vmov 0.0   ;;  %v487_v16 = vlaneseq }
  0xff   :  { %v234_v2 = vld [vmem:[%s6561_s5 + $0x10] sm:$0xff]  ;;  %v5018_v3 = vpack.c.bf16 %v233_v1, %v232_v0  ;;  %v235_v4 = vld [vmem:[%s6561_s5 + $0x18] sm:$0xff]  ;;  %v5959_v5 = vld [vmem:[#allocation2] sm:$0xff]  ;;  %4662 = vmatprep.subr.mxu1 %v5655_v8  ;;  %vm5656_vm1 = vmmov 0   ;;  %s5657_s5 = smov 96   ;;  %vm499_vm2 = vcmask 64512  }
 0x100   :  { %v5022_v6 = vpack.c.bf16 %v235_v4, %v234_v2  ;;  %4659 = vmatprep.mubr.msk.f32.mxu0 %vm243_vm0, %v5959_v5  ;;  %v5963_v7 = vld [vmem:[#allocation2 + $0x8] sm:$0xff]  ;;  %4664 = vmatprep.mubr.msk.f32.mxu1 %vm5656_vm1, %v5655_v8  ;;  %v4397_v9 = vld [vmem:[#allocation11] ss:$0 sm:$0xff]  ;;  %v5985_v17 = vld [vmem:[#allocation7] sm:$0x1]  ;;  %v5988_v19 = vshrl.u32 %v487_v16, 7 }
 0x101   :  { %5019 = vmatprep.subr.bf16.mxu0 %v5018_v3  ;;  %v4400_v18 = vadd.f32 -1.0, %v5985_v17  ;;  %v5990_v20 = vld [vmem:[#allocation7 + $0x1] sm:$0x1]  ;;  %s5658_s13 = smov 64   ;;  %v681_v48 = vld [vmem:[#allocation10] sm:$0xff]  ;;  %v683_v58 = vld [vmem:[#allocation10 + $0x10] sm:$0xff] }
 0x102   :  { %5021 = vmatpush3.bf16.msra.mxu0 %v5018_v3  ;;  %v5993_v22 = vsub.s32 0, %v5988_v19  ;;  %v4401_v23 = vadd.f32 -1.0, %v5990_v20  ;;  %v682_v49 = vld [vmem:[#allocation10 + $0x8] sm:$0xff]  ;;  %v684_v59 = vld [vmem:[#allocation10 + $0x18] sm:$0xff]  ;;  %v4408_v1 = vld [vmem:[#allocation13] ss:$0 sm:$0xff] }
 0x103   :  { %5023 = vmatprep.subr.bf16.mxu0 %v5022_v6  ;;  %v327_v21 = vmul.f32 1e+09, %v4400_v18  ;;  %v5026_v50 = vpack.c.bf16 %v682_v49, %v681_v48  ;;  %v5030_v60 = vpack.c.bf16 %v684_v59, %v683_v58  ;;  %s6587_s10 = sld [smem:[#allocation35_spill]]  ;;  %vm1065_vm3 = vcmask 1040384   ;;  %s5661_s23 = smov [#allocation23]  }
 0x104   :  { %v328_v25 = vmul.f32 1e+09, %v4401_v23  ;;  %vm1221_vm4 = vcmask 257024   ;;  %vm1564_vm5 = vcmask 60416   ;;  %vm4167_vm6 = vcmask 60417   ;;  %s4375_s20 = sshll.u32 %s5661_s23, 4  ;;  %s4376_s20 = int_to_ptr.vmem [resolvable:$true] %s4375_s20 }
 0x105   :  { %v490_v24 = vrot.slane %v327_v21, %v5993_v22  ;;  %s5600_s11 = scalar_lea.vmem %s4376_s20, 128  ;;  %p5605_p7 = scmp.lt.s32.totalorder %s4376_s20, %s4376_s20 }
 0x106   :  { %5025 = vmatpush3.bf16.msra.mxu0 %v5022_v6  ;;  %v494_v30 = vrot.slane %v328_v25, %v5993_v22  ;;  %p5601_p6 = scmp.ne.s32.totalorder %s4376_s20, %s5600_s11  ;;  %p5606_p8 = scmp.lt.s32.totalorder %s5600_s11, %s5600_s11 }
 0x107   :  { %4672 = vmatprep.subr.mxu0 %v5655_v8 }
 0x108   :  { %p5607_p9 = por %p5606_p8, %p5605_p7 }
 0x109   :  { %4660 = vmatmul.mubr.msk.f32.vlgmr.msra.gmra.mrb[0].mxu0 %vm243_vm0, %v5963_v7 }
 0x10a   :  { %4674 = vmatprep.mubr.msk.f32.mxu0 %vm5656_vm1, %v5655_v8  ;;  %p5608_p10 = pnand %p5607_p9, %p5601_p6 }
 0x1dc   :  { %v4661_v10 = vpop.f32.mrb[0].mxu0 }
 0x1dd   :  { %v316_v11 = vpop.f32.mrb[1].mxu0  ;;  %v322_v13 = vadd.f32 %v4661_v10, %v4397_v9 }
 0x1de   :  { %v317_v12 = vadd.f32 %v4397_v9, %v316_v11 }
 0x1e0   :  { %330 = vrot.lane.b32.xlu0 %v317_v12, %s5657_s5 }
 0x1e4   :  { %407 = vrot.lane.b32.xlu0 %v322_v13, %s5657_s5 }
 0x252   :  { %v331_v14 = vpop.permute.xlu0 %330 }
 0x253   :  { %4663 = vmatpush3.xpose.msk.msra.mxu1 %vm243_vm0, %v331_v14 }
 0x254   :  { %4667 = vmatprep.subr.mxu1 %v5655_v8 }
 0x256   :  { %4665 = vmatmul.mubr.msk.f32.vlgmr.msra.gmra.mrb[0].mxu1 %vm243_vm0, %v317_v12  ;;  %v408_v15 = vpop.permute.xlu0 %407 }
 0x257   :  { %4668 = vmatpush3.xpose.msk.msra.mxu1 %vm243_vm0, %v408_v15  ;;  %4669 = vmatprep.mubr.msk.f32.mxu1 %vm5656_vm1, %v5655_v8 }
 0x258   :  { %4677 = vmatprep.subr.mxu1 %v5655_v8 }
 0x25a   :  { %4670 = vmatmul.mubr.msk.f32.vlgmr.msra.gmra.mrb[2].mxu1 %vm243_vm0, %v322_v13 }
 0x25b   :  { %4679 = vmatprep.mubr.msk.f32.mxu1 %vm5656_vm1, %v5655_v8 }
 0x329   :  { %v402_v26 = vpop.f32.mrb[0].mxu1 }
 0x32a   :  { %v483_v27 = vmul.f32 0.17677669, %v402_v26  ;;  %v4666_v28 = vpop.f32.mrb[1].mxu1  ;;  %v813_v26 = vld [vmem:[#allocation10 + $0x28] sm:$0xff] }
 0x32b   :  { %v814_v28 = vld [vmem:[#allocation10 + $0x30] sm:$0xff] }
 0x32c   :  { %v497_v29 = vadd.f32 %v490_v24, %v483_v27 }
 0x32d   :  { %v479_v31 = vpop.f32.mrb[2].mxu1 }
 0x32e   :  { %v484_v32 = vmul.f32 0.17677669, %v479_v31  ;;  %v4671_v33 = vpop.f32.mrb[3].mxu1  ;;  %v500_v34 = vsel %vm499_vm2, %v497_v29, -inf  ;;  %v904_v31 = vld [vmem:[#allocation10 + $0x40] sm:$0xff] }
 0x32f   :  { %501 = vmax.xlane.f32.xlu1 %v500_v34 }
 0x330   :  { %v498_v35 = vadd.f32 %v494_v30, %v484_v32  ;;  %v905_v32 = vld [vmem:[#allocation10 + $0x48] sm:$0xff] }
 0x331   :  { %v5042_v33 = vpack.c.bf16 %v905_v32, %v904_v31  ;;  %v4421_v32 = vld [vmem:[#allocation20 + $0x9] ss:$0 sm:$0xff] }
 0x332   :  { %v503_v36 = vsel %vm499_vm2, %v498_v35, -inf }
 0x333   :  { %504 = vmax.xlane.f32.xlu1 %v503_v36 }
 0x344   :  { %522 = vrot.lane.b32.xlu1 %v317_v12, %s5658_s13 }
 0x3bc   :  { %v502_v37 = vpop.xlane.xlu1 %501 }
 0x3bd   :  { %v506_v38 = vsub.f32 %v497_v29, %v502_v37  ;;  %v815_v29 = vld [vmem:[#allocation10 + $0x38] sm:$0xff] }
 0x3be   :  { %v5038_v30 = vpack.c.bf16 %v815_v29, %v814_v28  ;;  %v230_v29 = vld [vmem:[%s6587_s10] sm:$0x7] }
 0x3bf   :  { %v508_v39 = vmul.f32 1.442695, %v506_v38 }
 0x3c0   :  { %v505_v40 = vpop.xlane.xlu1 %504 }
 0x3c1   :  { %5215 = vpow2.f32 %v508_v39  ;;  %v507_v41 = vsub.f32 %v498_v35, %v505_v40 }
 0x3c3   :  { %v510_v42 = vmul.f32 1.442695, %v507_v41  ;;  %v4411_v41 = vld [vmem:[#allocation13 + $0x3] ss:$0 sm:$0xff] }
 0x3c4   :  { %v523_v43 = vpop.permute.xlu1 %522 }
 0x3c5   :  { %5217 = vpow2.f32 %v510_v42  ;;  %4673 = vmatpush3.msra.mxu0 %v523_v43  ;;  %v4412_v43 = vld [vmem:[#allocation13 + $0x4] ss:$0 sm:$0xff] }
 0x3c6   :  { %5027 = vmatprep.subr.bf16.mxu0 %v5026_v50 }
 0x3cb   :  { %v5216_v44 = vpop.eup %5215 }
 0x3cc   :  { %v512_v45 = vsel %vm499_vm2, %v5216_v44, 0.0 }
 0x3cd   :  { %513 = vadd.xlane.f32.xlu0 %v512_v45 }
 0x3cf   :  { %v5218_v46 = vpop.eup %5217 }
 0x3d0   :  { %v515_v47 = vsel %vm499_vm2, %v5218_v46, 0.0 }
 0x3d1   :  { %516 = vadd.xlane.f32.xlu1 %v515_v47 }
 0x3e2   :  { %598 = vrot.lane.b32.xlu1 %v322_v13, %s5658_s13 }
 0x45a   :  { %v514_v51 = vpop.xlane.xlu0 %513 }
 0x45b   :  { %5219 = vrcp.f32 %v514_v51  ;;  %v907_v51 = vld [vmem:[#allocation10 + $0x58] sm:$0xff] }
 0x45e   :  { %v517_v52 = vpop.xlane.xlu1 %516 }
 0x45f   :  { %5221 = vrcp.f32 %v517_v52 }
 0x462   :  { %v599_v53 = vpop.permute.xlu1 %598 }
 0x463   :  { %4678 = vmatpush3.msra.mxu1 %v599_v53  ;;  %v4413_v53 = vld [vmem:[#allocation13 + $0x1] ss:$0 sm:$0xff] }
 0x465   :  { %v5220_v54 = vpop.eup %5219 }
 0x466   :  { %v520_v55 = vmul.f32 %v5220_v54, %v5216_v44 }
 0x468   :  { %4675 = vmatmul.mubr.msk.f32.vlgmr.msra.gmra.mrb[2].mxu0 %vm499_vm2, %v520_v55 }
 0x469   :  { %v5222_v56 = vpop.eup %5221  ;;  %5029 = vmatpush3.bf16.msra.mxu0 %v5026_v50  ;;  %v906_v50 = vld [vmem:[#allocation10 + $0x50] sm:$0xff] }
 0x46a   :  { %v521_v57 = vmul.f32 %v5222_v56, %v5218_v46  ;;  %5031 = vmatprep.subr.bf16.mxu0 %v5030_v60  ;;  %v5046_v52 = vpack.c.bf16 %v907_v51, %v906_v50 }
 0x46c   :  { %4680 = vmatmul.mubr.msk.f32.vlgmr.msra.gmra.mrb[4].mxu1 %vm499_vm2, %v521_v57 }
 0x46d   :  { %5033 = vmatpush3.bf16.msra.mxu0 %v5030_v60  ;;  %v4416_v60 = vld [vmem:[#allocation13 + $0x2] ss:$0 sm:$0xff] }
 0x46e   :  { %5043 = vmatprep.subr.bf16.mxu0 %v5042_v33 }
 0x53b   :  { %v594_v61 = vpop.f32.mrb[2].mxu0 }
 0x53c   :  { %v4676_v62 = vpop.f32.mrb[3].mxu0  ;;  %4690 = vmatprep.mubr.msk.f32.mxu0 %vm243_vm0, %v594_v61 }
 0x53f   :  { %v670_v63 = vpop.f32.mrb[4].mxu1 }
 0x540   :  { %v4681_v0 = vpop.f32.mrb[5].mxu1  ;;  %4691 = vmatmul.mubr.msk.f32.vlgmr.msra.gmra.mrb[4].mxu0 %vm243_vm0, %v670_v63 }
 0x541   :  { %5045 = vmatpush3.bf16.msra.mxu0 %v5042_v33  ;;  %v231_v33 = vld [vmem:[%s6587_s10 + $0x4] sm:$0x7] }
 0x542   :  { %5047 = vmatprep.subr.bf16.mxu0 %v5046_v52 }
 0x545   :  { %5049 = vmatpush3.bf16.msra.mxu0 %v5046_v52 }
 0x613   :  { %v4692_v2 = vpop.f32.mrb[4].mxu0 }
 0x614   :  { %v767_v3 = vadd.f32 %v4692_v2, %v4408_v1  ;;  %v761_v4 = vpop.f32.mrb[5].mxu0 }
 0x615   :  { %v762_v6 = vadd.f32 %v4408_v1, %v761_v4 }
 0x616   :  { %v771_v9 = vadd.f32 %v767_v3, %v5963_v7 }
 0x617   :  { %v770_v10 = vadd.f32 %v762_v6, %v5959_v5  ;;  %v812_v5 = vld [vmem:[#allocation10 + $0x20] sm:$0xff] }
 0x618   :  { %v775_v11 = vsel %vm243_vm0, %v771_v9, 0.0  ;;  %v5034_v27 = vpack.c.bf16 %v813_v26, %v812_v5 }
 0x619   :  { %776 = vadd.xlane.f32.xlu0 %v775_v11  ;;  %v772_v12 = vsel %vm243_vm0, %v770_v10, 0.0 }
 0x61a   :  { %773 = vadd.xlane.f32.xlu1 %v772_v12  ;;  %5035 = vmatprep.subr.bf16.mxu1 %v5034_v27 }
 0x61b   :  { %5037 = vmatpush3.bf16.msra.mxu1 %v5034_v27 }
 0x61c   :  { %5039 = vmatprep.subr.bf16.mxu1 %v5038_v30 }
 0x61f   :  { %5041 = vmatpush3.bf16.msra.mxu1 %v5038_v30 }
 0x6a6   :  { %v777_v13 = vpop.xlane.xlu0 %776 }
 0x6a7   :  { %v780_v14 = vmul.f32 0.03125, %v777_v13  ;;  %v774_v15 = vpop.xlane.xlu1 %773 }
 0x6a8   :  { %v779_v16 = vmul.f32 0.03125, %v774_v15 }
 0x6a9   :  { %v782_v18 = vsub.f32 %v771_v9, %v780_v14 }
 0x6aa   :  { %v781_v21 = vsub.f32 %v770_v10, %v779_v16 }
 0x6ab   :  { %v784_v25 = vmul.f32 %v782_v18, %v782_v18 }
 0x6ac   :  { %v783_v23 = vmul.f32 %v781_v21, %v781_v21 }
 0x6ad   :  { %v788_v7 = vsel %vm243_vm0, %v784_v25, 0.0 }
 0x6ae   :  { %v785_v24 = vsel %vm243_vm0, %v783_v23, 0.0 }
 0x6af   :  { %786 = vadd.xlane.f32.xlu0 %v785_v24 }
 0x6b3   :  { %789 = vadd.xlane.f32.xlu0 %v788_v7 }
 0x73c   :  { %v787_v34 = vpop.xlane.xlu0 %786 }
 0x73d   :  { %v791_v35 = vmul.f32 0.03125, %v787_v34 }
 0x73f   :  { %v793_v36 = vadd.f32 1e-05, %v791_v35 }
 0x740   :  { %v790_v37 = vpop.xlane.xlu0 %789 }
 0x741   :  { %5223 = vrsqrt.f32 %v793_v36  ;;  %v792_v38 = vmul.f32 0.03125, %v790_v37  ;;  %v4419_v37 = vld [vmem:[#allocation13 + $0x5] ss:$0 sm:$0xff] }
 0x743   :  { %v794_v39 = vadd.f32 1e-05, %v792_v38 }
 0x745   :  { %5225 = vrsqrt.f32 %v794_v39  ;;  %v4420_v39 = vld [vmem:[#allocation13 + $0x6] ss:$0 sm:$0xff] }
 0x74b   :  { %v5224_v40 = vpop.eup %5223 }
 0x74c   :  { %v797_v42 = vmul.f32 %v5224_v40, %v781_v21  ;;  %v1043_v21 = vld [vmem:[#allocation20 + $0xa] sm:$0x1] }
 0x74d   :  { %v1045_v23 = vmul.f32 1.442695, %v1043_v21  ;;  %v1198_v21 = vld [vmem:[#allocation14] sm:$0xff] }
 0x74e   :  { %v803_v44 = vmul.f32 %v4411_v41, %v797_v42 }
 0x74f   :  { %v5226_v45 = vpop.eup %5225  ;;  %5227 = vpow2.f32 %v1045_v23  ;;  %v1199_v23 = vld [vmem:[#allocation14 + $0x8] sm:$0xff] }
 0x750   :  { %v798_v46 = vmul.f32 %v5226_v45, %v782_v18  ;;  %v809_v47 = vadd.f32 %v4412_v43, %v803_v44 }
 0x752   :  { %v804_v48 = vmul.f32 %v4411_v41, %v798_v46  ;;  %4701 = vmatprep.mubr.msk.f32.mxu1 %vm243_vm0, %v809_v47 }
 0x754   :  { %v810_v49 = vadd.f32 %v4412_v43, %v804_v48  ;;  %v1044_v43 = vld [vmem:[#allocation20 + $0xb] sm:$0x1] }
 0x756   :  { %4702 = vmatmul.mubr.msk.f32.vlgmr.msra.gmra.mrb[6].mxu1 %vm243_vm0, %v810_v49 }
 0x759   :  { %v5228_v7 = vpop.eup %5227 }
 0x75a   :  { %v1050_v28 = vrot.slane %v5228_v7, %v5993_v22  ;;  %v1108_v7 = vld [vmem:[#allocation16 + $0x10] sm:$0xff] }
 0x75c   :  { %v1051_v31 = vmul.f32 %v1050_v28, %v230_v29  ;;  %v1052_v35 = vmul.f32 %v1050_v28, %v231_v33  ;;  %v1201_v28 = vld [vmem:[#allocation14 + $0x18] sm:$0xff] }
 0x75e   :  { %v1057_v34 = vadd.f32 %v4421_v32, %v1051_v31  ;;  %v1058_v41 = vadd.f32 %v4421_v32, %v1052_v35 }
 0x760   :  { %v1061_v40 = vrot.slane %v1057_v34, 7  ;;  %v1062_v48 = vrot.slane %v1058_v41, 7 }
 0x829   :  { %v4703_v54 = vpop.f32.mrb[6].mxu1 }
 0x82a   :  { %v898_v55 = vadd.f32 %v4703_v54, %v4413_v53  ;;  %v892_v56 = vpop.f32.mrb[7].mxu1 }
 0x82b   :  { %v893_v57 = vadd.f32 %v4413_v53, %v892_v56  ;;  %v6036_v53 = vsel %vm1065_vm3, %v1044_v43, %v1062_v48 }
 0x82c   :  { %v902_v59 = vmax.f32 %v898_v55, 0.0  ;;  %v1225_v55 = vsel %vm1221_vm4, %v6036_v53, 0.0 }
 0x82d   :  { %v901_v58 = vmax.f32 %v893_v57, 0.0 }
 0x82f   :  { %4712 = vmatprep.mubr.msk.f32.mxu0 %vm243_vm0, %v901_v58 }
 0x830   :  { %4713 = vmatmul.mubr.msk.f32.vlgmr.msra.gmra.mrb[6].mxu0 %vm243_vm0, %v902_v59 }
 0x831   :  { %4734 = vmatprep.mubr.msk.f32.mxu0 %vm5656_vm1, %v5655_v8 }
 0x903   :  { %v4714_v61 = vpop.f32.mrb[6].mxu0 }
 0x904   :  { %v984_v62 = vpop.f32.mrb[7].mxu0  ;;  %v990_v63 = vadd.f32 %v4714_v61, %v4416_v60 }
 0x905   :  { %v985_v0 = vadd.f32 %v4416_v60, %v984_v62 }
 0x906   :  { %v994_v3 = vadd.f32 %v990_v63, %v810_v49 }
 0x907   :  { %v993_v1 = vadd.f32 %v985_v0, %v809_v47  ;;  %v6031_v47 = vsel %vm1065_vm3, %v1044_v43, %v1061_v40  ;;  %v4422_v43 = vld [vmem:[#allocation20 + $0x3] ss:$0 sm:$0xff] }
 0x908   :  { %v998_v4 = vsel %vm243_vm0, %v994_v3, 0.0  ;;  %v1222_v51 = vsel %vm1221_vm4, %v6031_v47, 0.0 }
 0x909   :  { %v995_v2 = vsel %vm243_vm0, %v993_v1, 0.0 }
 0x90a   :  { %996 = vadd.xlane.f32.xlu0 %v995_v2 }
 0x90e   :  { %999 = vadd.xlane.f32.xlu0 %v998_v4 }
 0x997   :  { %v997_v6 = vpop.xlane.xlu0 %996 }
 0x998   :  { %v1001_v9 = vmul.f32 0.03125, %v997_v6 }
 0x99a   :  { %v1003_v10 = vsub.f32 %v993_v1, %v1001_v9 }
 0x99b   :  { %v1000_v11 = vpop.xlane.xlu0 %999 }
 0x99c   :  { %v1002_v12 = vmul.f32 0.03125, %v1000_v11  ;;  %v1005_v13 = vmul.f32 %v1003_v10, %v1003_v10 }
 0x99e   :  { %v1004_v14 = vsub.f32 %v994_v3, %v1002_v12  ;;  %v1007_v15 = vsel %vm243_vm0, %v1005_v13, 0.0 }
 0x99f   :  { %1008 = vadd.xlane.f32.xlu0 %v1007_v15  ;;  %v1106_v15 = vld [vmem:[#allocation16] sm:$0xff] }
 0x9a0   :  { %v1006_v16 = vmul.f32 %v1004_v14, %v1004_v14 }
 0x9a2   :  { %v1010_v18 = vsel %vm243_vm0, %v1006_v16, 0.0  ;;  %v1107_v16 = vld [vmem:[#allocation16 + $0x8] sm:$0xff] }
 0x9a3   :  { %1011 = vadd.xlane.f32.xlu0 %v1010_v18  ;;  %v5050_v18 = vpack.c.bf16 %v1107_v16, %v1106_v15 }
 0x9a5   :  { %5051 = vmatprep.subr.bf16.mxu1 %v5050_v18 }
 0x9a6   :  { %5053 = vmatpush3.bf16.msra.mxu1 %v5050_v18 }
 0xa2c   :  { %v1009_v24 = vpop.xlane.xlu0 %1008 }
 0xa2d   :  { %v1013_v25 = vmul.f32 0.03125, %v1009_v24  ;;  %v6059_v24 = vpack.c.bf16 %v1199_v23, %v1198_v21 }
 0xa2f   :  { %v1015_v5 = vadd.f32 1e-05, %v1013_v25  ;;  %v5659_v25 = vmov 0.0|0.0  }
 0xa30   :  { %v1012_v26 = vpop.xlane.xlu0 %1011  ;;  %5058 = vmatprep.subr.bf16.mxu0 %v5659_v25 }
 0xa31   :  { %5229 = vrsqrt.f32 %v1015_v5  ;;  %v1014_v27 = vmul.f32 0.03125, %v1012_v26  ;;  %v1109_v5 = vld [vmem:[#allocation16 + $0x18] sm:$0xff]  ;;  %5060 = vmatpush3.bf16.msra.mxu0 %v6059_v24 }
 0xa32   :  { %v5054_v26 = vpack.c.bf16 %v1109_v5, %v1108_v7  ;;  %5061 = vmatprep.subr.bf16.mxu0 %v5659_v25 }
 0xa33   :  { %v1016_v30 = vadd.f32 1e-05, %v1014_v27  ;;  %v1200_v27 = vld [vmem:[#allocation14 + $0x10] sm:$0xff] }
 0xa34   :  { %5055 = vmatprep.subr.bf16.mxu1 %v5054_v26  ;;  %v6064_v29 = vpack.c.bf16 %v1201_v28, %v1200_v27 }
 0xa35   :  { %5231 = vrsqrt.f32 %v1016_v30  ;;  %5057 = vmatpush3.bf16.msra.mxu1 %v5054_v26 }
 0xa36   :  { %5063 = vmatpush3.bf16.msra.mxu0 %v6064_v29  ;;  %5064 = vmatprep.subr.bf16.mxu1 %v5659_v25 }
 0xa37   :  { %4748 = vmatprep.subr.mxu0 %v5655_v8 }
 0xa3b   :  { %v5230_v36 = vpop.eup %5229 }
 0xa3c   :  { %v1019_v38 = vmul.f32 %v5230_v36, %v1003_v10 }
 0xa3e   :  { %v1025_v42 = vmul.f32 %v4419_v37, %v1019_v38 }
 0xa3f   :  { %v5232_v44 = vpop.eup %5231 }
 0xa40   :  { %v1031_v45 = vadd.f32 %v4420_v39, %v1025_v42  ;;  %v1020_v46 = vmul.f32 %v5232_v44, %v1004_v14 }
 0xa42   :  { %v1068_v49 = vsel %vm243_vm0, %v1031_v45, 0.0  ;;  %v1026_v50 = vmul.f32 %v4419_v37, %v1020_v46 }
 0xa43   :  { %1069 = vadd.xlane.f32.xlu0 %v1068_v49 }
 0xa44   :  { %v1032_v52 = vadd.f32 %v4420_v39, %v1026_v50 }
 0xa46   :  { %v1071_v54 = vsel %vm243_vm0, %v1032_v52, 0.0 }
 0xa47   :  { %1223 = vadd.xlane.f32.xlu0 %v1222_v51  ;;  %1072 = vadd.xlane.f32.xlu1 %v1071_v54 }
 0xa4b   :  { %1226 = vadd.xlane.f32.xlu1 %v1225_v55 }
 0xad0   :  { %v1070_v56 = vpop.xlane.xlu0 %1069 }
 0xad1   :  { %v1074_v57 = vmul.f32 0.03125, %v1070_v56  ;;  %v6074_v56 = vld [vmem:[#allocation20 + $0x6] ss:$0 sm:$0xff] }
 0xad3   :  { %v6041_v58 = vsub.f32 %v1031_v45, %v1074_v57  ;;  %v4423_v45 = vld [vmem:[#allocation20 + $0x4] ss:$0 sm:$0xff] }
 0xad4   :  { %v1073_v59 = vpop.xlane.xlu1 %1072  ;;  %v1224_v60 = vpop.xlane.xlu0 %1223 }
 0xad5   :  { %v1075_v61 = vmul.f32 0.03125, %v1073_v59  ;;  %v1228_v62 = vmul.f32 0.03125, %v1224_v60  ;;  %v1078_v63 = vmul.f32 %v6041_v58, %v6041_v58 }
 0xad7   :  { %v1077_v0 = vsub.f32 %v1032_v52, %v1075_v61  ;;  %v6046_v1 = vsub.f32 %v6031_v47, %v1228_v62  ;;  %v1080_v2 = vsel %vm243_vm0, %v1078_v63, 0.0  ;;  %v6070_v52 = vld [vmem:[#allocation20 + $0x5] ss:$0 sm:$0xff] }
 0xad8   :  { %v1227_v3 = vpop.xlane.xlu1 %1226  ;;  %1081 = vadd.xlane.f32.xlu0 %v1080_v2 }
 0xad9   :  { %v1229_v4 = vmul.f32 0.03125, %v1227_v3  ;;  %v1079_v6 = vmul.f32 %v1077_v0, %v1077_v0  ;;  %v1232_v9 = vmul.f32 %v6046_v1, %v6046_v1 }
 0xadb   :  { %v6052_v10 = vsub.f32 %v6036_v53, %v1229_v4  ;;  %v1083_v11 = vsel %vm243_vm0, %v1079_v6, 0.0  ;;  %v1234_v12 = vsel %vm1221_vm4, %v1232_v9, 0.0  ;;  %v6096_v6 = vld [vmem:[#allocation20] ss:$0 sm:$0xff] }
 0xadc   :  { %1084 = vadd.xlane.f32.xlu1 %v1083_v11  ;;  %1235 = vadd.xlane.f32.xlu0 %v1234_v12 }
 0xadd   :  { %v1233_v13 = vmul.f32 %v6052_v10, %v6052_v10 }
 0xadf   :  { %v1237_v14 = vsel %vm1221_vm4, %v1233_v13, 0.0 }
 0xae0   :  { %1238 = vadd.xlane.f32.xlu1 %v1237_v14 }
 0xb65   :  { %v1082_v30 = vpop.xlane.xlu0 %1081 }
 0xb66   :  { %v1086_v31 = vmul.f32 0.03125, %v1082_v30 }
 0xb68   :  { %v1088_v32 = vadd.f32 1e-05, %v1086_v31 }
 0xb69   :  { %v1085_v33 = vpop.xlane.xlu1 %1084  ;;  %v1236_v34 = vpop.xlane.xlu0 %1235 }
 0xb6a   :  { %5233 = vrsqrt.f32 %v1088_v32  ;;  %v1087_v35 = vmul.f32 0.03125, %v1085_v33  ;;  %v1240_v36 = vmul.f32 0.03125, %v1236_v34 }
 0xb6c   :  { %v1089_v37 = vadd.f32 1e-05, %v1087_v35  ;;  %v1242_v38 = vadd.f32 1e-05, %v1240_v36 }
 0xb6d   :  { %v1239_v39 = vpop.xlane.xlu1 %1238 }
 0xb6e   :  { %5235 = vrsqrt.f32 %v1089_v37  ;;  %v1241_v40 = vmul.f32 0.03125, %v1239_v39 }
 0xb6f   :  { %5237 = vrsqrt.f32 %v1242_v38 }
 0xb70   :  { %v1243_v41 = vadd.f32 1e-05, %v1241_v40 }
 0xb72   :  { %5239 = vrsqrt.f32 %v1243_v41 }
 0xb74   :  { %v5234_v42 = vpop.eup %5233 }
 0xb75   :  { %v1092_v44 = vmul.f32 %v5234_v42, %v6041_v58 }
 0xb77   :  { %v1098_v46 = vmul.f32 %v4422_v43, %v1092_v44 }
 0xb78   :  { %v5236_v48 = vpop.eup %5235 }
 0xb79   :  { %v5238_v49 = vpop.eup %5237  ;;  %v1093_v50 = vmul.f32 %v5236_v48, %v1077_v0  ;;  %v1104_v51 = vadd.f32 %v4423_v45, %v1098_v46  ;;  %v4424_v0 = vld [vmem:[#allocation17] ss:$0 sm:$0xff] }
 0xb7a   :  { %v1246_v54 = vmul.f32 %v5238_v49, %v6046_v1 }
 0xb7b   :  { %v1099_v55 = vmul.f32 %v4422_v43, %v1093_v50  ;;  %4723 = vmatprep.mubr.msk.f32.mxu1 %vm243_vm0, %v1104_v51 }
 0xb7c   :  { %v5240_v57 = vpop.eup %5239  ;;  %v1252_v59 = vmul.f32 %v6070_v52, %v1246_v54 }
 0xb7d   :  { %v1247_v58 = vmul.f32 %v5240_v57, %v6052_v10  ;;  %v1105_v60 = vadd.f32 %v4423_v45, %v1099_v55 }
 0xb7e   :  { %v1258_v61 = vadd.f32 %v6074_v56, %v1252_v59 }
 0xb7f   :  { %4724 = vmatmul.mubr.msk.f32.vlgmr.msra.gmra.mrb[8].mxu1 %vm243_vm0, %v1105_v60  ;;  %v1253_v62 = vmul.f32 %v6070_v52, %v1247_v58 }
 0xb80   :  { %4735 = vmatmul.mubr.msk.f32.vlgmr.msra.gmra.mrb[8].mxu0 %vm243_vm0, %v1258_v61  ;;  %5066 = vmatpush3.bf16.msra.mxu1 %v6059_v24 }
 0xb81   :  { %5067 = vmatprep.subr.bf16.mxu1 %v5659_v25  ;;  %4745 = vmatprep.mubr.msk.f32.mxu1 %vm5656_vm1, %v5655_v8  ;;  %v1259_v63 = vadd.f32 %v6074_v56, %v1253_v62 }
 0xb82   :  { %4750 = vmatprep.mubr.msk.f32.mxu0 %vm5656_vm1, %v5655_v8 }
 0xb84   :  { %5069 = vmatpush3.bf16.msra.mxu1 %v6064_v29 }
 0xb85   :  { %4753 = vmatprep.subr.mxu1 %v5655_v8 }
 0xb87   :  { %4746 = vmatmul.mubr.msk.f32.vlgmr.msra.gmra.mrb[10].mxu1 %vm243_vm0, %v1259_v63 }
 0xb88   :  { %4755 = vmatprep.mubr.msk.f32.mxu1 %vm5656_vm1, %v5655_v8 }
 0xc52   :  { %v4725_v1 = vpop.f32.mrb[8].mxu1 }
 0xc53   :  { %v6094_v2 = vadd.f32 %v4725_v1, %v4424_v0  ;;  %v1333_v3 = vpop.f32.mrb[8].mxu0  ;;  %v1189_v4 = vpop.f32.mrb[9].mxu1 }
 0xc54   :  { %v6098_v9 = vadd.f32 %v4424_v0, %v1189_v4  ;;  %v4736_v10 = vpop.f32.mrb[9].mxu0  ;;  %v1334_v11 = vadd.f32 %v6096_v6, %v1333_v3  ;;  %v6120_v3 = vrot.slane %v5985_v17, %v5993_v22 }
 0xc55   :  { %4754 = vmatpush3.xpose.msk.msra.mxu1 %vm243_vm0, %v6094_v2 }
 0xc56   :  { %4749 = vmatpush3.xpose.msk.msra.mxu0 %vm243_vm0, %v6098_v9  ;;  %4763 = vmatprep.subr.mxu1 %v5655_v8 }
 0xc57   :  { %4758 = vmatprep.subr.mxu0 %v5655_v8 }
 0xc59   :  { %4751 = vmatmul.mubr.msk.f32.vlgmr.msra.gmra.mrb[10].mxu0 %vm243_vm0, %v1334_v11 }
 0xc5a   :  { %v1406_v12 = vpop.f32.mrb[10].mxu1  ;;  %4760 = vmatprep.mubr.msk.f32.mxu0 %vm5656_vm1, %v5655_v8 }
 0xc5b   :  { %v1407_v13 = vadd.f32 %v6096_v6, %v1406_v12  ;;  %v4747_v14 = vpop.f32.mrb[11].mxu1 }
 0xc5d   :  { %4756 = vmatmul.mubr.msk.f32.vlgmr.msra.gmra.mrb[12].mxu1 %vm243_vm0, %v1407_v13  ;;  %v6125_v13 = vrot.slane %v5990_v20, %v5993_v22 }
 0xc5e   :  { %4765 = vmatprep.mubr.msk.f32.mxu1 %vm5656_vm1, %v5655_v8 }
 0xd2c   :  { %v1482_v15 = vpop.f32.mrb[10].mxu0 }
 0xd2d   :  { %v1562_v16 = vmul.f32 0.17677669, %v1482_v15  ;;  %v4752_v18 = vpop.f32.mrb[11].mxu0 }
 0xd2f   :  { %v1565_v21 = vsel %vm1564_vm5, %v1562_v16, -inf }
 0xd30   :  { %v1566_v23 = vrot.slane %v1565_v21, 4  ;;  %v1558_v7 = vpop.f32.mrb[12].mxu1 }
 0xd31   :  { %v1563_v5 = vmul.f32 0.17677669, %v1558_v7  ;;  %v4757_v26 = vpop.f32.mrb[13].mxu1  ;;  %v1202_v7 = vld [vmem:[%s6570_s14] sm:$0xff] }
 0xd32   :  { %v1567_v27 = vmax.f32 %v1565_v21, %v1566_v23 }
 0xd33   :  { %v1572_v28 = vsel %vm1564_vm5, %v1563_v5, -inf }
 0xd34   :  { %v1568_v30 = vrot.slane %v1567_v27, 2  ;;  %v1573_v31 = vrot.slane %v1572_v28, 4 }
 0xd36   :  { %v1569_v32 = vmax.f32 %v1567_v27, %v1568_v30  ;;  %v1574_v33 = vmax.f32 %v1572_v28, %v1573_v31  ;;  %v1204_v30 = vld [vmem:[%s6570_s14 + $0x10] sm:$0xff]  ;;  %v1205_v31 = vld [vmem:[%s6570_s14 + $0x18] sm:$0xff] }
 0xd38   :  { %v1570_v34 = vrot.slane %v1569_v32, 1  ;;  %v1575_v35 = vrot.slane %v1574_v33, 2 }
 0xd3a   :  { %v1571_v36 = vmax.f32 %v1569_v32, %v1570_v34  ;;  %v1576_v37 = vmax.f32 %v1574_v33, %v1575_v35  ;;  %v6158_v33 = vpack.c.bf16 %v1205_v31, %v1204_v30  ;;  %v1206_v35 = vld [vmem:[#allocation22] sm:$0xff] }
 0xd3c   :  { %v1579_v38 = vsub.f32 %v1562_v16, %v1571_v36  ;;  %v1577_v39 = vrot.slane %v1576_v37, 1  ;;  %v1207_v36 = vld [vmem:[#allocation22 + $0x8] sm:$0xff] }
 0xd3e   :  { %v1581_v40 = vmul.f32 1.442695, %v1579_v38  ;;  %v1578_v41 = vmax.f32 %v1576_v37, %v1577_v39  ;;  %v6172_v37 = vpack.c.bf16 %v1207_v36, %v1206_v35  ;;  %v1208_v38 = vld [vmem:[#allocation22 + $0x10] sm:$0xff]  ;;  %v1209_v39 = vld [vmem:[#allocation22 + $0x18] sm:$0xff] }
 0xd40   :  { %5241 = vpow2.f32 %v1581_v40  ;;  %v1580_v42 = vsub.f32 %v1563_v5, %v1578_v41  ;;  %v1203_v5 = vld [vmem:[%s6570_s14 + $0x8] sm:$0xff] }
 0xd41   :  { %v6148_v27 = vpack.c.bf16 %v1203_v5, %v1202_v7 }
 0xd42   :  { %v1583_v43 = vmul.f32 1.442695, %v1580_v42  ;;  %v6176_v42 = vpack.c.bf16 %v1209_v39, %v1208_v38 }
 0xd44   :  { %5243 = vpow2.f32 %v1583_v43 }
 0xd4a   :  { %v5242_v44 = vpop.eup %5241 }
 0xd4b   :  { %v1585_v45 = vsel %vm1564_vm5, %v5242_v44, 0.0 }
 0xd4c   :  { %v1586_v46 = vrot.slane %v1585_v45, 4 }
 0xd4e   :  { %v5244_v48 = vpop.eup %5243  ;;  %v1587_v49 = vadd.f32 %v1586_v46, %v1585_v45 }
 0xd4f   :  { %v1592_v50 = vsel %vm1564_vm5, %v5244_v48, 0.0 }
 0xd50   :  { %v1588_v51 = vrot.slane %v1587_v49, 2  ;;  %v1593_v54 = vrot.slane %v1592_v50, 4 }
 0xd52   :  { %v1589_v55 = vadd.f32 %v1588_v51, %v1587_v49  ;;  %v1594_v57 = vadd.f32 %v1593_v54, %v1592_v50  ;;  %v6201_v50 = vld [vmem:[%s6572_s16 + $0x1] ss:$0 sm:$0xff] }
 0xd54   :  { %v1595_v59 = vrot.slane %v1594_v57, 2  ;;  %v1590_v58 = vrot.slane %v1589_v55, 1 }
 0xd56   :  { %v1596_v60 = vadd.f32 %v1595_v59, %v1594_v57  ;;  %v1591_v61 = vadd.f32 %v1590_v58, %v1589_v55 }
 0xd58   :  { %5245 = vrcp.f32 %v1591_v61  ;;  %v1597_v62 = vrot.slane %v1596_v60, 1 }
 0xd5a   :  { %v1598_v63 = vadd.f32 %v1597_v62, %v1596_v60  ;;  %v6210_v60 = vld [vmem:[%s6572_s16] ss:$0 sm:$0xff]  ;;  %s5660_s16 = smov 32  }
 0xd5c   :  { %5247 = vrcp.f32 %v1598_v63 }
 0xd62   :  { %v5246_v0 = vpop.eup %5245 }
 0xd63   :  { %v1601_v1 = vmul.f32 %v5246_v0, %v5242_v44 }
 0xd65   :  { %v1603_v4 = vadd.f32 1e-08, %v1601_v1 }
 0xd66   :  { %v5248_v10 = vpop.eup %5247 }
 0xd67   :  { %v1617_v11 = vmul.f32 %v6120_v3, %v1603_v4  ;;  %v1602_v12 = vmul.f32 %v5248_v10, %v5244_v48 }
 0xd69   :  { %v1619_v14 = vsel %vm1564_vm5, %v1617_v11, 0.0  ;;  %v1604_v15 = vadd.f32 1e-08, %v1602_v12 }
 0xd6a   :  { %1620 = vadd.xlane.f32.xlu0 %v1619_v14 }
 0xd6b   :  { %v1618_v16 = vmul.f32 %v6125_v13, %v1604_v15 }
 0xd6d   :  { %v1622_v18 = vsel %vm1564_vm5, %v1618_v16, 0.0 }
 0xd6e   :  { %1623 = vadd.xlane.f32.xlu1 %v1622_v18 }
 0xd7f   :  { %1705 = vrot.lane.b32.xlu1 %v6094_v2, %s5657_s5 }
 0xd80   :  { %1629 = vrot.lane.b32.xlu0 %v6098_v9, %s5657_s5 }
 0xdf7   :  { %v1621_v17 = vpop.xlane.xlu0 %1620 }
 0xdf8   :  { %5249 = vrcp.f32 %v1621_v17 }
 0xdfb   :  { %v1624_v21 = vpop.xlane.xlu1 %1623  ;;  %v6134_v20 = vpop.permute.xlu0 %1629 }
 0xdfc   :  { %5251 = vrcp.f32 %v1624_v21  ;;  %4759 = vmatpush3.msra.mxu0 %v6134_v20 }
 0xdfd   :  { %5070 = vmatprep.subr.bf16.mxu0 %v5659_v25 }
 0xdff   :  { %v6138_v23 = vpop.permute.xlu1 %1705 }
 0xe00   :  { %4764 = vmatpush3.msra.mxu1 %v6138_v23 }
 0xe01   :  { %5076 = vmatprep.subr.bf16.mxu1 %v5659_v25 }
 0xe02   :  { %v5250_v26 = vpop.eup %5249 }
 0xe03   :  { %v1627_v28 = vmul.f32 %v5250_v26, %v1617_v11 }
 0xe05   :  { %4761 = vmatmul.mubr.msk.f32.vlgmr.msra.gmra.mrb[12].mxu0 %vm499_vm2, %v1627_v28 }
 0xe06   :  { %v5252_v32 = vpop.eup %5251  ;;  %5072 = vmatpush3.bf16.msra.mxu0 %v6148_v27  ;;  %4776 = vmatprep.mubr.msk.f32.mxu0 %vm5656_vm1, %v5655_v8 }
 0xe07   :  { %v1628_v34 = vmul.f32 %v5252_v32, %v1618_v16  ;;  %5073 = vmatprep.subr.bf16.mxu0 %v5659_v25 }
 0xe09   :  { %4766 = vmatmul.mubr.msk.f32.vlgmr.msra.gmra.mrb[14].mxu1 %vm499_vm2, %v1628_v34 }
 0xe0a   :  { %5078 = vmatpush3.bf16.msra.mxu1 %v6148_v27  ;;  %5075 = vmatpush3.bf16.msra.mxu0 %v6158_v33 }
 0xe0b   :  { %5079 = vmatprep.subr.bf16.mxu1 %v5659_v25  ;;  %5082 = vmatprep.subr.bf16.mxu0 %v5659_v25 }
 0xe0c   :  { %4787 = vmatprep.mubr.msk.f32.mxu1 %vm5656_vm1, %v5655_v8 }
 0xe0e   :  { %5081 = vmatpush3.bf16.msra.mxu1 %v6158_v33 }
 0xe0f   :  { %5088 = vmatprep.subr.bf16.mxu1 %v5659_v25 }
 0xed8   :  { %v1701_v40 = vpop.f32.mrb[12].mxu0 }
 0xed9   :  { %v4762_v41 = vpop.f32.mrb[13].mxu0  ;;  %4777 = vmatmul.mubr.msk.f32.vlgmr.msra.gmra.mrb[14].mxu0 %vm243_vm0, %v1701_v40 }
 0xeda   :  { %5084 = vmatpush3.bf16.msra.mxu0 %v6172_v37  ;;  %4798 = vmatprep.mubr.msk.f32.mxu0 %vm5656_vm1, %v5655_v8 }
 0xedb   :  { %5085 = vmatprep.subr.bf16.mxu0 %v5659_v25 }
 0xedc   :  { %v1777_v43 = vpop.f32.mrb[14].mxu1 }
 0xedd   :  { %v4767_v44 = vpop.f32.mrb[15].mxu1  ;;  %4788 = vmatmul.mubr.msk.f32.vlgmr.msra.gmra.mrb[16].mxu1 %vm243_vm0, %v1777_v43 }
 0xede   :  { %5090 = vmatpush3.bf16.msra.mxu1 %v6172_v37  ;;  %5087 = vmatpush3.bf16.msra.mxu0 %v6176_v42 }
 0xedf   :  { %5091 = vmatprep.subr.bf16.mxu1 %v5659_v25  ;;  %4809 = vmatprep.mubr.msk.f32.mxu1 %vm5656_vm1, %v5655_v8 }
 0xee0   :  { %5094 = vmatprep.subr.bf16.mxu0 %v5659_v25 }
 0xee1   :  { %4799 = vmatmul.mubr.msk.f32.vlgmr.msra.gmra.mrb[16].mxu0 %vm243_vm0, %v6031_v47 }
 0xee2   :  { %5093 = vmatpush3.bf16.msra.mxu1 %v6176_v42  ;;  %4820 = vmatprep.mubr.msk.f32.mxu0 %vm5656_vm1, %v5655_v8 }
 0xee3   :  { %5100 = vmatprep.subr.bf16.mxu1 %v5659_v25 }
 0xee5   :  { %4810 = vmatmul.mubr.msk.f32.vlgmr.msra.gmra.mrb[18].mxu1 %vm243_vm0, %v6036_v53 }
 0xee6   :  { %4831 = vmatprep.mubr.msk.f32.mxu1 %vm5656_vm1, %v5655_v8 }
 0xfac   :  { %v1854_v45 = vpop.f32.mrb[14].mxu0 }
 0xfad   :  { %v4778_v46 = vpop.f32.mrb[15].mxu0  ;;  %v1855_v61 = vadd.f32 %v6210_v60, %v1854_v45 }
 0xfb0   :  { %v1927_v48 = vpop.f32.mrb[16].mxu1 }
 0xfb1   :  { %v4789_v49 = vpop.f32.mrb[17].mxu1  ;;  %v1928_v63 = vadd.f32 %v6210_v60, %v1927_v48 }
 0xfb4   :  { %v2004_v51 = vpop.f32.mrb[16].mxu0 }
 0xfb5   :  { %v2005_v54 = vadd.f32 %v6201_v50, %v2004_v51  ;;  %v4800_v55 = vpop.f32.mrb[17].mxu0 }
 0xfb7   :  { %2097 = vrot.lane.b32.xlu1 %v2005_v54, %s5658_s13  ;;  %v2081_v62 = vadd.f32 %v2005_v54, %v1855_v61 }
 0xfb8   :  { %v2077_v57 = vpop.f32.mrb[18].mxu1 }
 0xfb9   :  { %v2078_v59 = vadd.f32 %v6201_v50, %v2077_v57  ;;  %v4811_v58 = vpop.f32.mrb[19].mxu1  ;;  %v4444_v0 = vmul.f32 -1.442695, %v2081_v62 }
 0xfbb   :  { %2099 = vrot.lane.b32.xlu0 %v2078_v59, %s5658_s13  ;;  %v2082_v1 = vadd.f32 %v2078_v59, %v1928_v63  ;;  %5253 = vpow2.f32 %v4444_v0 }
 0xfbd   :  { %v4445_v4 = vmul.f32 -1.442695, %v2082_v1 }
 0xfbf   :  { %5255 = vpow2.f32 %v4445_v4 }
 0xfc5   :  { %v5254_v10 = vpop.eup %5253 }
 0xfc6   :  { %v2089_v11 = vadd.f32 1.0, %v5254_v10 }
 0xfc8   :  { %5257 = vrcp.f32 %v2089_v11  ;;  %v4447_v11 = vld [vmem:[#allocation20 + $0x8] ss:$0 sm:$0xff] }
 0xfc9   :  { %v5256_v12 = vpop.eup %5255 }
 0xfca   :  { %v2090_v14 = vadd.f32 1.0, %v5256_v12  ;;  %v4446_v12 = vld [vmem:[#allocation20 + $0x7] ss:$0 sm:$0xff] }
 0xfcc   :  { %5259 = vrcp.f32 %v2090_v14  ;;  %v1210_v14 = vld [vmem:[#allocation19] sm:$0xff] }
 0xfd2   :  { %v5258_v15 = vpop.eup %5257 }
 0xfd3   :  { %v2117_v35 = vsub.f32 1.0, %v5258_v15 }
 0xfd6   :  { %v5260_v17 = vpop.eup %5259 }
 0xfd7   :  { %v2118_v41 = vsub.f32 1.0, %v5260_v17 }
0x1029   :  { %v2098_v16 = vpop.permute.xlu1 %2097 }
0x102a   :  { %v2103_v18 = vmul.f32 %v5258_v15, %v2098_v16  ;;  %v1212_v16 = vld [vmem:[#allocation19 + $0x10] sm:$0xff] }
0x102c   :  { %2107 = vrot.lane.b32.xlu1 %v2103_v18, %s5658_s13 }
0x102d   :  { %v2100_v21 = vpop.permute.xlu0 %2099 }
0x102e   :  { %v2104_v7 = vmul.f32 %v5260_v17, %v2100_v21 }
0x1030   :  { %2109 = vrot.lane.b32.xlu0 %v2104_v7, %s5658_s13 }
0x109e   :  { %v2108_v5 = vpop.permute.xlu1 %2107 }
0x109f   :  { %v2113_v26 = vadd.f32 %v2108_v5, %v1855_v61 }
0x10a1   :  { %5261 = vtanh.f32 %v2113_v26 }
0x10a2   :  { %v2110_v28 = vpop.permute.xlu0 %2109 }
0x10a3   :  { %v2114_v30 = vadd.f32 %v2110_v28, %v1928_v63 }
0x10a5   :  { %5263 = vtanh.f32 %v2114_v30 }
0x10ab   :  { %v5262_v31 = vpop.eup %5261 }
0x10ac   :  { %2121 = vrot.lane.b32.xlu1 %v5262_v31, %s5657_s5 }
0x10af   :  { %v5264_v32 = vpop.eup %5263 }
0x10b0   :  { %2123 = vrot.lane.b32.xlu0 %v5264_v32, %s5657_s5  ;;  %2129 = vrot.lane.b32.xlu1 %v6031_v47, %s5660_s16 }
0x10b4   :  { %2131 = vrot.lane.b32.xlu0 %v6036_v53, %s5660_s16 }
0x111e   :  { %v2122_v34 = vpop.permute.xlu1 %2121 }
0x111f   :  { %v2127_v39 = vmul.f32 %v2122_v34, %v2117_v35 }
0x1122   :  { %v2124_v36 = vpop.permute.xlu0 %2123  ;;  %v2130_v38 = vpop.permute.xlu1 %2129 }
0x1123   :  { %v2135_v40 = vmul.f32 %v5258_v15, %v2130_v38  ;;  %v2128_v45 = vmul.f32 %v2124_v36, %v2118_v41  ;;  %v1211_v15 = vld [vmem:[#allocation19 + $0x8] sm:$0xff] }
0x1124   :  { %v6240_v18 = vpack.c.bf16 %v1211_v15, %v1210_v14  ;;  %v4453_v14 = vld [vmem:[#allocation20 + $0x2] ss:$0 sm:$0xff] }
0x1125   :  { %v6222_v43 = vadd.f32 %v2135_v40, %v2127_v39 }
0x1126   :  { %v2132_v44 = vpop.permute.xlu0 %2131  ;;  %5096 = vmatpush3.bf16.msra.mxu0 %v6240_v18  ;;  %5102 = vmatpush3.bf16.msra.mxu1 %v6240_v18 }
0x1127   :  { %v2136_v46 = vmul.f32 %v5260_v17, %v2132_v44  ;;  %2141 = vrot.lane.b32.xlu1 %v6222_v43, %s5657_s5  ;;  %v1213_v17 = vld [vmem:[#allocation19 + $0x18] sm:$0xff]  ;;  %5097 = vmatprep.subr.bf16.mxu0 %v5659_v25 }
0x1128   :  { %v6244_v21 = vpack.c.bf16 %v1213_v17, %v1212_v16  ;;  %5103 = vmatprep.subr.bf16.mxu1 %v5659_v25 }
0x1129   :  { %v6226_v48 = vadd.f32 %v2136_v46, %v2128_v45  ;;  %v1215_v46 = vld [vmem:[#allocation19 + $0x20] sm:$0xff] }
0x112a   :  { %5099 = vmatpush3.bf16.msra.mxu0 %v6244_v21  ;;  %5105 = vmatpush3.bf16.msra.mxu1 %v6244_v21 }
0x112b   :  { %2143 = vrot.lane.b32.xlu0 %v6226_v48, %s5657_s5  ;;  %5106 = vmatprep.subr.bf16.mxu0 %v5659_v25 }
0x112c   :  { %5112 = vmatprep.subr.bf16.mxu1 %v5659_v25 }
0x1199   :  { %v2142_v47 = vpop.permute.xlu1 %2141 }
0x119a   :  { %v2147_v53 = vsel %vm1221_vm4, %v2142_v47, 0.0  ;;  %v1216_v47 = vld [vmem:[#allocation19 + $0x28] sm:$0xff] }
0x119b   :  { %2148 = vadd.xlane.f32.xlu1 %v2147_v53  ;;  %v6262_v53 = vpack.c.bf16 %v1216_v47, %v1215_v46 }
0x119d   :  { %v2144_v49 = vpop.permute.xlu0 %2143 }
0x119e   :  { %v2150_v51 = vsel %vm1221_vm4, %v2144_v49, 0.0 }
0x119f   :  { %2151 = vadd.xlane.f32.xlu0 %v2150_v51 }
0x1228   :  { %v2149_v54 = vpop.xlane.xlu1 %2148 }
0x1229   :  { %v2153_v55 = vmul.f32 0.03125, %v2149_v54  ;;  %v1217_v54 = vld [vmem:[#allocation19 + $0x30] sm:$0xff] }
0x122b   :  { %v2155_v57 = vsub.f32 %v6222_v43, %v2153_v55  ;;  %v1218_v55 = vld [vmem:[#allocation19 + $0x38] sm:$0xff] }
0x122c   :  { %v2152_v59 = vpop.xlane.xlu0 %2151 }
0x122d   :  { %v2154_v58 = vmul.f32 0.03125, %v2152_v59  ;;  %v2157_v61 = vmul.f32 %v2155_v57, %v2155_v57  ;;  %v6280_v59 = vld [vmem:[#allocation20 + $0x1] ss:$0 sm:$0xff] }
0x122f   :  { %v2156_v62 = vsub.f32 %v6226_v48, %v2154_v58  ;;  %2161 = vrot.lane.b32.xlu0 %v2157_v61, %s5657_s5 }
0x1231   :  { %v2158_v63 = vmul.f32 %v2156_v62, %v2156_v62 }
0x1233   :  { %2163 = vrot.lane.b32.xlu1 %v2158_v63, %s5657_s5 }
0x12a1   :  { %v2162_v0 = vpop.permute.xlu0 %2161 }
0x12a2   :  { %v2167_v1 = vsel %vm1221_vm4, %v2162_v0, 0.0 }
0x12a3   :  { %2168 = vadd.xlane.f32.xlu1 %v2167_v1 }
0x12a5   :  { %v2164_v4 = vpop.permute.xlu1 %2163 }
0x12a6   :  { %v2170_v10 = vsel %vm1221_vm4, %v2164_v4, 0.0 }
0x12a7   :  { %2171 = vadd.xlane.f32.xlu0 %v2170_v10 }
0x12b4   :  { %2196 = vrot.lane.b32.xlu1 %v4447_v11, %s5660_s16 }
0x12bd   :  { %2186 = vrot.lane.b32.xlu0 %v4446_v12, %s5660_s16 }
0x1330   :  { %v2169_v7 = vpop.xlane.xlu1 %2168 }
0x1331   :  { %v2173_v5 = vmul.f32 0.03125, %v2169_v7 }
0x1333   :  { %v2175_v26 = vadd.f32 1e-05, %v2173_v5 }
0x1334   :  { %v2172_v28 = vpop.xlane.xlu0 %2171  ;;  %v6254_v36 = vpop.permute.xlu1 %2196 }
0x1335   :  { %5265 = vrsqrt.f32 %v2175_v26  ;;  %v2174_v30 = vmul.f32 0.03125, %v2172_v28 }
0x1337   :  { %v2176_v31 = vadd.f32 1e-05, %v2174_v30 }
0x1338   :  { %v6252_v34 = vpop.permute.xlu0 %2186 }
0x1339   :  { %5267 = vrsqrt.f32 %v2176_v31 }
0x133f   :  { %v5266_v32 = vpop.eup %5265 }
0x1340   :  { %v2179_v35 = vmul.f32 %v5266_v32, %v2155_v57  ;;  %v6274_v57 = vpack.c.bf16 %v1218_v55, %v1217_v54 }
0x1342   :  { %v2189_v38 = vmul.f32 %v6252_v34, %v2179_v35 }
0x1343   :  { %v5268_v39 = vpop.eup %5267 }
0x1344   :  { %v2180_v40 = vmul.f32 %v5268_v39, %v2156_v62  ;;  %v2199_v41 = vadd.f32 %v6254_v36, %v2189_v38 }
0x1346   :  { %v2190_v44 = vmul.f32 %v6252_v34, %v2180_v40  ;;  %2206 = vrot.lane.b32.xlu1 %v2199_v41, %s5657_s5 }
0x1348   :  { %v2200_v45 = vadd.f32 %v6254_v36, %v2190_v44 }
0x134a   :  { %2281 = vrot.lane.b32.xlu0 %v2200_v45, %s5657_s5 }
0x13b8   :  { %v2207_v49 = vpop.permute.xlu1 %2206 }
0x13b9   :  { %4821 = vmatmul.mubr.msk.f32.vlgmr.msra.gmra.mrb[18].mxu0 %vm243_vm0, %v2207_v49 }
0x13ba   :  { %5108 = vmatpush3.bf16.msra.mxu0 %v6262_v53  ;;  %4842 = vmatprep.mubr.msk.f32.mxu0 %vm5656_vm1, %v5655_v8 }
0x13bb   :  { %5109 = vmatprep.subr.bf16.mxu0 %v5659_v25 }
0x13bc   :  { %v2282_v51 = vpop.permute.xlu0 %2281 }
0x13bd   :  { %4832 = vmatmul.mubr.msk.f32.vlgmr.msra.gmra.mrb[20].mxu1 %vm243_vm0, %v2282_v51 }
0x13be   :  { %5114 = vmatpush3.bf16.msra.mxu1 %v6262_v53  ;;  %4853 = vmatprep.mubr.msk.f32.mxu1 %vm5656_vm1, %v5655_v8 }
0x13bf   :  { %5115 = vmatprep.subr.bf16.mxu1 %v5659_v25  ;;  %5111 = vmatpush3.bf16.msra.mxu0 %v6274_v57 }
0x13c0   :  { %5118 = vmatprep.subr.bf16.mxu0 %v5659_v25 }
0x13c2   :  { %5117 = vmatpush3.bf16.msra.mxu1 %v6274_v57 }
0x13c3   :  { %5124 = vmatprep.subr.bf16.mxu1 %v5659_v25 }
0x148c   :  { %v2276_v58 = vpop.f32.mrb[18].mxu0 }
0x148d   :  { %v2277_v61 = vadd.f32 %v6280_v59, %v2276_v58  ;;  %v4822_v62 = vpop.f32.mrb[19].mxu0 }
0x148f   :  { %v2355_v63 = vmax.f32 %v2277_v61, 0.0 }
0x1490   :  { %v2351_v0 = vpop.f32.mrb[20].mxu1 }
0x1491   :  { %v2352_v1 = vadd.f32 %v6280_v59, %v2351_v0  ;;  %v4833_v4 = vpop.f32.mrb[21].mxu1  ;;  %4843 = vmatmul.mubr.msk.f32.vlgmr.msra.gmra.mrb[20].mxu0 %vm243_vm0, %v2355_v63 }
0x1492   :  { %5120 = vmatpush3.bf16.msra.mxu0 %v6059_v24  ;;  %4864 = vmatprep.mubr.msk.f32.mxu0 %vm5656_vm1, %v5655_v8 }
0x1493   :  { %v2356_v10 = vmax.f32 %v2352_v1, 0.0  ;;  %5121 = vmatprep.subr.bf16.mxu0 %v5659_v25 }
0x1495   :  { %4854 = vmatmul.mubr.msk.f32.vlgmr.msra.gmra.mrb[22].mxu1 %vm243_vm0, %v2356_v10 }
0x1496   :  { %5126 = vmatpush3.bf16.msra.mxu1 %v6059_v24  ;;  %5123 = vmatpush3.bf16.msra.mxu0 %v6064_v29 }
0x1497   :  { %5127 = vmatprep.subr.bf16.mxu1 %v5659_v25  ;;  %4878 = vmatprep.subr.mxu0 %v5655_v8 }
0x1498   :  { %4875 = vmatprep.mubr.msk.f32.mxu1 %vm5656_vm1, %v5655_v8 }
0x149a   :  { %5129 = vmatpush3.bf16.msra.mxu1 %v6064_v29 }
0x149b   :  { %4883 = vmatprep.subr.mxu1 %v5655_v8 }
0x1564   :  { %v2426_v11 = vpop.f32.mrb[20].mxu0 }
0x1565   :  { %2505 = vrot.lane.b32.xlu1 %v2426_v11, %s5660_s16  ;;  %v4844_v12 = vpop.f32.mrb[21].mxu0 }
0x1568   :  { %v2499_v15 = vpop.f32.mrb[22].mxu1 }
0x1569   :  { %2507 = vrot.lane.b32.xlu0 %v2499_v15, %s5660_s16  ;;  %v4855_v16 = vpop.f32.mrb[23].mxu1  ;;  %2518 = vrot.lane.b32.xlu1 %v4453_v14, %s5660_s16 }
0x15d7   :  { %v2506_v17 = vpop.permute.xlu1 %2505 }
0x15d8   :  { %v2511_v7 = vadd.f32 %v2506_v17, %v6222_v43 }
0x15db   :  { %v2508_v5 = vpop.permute.xlu0 %2507  ;;  %v6302_v26 = vpop.permute.xlu1 %2518 }
0x15dc   :  { %v2512_v28 = vadd.f32 %v2508_v5, %v6226_v48  ;;  %v6306_v30 = vadd.f32 %v6302_v26, %v2511_v7 }
0x15de   :  { %2525 = vrot.lane.b32.xlu0 %v6306_v30, %s5657_s5  ;;  %v6311_v31 = vadd.f32 %v6302_v26, %v2512_v28 }
0x15e0   :  { %2527 = vrot.lane.b32.xlu1 %v6311_v31, %s5657_s5 }
0x1650   :  { %v6315_v32 = vpop.permute.xlu0 %2525 }
0x1651   :  { %v2531_v43 = vsel %vm1221_vm4, %v6315_v32, 0.0 }
0x1652   :  { %v6319_v35 = vpop.permute.xlu1 %2527  ;;  %2532 = vadd.xlane.f32.xlu0 %v2531_v43 }
0x1653   :  { %v2534_v48 = vsel %vm1221_vm4, %v6319_v35, 0.0 }
0x1654   :  { %2535 = vadd.xlane.f32.xlu1 %v2534_v48 }
0x16df   :  { %v2533_v38 = vpop.xlane.xlu0 %2532 }
0x16e0   :  { %v2537_v39 = vmul.f32 0.03125, %v2533_v38 }
0x16e1   :  { %v2536_v40 = vpop.xlane.xlu1 %2535 }
0x16e2   :  { %v2539_v41 = vsub.f32 %v6306_v30, %v2537_v39  ;;  %v2538_v44 = vmul.f32 0.03125, %v2536_v40 }
0x16e4   :  { %v2540_v45 = vsub.f32 %v6311_v31, %v2538_v44  ;;  %v2541_v46 = vmul.f32 %v2539_v41, %v2539_v41 }
0x16e6   :  { %2545 = vrot.lane.b32.xlu0 %v2541_v46, %s5657_s5  ;;  %v2542_v47 = vmul.f32 %v2540_v45, %v2540_v45 }
0x16e8   :  { %2547 = vrot.lane.b32.xlu1 %v2542_v47, %s5657_s5 }
0x1758   :  { %v2546_v49 = vpop.permute.xlu0 %2545 }
0x1759   :  { %v2551_v51 = vsel %vm1221_vm4, %v2546_v49, 0.0 }
0x175a   :  { %v2548_v54 = vpop.permute.xlu1 %2547  ;;  %2552 = vadd.xlane.f32.xlu0 %v2551_v51 }
0x175b   :  { %v2554_v55 = vsel %vm1221_vm4, %v2548_v54, 0.0 }
0x175c   :  { %2555 = vadd.xlane.f32.xlu1 %v2554_v55 }
0x176d   :  { %2572 = vrot.lane.b32.xlu1 %v6074_v56, %s5660_s16 }
0x1770   :  { %2566 = vrot.lane.b32.xlu0 %v6070_v52, %s5660_s16 }
0x17e7   :  { %v2553_v58 = vpop.xlane.xlu0 %2552 }
0x17e8   :  { %v2557_v61 = vmul.f32 0.03125, %v2553_v58 }
0x17e9   :  { %v2556_v62 = vpop.xlane.xlu1 %2555 }
0x17ea   :  { %v2559_v63 = vadd.f32 1e-05, %v2557_v61  ;;  %v2558_v0 = vmul.f32 0.03125, %v2556_v62 }
0x17eb   :  { %v6333_v10 = vpop.permute.xlu0 %2566 }
0x17ec   :  { %5269 = vrsqrt.f32 %v2559_v63  ;;  %v2560_v1 = vadd.f32 1e-05, %v2558_v0 }
0x17ed   :  { %v6335_v14 = vpop.permute.xlu1 %2572 }
0x17ee   :  { %5271 = vrsqrt.f32 %v2560_v1 }
0x17f6   :  { %v5270_v4 = vpop.eup %5269 }
0x17f7   :  { %v2563_v11 = vmul.f32 %v5270_v4, %v2539_v41 }
0x17f8   :  { %v5272_v12 = vpop.eup %5271 }
0x17f9   :  { %v2564_v15 = vmul.f32 %v5272_v12, %v2540_v45  ;;  %v2569_v56 = vmul.f32 %v6333_v10, %v2563_v11 }
0x17fb   :  { %v2570_v52 = vmul.f32 %v6333_v10, %v2564_v15  ;;  %v2575_v16 = vadd.f32 %v6335_v14, %v2569_v56 }
0x17fd   :  { %2578 = vrot.lane.b32.xlu0 %v2575_v16, %s5657_s5  ;;  %v2576_v17 = vadd.f32 %v6335_v14, %v2570_v52 }
0x17ff   :  { %2653 = vrot.lane.b32.xlu1 %v2576_v17, %s5657_s5 }
0x186f   :  { %v2579_v7 = vpop.permute.xlu0 %2578 }
0x1870   :  { %4865 = vmatmul.mubr.msk.f32.vlgmr.msra.gmra.mrb[22].mxu0 %vm243_vm0, %v2579_v7 }
0x1871   :  { %v2654_v5 = vpop.permute.xlu1 %2653  ;;  %4879 = vmatpush3.xpose.msk.msra.mxu0 %vm243_vm0, %v6098_v9  ;;  %4880 = vmatprep.mubr.msk.f32.mxu0 %vm5656_vm1, %v5655_v8 }
0x1872   :  { %4876 = vmatmul.mubr.msk.f32.vlgmr.msra.gmra.mrb[24].mxu1 %vm243_vm0, %v2654_v5  ;;  %4888 = vmatprep.subr.mxu0 %v5655_v8 }
0x1873   :  { %4884 = vmatpush3.xpose.msk.msra.mxu1 %vm243_vm0, %v6094_v2  ;;  %4885 = vmatprep.mubr.msk.f32.mxu1 %vm5656_vm1, %v5655_v8 }
0x1874   :  { %4893 = vmatprep.subr.mxu1 %v5655_v8 }
0x1943   :  { %v2648_v28 = vpop.f32.mrb[22].mxu0 }
0x1944   :  { %v2649_v43 = vadd.f32 %v6096_v6, %v2648_v28  ;;  %v4866_v48 = vpop.f32.mrb[23].mxu0 }
0x1945   :  { %v2723_v38 = vpop.f32.mrb[24].mxu1 }
0x1946   :  { %v2724_v39 = vadd.f32 %v6096_v6, %v2723_v38  ;;  %v4877_v40 = vpop.f32.mrb[25].mxu1  ;;  %4881 = vmatmul.mubr.msk.f32.vlgmr.msra.gmra.mrb[24].mxu0 %vm243_vm0, %v2649_v43 }
0x1947   :  { %4889 = vmatpush3.msra.mxu0 %v6134_v20  ;;  %4890 = vmatprep.mubr.msk.f32.mxu0 %vm5656_vm1, %v5655_v8 }
0x1948   :  { %4886 = vmatmul.mubr.msk.f32.vlgmr.msra.gmra.mrb[26].mxu1 %vm243_vm0, %v2724_v39  ;;  %5130 = vmatprep.subr.bf16.mxu0 %v5659_v25 }
0x1949   :  { %4894 = vmatpush3.msra.mxu1 %v6138_v23  ;;  %4895 = vmatprep.mubr.msk.f32.mxu1 %vm5656_vm1, %v5655_v8 }
0x194a   :  { %5136 = vmatprep.subr.bf16.mxu1 %v5659_v25 }
0x1a19   :  { %v2796_v6 = vpop.f32.mrb[24].mxu0 }
0x1a1a   :  { %v2873_v41 = vmul.f32 0.17677669, %v2796_v6  ;;  %v4882_v44 = vpop.f32.mrb[25].mxu0 }
0x1a1b   :  { %v2869_v45 = vpop.f32.mrb[26].mxu1 }
0x1a1c   :  { %v2875_v20 = vsel %vm1564_vm5, %v2873_v41, -inf  ;;  %v2874_v46 = vmul.f32 0.17677669, %v2869_v45  ;;  %v4887_v47 = vpop.f32.mrb[27].mxu1 }
0x1a1d   :  { %v2876_v49 = vrot.slane %v2875_v20, 4 }
0x1a1e   :  { %v2882_v51 = vsel %vm1564_vm5, %v2874_v46, -inf }
0x1a1f   :  { %v2877_v54 = vmax.f32 %v2875_v20, %v2876_v49  ;;  %v2883_v55 = vrot.slane %v2882_v51, 4 }
0x1a21   :  { %v2878_v58 = vrot.slane %v2877_v54, 2  ;;  %v2884_v23 = vmax.f32 %v2882_v51, %v2883_v55 }
0x1a23   :  { %v2879_v61 = vmax.f32 %v2877_v54, %v2878_v58  ;;  %v2885_v62 = vrot.slane %v2884_v23, 2 }
0x1a25   :  { %v2880_v63 = vrot.slane %v2879_v61, 1  ;;  %v2886_v0 = vmax.f32 %v2884_v23, %v2885_v62 }
0x1a27   :  { %v2881_v1 = vmax.f32 %v2879_v61, %v2880_v63  ;;  %v2887_v4 = vrot.slane %v2886_v0, 1 }
0x1a29   :  { %v2889_v11 = vsub.f32 %v2873_v41, %v2881_v1  ;;  %v2888_v12 = vmax.f32 %v2886_v0, %v2887_v4 }
0x1a2b   :  { %v2891_v15 = vmul.f32 1.442695, %v2889_v11  ;;  %v2890_v56 = vsub.f32 %v2874_v46, %v2888_v12 }
0x1a2d   :  { %5273 = vpow2.f32 %v2891_v15  ;;  %v2893_v52 = vmul.f32 1.442695, %v2890_v56 }
0x1a2f   :  { %5275 = vpow2.f32 %v2893_v52 }
0x1a37   :  { %v5274_v16 = vpop.eup %5273 }
0x1a38   :  { %v2895_v17 = vsel %vm1564_vm5, %v5274_v16, 0.0 }
0x1a39   :  { %v5276_v7 = vpop.eup %5275  ;;  %v2896_v5 = vrot.slane %v2895_v17, 4 }
0x1a3a   :  { %v2902_v28 = vsel %vm1564_vm5, %v5276_v7, 0.0 }
0x1a3b   :  { %v2897_v43 = vadd.f32 %v2896_v5, %v2895_v17  ;;  %v2903_v48 = vrot.slane %v2902_v28, 4 }
0x1a3d   :  { %v2898_v38 = vrot.slane %v2897_v43, 2  ;;  %v2904_v39 = vadd.f32 %v2903_v48, %v2902_v28 }
0x1a3f   :  { %v2899_v40 = vadd.f32 %v2898_v38, %v2897_v43  ;;  %v2905_v6 = vrot.slane %v2904_v39, 2 }
0x1a41   :  { %v2906_v41 = vadd.f32 %v2905_v6, %v2904_v39  ;;  %v2900_v44 = vrot.slane %v2899_v40, 1 }
0x1a43   :  { %v2901_v45 = vadd.f32 %v2900_v44, %v2899_v40  ;;  %v2907_v20 = vrot.slane %v2906_v41, 1 }
0x1a45   :  { %5277 = vrcp.f32 %v2901_v45  ;;  %v2908_v46 = vadd.f32 %v2907_v20, %v2906_v41 }
0x1a47   :  { %5279 = vrcp.f32 %v2908_v46 }
0x1a4f   :  { %v5278_v47 = vpop.eup %5277 }
0x1a50   :  { %v2911_v49 = vmul.f32 %v5278_v47, %v5274_v16 }
0x1a51   :  { %v5280_v51 = vpop.eup %5279 }
0x1a52   :  { %v2913_v54 = vadd.f32 1e-08, %v2911_v49  ;;  %v2912_v55 = vmul.f32 %v5280_v51, %v5276_v7 }
0x1a54   :  { %v2915_v58 = vmul.f32 %v2913_v54, %v6120_v3  ;;  %v2914_v23 = vadd.f32 1e-08, %v2912_v55 }
0x1a56   :  { %v2917_v61 = vsel %vm1564_vm5, %v2915_v58, 0.0  ;;  %v2916_v62 = vmul.f32 %v2914_v23, %v6125_v13 }
0x1a57   :  { %2918 = vadd.xlane.f32.xlu0 %v2917_v61 }
0x1a58   :  { %v2920_v63 = vsel %vm1564_vm5, %v2916_v62, 0.0 }
0x1a59   :  { %2921 = vadd.xlane.f32.xlu1 %v2920_v63 }
0x1ae4   :  { %v2919_v0 = vpop.xlane.xlu0 %2918 }
0x1ae5   :  { %5281 = vrcp.f32 %v2919_v0 }
0x1ae6   :  { %v2922_v1 = vpop.xlane.xlu1 %2921 }
0x1ae7   :  { %5283 = vrcp.f32 %v2922_v1 }
0x1aef   :  { %v5282_v4 = vpop.eup %5281 }
0x1af0   :  { %v2925_v11 = vmul.f32 %v5282_v4, %v2915_v58 }
0x1af1   :  { %v5284_v12 = vpop.eup %5283 }
0x1af2   :  { %v2926_v15 = vmul.f32 %v5284_v12, %v2916_v62  ;;  %4891 = vmatmul.mubr.msk.f32.vlgmr.msra.gmra.mrb[26].mxu0 %vm499_vm2, %v2925_v11 }
0x1af3   :  { %5132 = vmatpush3.bf16.msra.mxu0 %v6148_v27  ;;  %4906 = vmatprep.mubr.msk.f32.mxu0 %vm5656_vm1, %v5655_v8 }
0x1af4   :  { %4896 = vmatmul.mubr.msk.f32.vlgmr.msra.gmra.mrb[28].mxu1 %vm499_vm2, %v2926_v15  ;;  %5133 = vmatprep.subr.bf16.mxu0 %v5659_v25 }
0x1af5   :  { %5138 = vmatpush3.bf16.msra.mxu1 %v6148_v27  ;;  %4917 = vmatprep.mubr.msk.f32.mxu1 %vm5656_vm1, %v5655_v8 }
0x1af6   :  { %5139 = vmatprep.subr.bf16.mxu1 %v5659_v25 }
0x1af7   :  { %5135 = vmatpush3.bf16.msra.mxu0 %v6158_v33 }
0x1af8   :  { %5142 = vmatprep.subr.bf16.mxu0 %v5659_v25 }
0x1af9   :  { %5141 = vmatpush3.bf16.msra.mxu1 %v6158_v33 }
0x1afa   :  { %5148 = vmatprep.subr.bf16.mxu1 %v5659_v25 }
0x1bc5   :  { %v2996_v56 = vpop.f32.mrb[26].mxu0 }
0x1bc6   :  { %v4892_v52 = vpop.f32.mrb[27].mxu0  ;;  %4907 = vmatmul.mubr.msk.f32.vlgmr.msra.gmra.mrb[28].mxu0 %vm243_vm0, %v2996_v56 }
0x1bc7   :  { %v3069_v16 = vpop.f32.mrb[28].mxu1  ;;  %5144 = vmatpush3.bf16.msra.mxu0 %v6172_v37  ;;  %4928 = vmatprep.mubr.msk.f32.mxu0 %vm5656_vm1, %v5655_v8 }
0x1bc8   :  { %v4897_v27 = vpop.f32.mrb[29].mxu1  ;;  %4918 = vmatmul.mubr.msk.f32.vlgmr.msra.gmra.mrb[30].mxu1 %vm243_vm0, %v3069_v16  ;;  %5145 = vmatprep.subr.bf16.mxu0 %v5659_v25 }
0x1bc9   :  { %5150 = vmatpush3.bf16.msra.mxu1 %v6172_v37  ;;  %4939 = vmatprep.mubr.msk.f32.mxu1 %vm5656_vm1, %v5655_v8 }
0x1bca   :  { %5151 = vmatprep.subr.bf16.mxu1 %v5659_v25 }
0x1bcb   :  { %5147 = vmatpush3.bf16.msra.mxu0 %v6176_v42 }
0x1bcc   :  { %5154 = vmatprep.subr.bf16.mxu0 %v5659_v25 }
0x1bcd   :  { %5153 = vmatpush3.bf16.msra.mxu1 %v6176_v42 }
0x1bce   :  { %4929 = vmatmul.mubr.msk.f32.vlgmr.msra.gmra.mrb[30].mxu0 %vm243_vm0, %v6315_v32  ;;  %5160 = vmatprep.subr.bf16.mxu1 %v5659_v25 }
0x1bcf   :  { %5156 = vmatpush3.bf16.msra.mxu0 %v6240_v18  ;;  %4950 = vmatprep.mubr.msk.f32.mxu0 %vm5656_vm1, %v5655_v8 }
0x1bd0   :  { %4940 = vmatmul.mubr.msk.f32.vlgmr.msra.gmra.mrb[32].mxu1 %vm243_vm0, %v6319_v35  ;;  %5157 = vmatprep.subr.bf16.mxu0 %v5659_v25 }
0x1bd1   :  { %5162 = vmatpush3.bf16.msra.mxu1 %v6240_v18  ;;  %4961 = vmatprep.mubr.msk.f32.mxu1 %vm5656_vm1, %v5655_v8 }
0x1bd2   :  { %5163 = vmatprep.subr.bf16.mxu1 %v5659_v25 }
0x1bd3   :  { %5159 = vmatpush3.bf16.msra.mxu0 %v6244_v21 }
0x1bd4   :  { %5166 = vmatprep.subr.bf16.mxu0 %v5659_v25 }
0x1bd5   :  { %5165 = vmatpush3.bf16.msra.mxu1 %v6244_v21 }
0x1bd6   :  { %5172 = vmatprep.subr.bf16.mxu1 %v5659_v25 }
0x1c99   :  { %v3142_v33 = vpop.f32.mrb[28].mxu0 }
0x1c9a   :  { %v4908_v37 = vpop.f32.mrb[29].mxu0  ;;  %v3143_v21 = vadd.f32 %v6210_v60, %v3142_v33 }
0x1c9b   :  { %v3215_v42 = vpop.f32.mrb[30].mxu1 }
0x1c9c   :  { %v4919_v32 = vpop.f32.mrb[31].mxu1  ;;  %v3216_v43 = vadd.f32 %v6210_v60, %v3215_v42 }
0x1ca1   :  { %v3287_v35 = vpop.f32.mrb[30].mxu0 }
0x1ca2   :  { %v3288_v18 = vadd.f32 %v6201_v50, %v3287_v35  ;;  %v4930_v17 = vpop.f32.mrb[31].mxu0 }
0x1ca3   :  { %v3359_v7 = vpop.f32.mrb[32].mxu1 }
0x1ca4   :  { %v3360_v5 = vadd.f32 %v6201_v50, %v3359_v7  ;;  %v4941_v28 = vpop.f32.mrb[33].mxu1  ;;  %3379 = vrot.lane.b32.xlu0 %v3288_v18, %s5658_s13  ;;  %v3363_v48 = vadd.f32 %v3288_v18, %v3143_v21 }
0x1ca6   :  { %3381 = vrot.lane.b32.xlu1 %v3360_v5, %s5658_s13  ;;  %v3364_v38 = vadd.f32 %v3360_v5, %v3216_v43  ;;  %v4466_v39 = vmul.f32 -1.442695, %v3363_v48 }
0x1ca8   :  { %v4467_v40 = vmul.f32 -1.442695, %v3364_v38  ;;  %5285 = vpow2.f32 %v4466_v39 }
0x1caa   :  { %5287 = vpow2.f32 %v4467_v40 }
0x1cb2   :  { %v5286_v6 = vpop.eup %5285 }
0x1cb3   :  { %v3371_v44 = vadd.f32 1.0, %v5286_v6 }
0x1cb4   :  { %v5288_v41 = vpop.eup %5287 }
0x1cb5   :  { %v3372_v45 = vadd.f32 1.0, %v5288_v41  ;;  %5289 = vrcp.f32 %v3371_v44 }
0x1cb7   :  { %5291 = vrcp.f32 %v3372_v45 }
0x1cbf   :  { %v5290_v50 = vpop.eup %5289 }
0x1cc0   :  { %v3399_v62 = vsub.f32 1.0, %v5290_v50  ;;  %v3411_v0 = vmul.f32 %v5290_v50, %v6306_v30 }
0x1cc1   :  { %v5292_v47 = vpop.eup %5291 }
0x1cc2   :  { %v3400_v4 = vsub.f32 1.0, %v5292_v47  ;;  %v3412_v15 = vmul.f32 %v5292_v47, %v6311_v31 }
0x1d16   :  { %v3380_v20 = vpop.permute.xlu0 %3379 }
0x1d17   :  { %v3385_v46 = vmul.f32 %v5290_v50, %v3380_v20 }
0x1d18   :  { %v3382_v49 = vpop.permute.xlu1 %3381 }
0x1d19   :  { %v3386_v51 = vmul.f32 %v5292_v47, %v3382_v49  ;;  %3389 = vrot.lane.b32.xlu0 %v3385_v46, %s5658_s13 }
0x1d1b   :  { %3391 = vrot.lane.b32.xlu1 %v3386_v51, %s5658_s13 }
0x1d8b   :  { %v3390_v60 = vpop.permute.xlu0 %3389 }
0x1d8c   :  { %v3395_v54 = vadd.f32 %v3390_v60, %v3143_v21 }
0x1d8d   :  { %v3392_v55 = vpop.permute.xlu1 %3391 }
0x1d8e   :  { %5293 = vtanh.f32 %v3395_v54  ;;  %v3396_v58 = vadd.f32 %v3392_v55, %v3216_v43 }
0x1d90   :  { %5295 = vtanh.f32 %v3396_v58 }
0x1d98   :  { %v5294_v23 = vpop.eup %5293 }
0x1d99   :  { %3403 = vrot.lane.b32.xlu0 %v5294_v23, %s5657_s5 }
0x1d9a   :  { %v5296_v61 = vpop.eup %5295 }
0x1d9b   :  { %3405 = vrot.lane.b32.xlu1 %v5296_v61, %s5657_s5 }
0x1e0b   :  { %v3404_v63 = vpop.permute.xlu0 %3403 }
0x1e0c   :  { %v3409_v1 = vmul.f32 %v3404_v63, %v3399_v62 }
0x1e0d   :  { %v3406_v11 = vpop.permute.xlu1 %3405 }
0x1e0e   :  { %v6430_v12 = vadd.f32 %v3411_v0, %v3409_v1  ;;  %v3410_v56 = vmul.f32 %v3406_v11, %v3400_v4 }
0x1e10   :  { %v6433_v52 = vadd.f32 %v3412_v15, %v3410_v56  ;;  %3417 = vrot.lane.b32.xlu0 %v6430_v12, %s5657_s5 }
0x1e12   :  { %3419 = vrot.lane.b32.xlu1 %v6433_v52, %s5657_s5 }
0x1e82   :  { %v3418_v16 = vpop.permute.xlu0 %3417 }
0x1e83   :  { %v3423_v27 = vsel %vm1221_vm4, %v3418_v16, 0.0 }
0x1e84   :  { %v3420_v30 = vpop.permute.xlu1 %3419  ;;  %3424 = vadd.xlane.f32.xlu0 %v3423_v27 }
0x1e85   :  { %v3426_v33 = vsel %vm1221_vm4, %v3420_v30, 0.0 }
0x1e86   :  { %3427 = vadd.xlane.f32.xlu1 %v3426_v33 }
0x1f11   :  { %v3425_v37 = vpop.xlane.xlu0 %3424 }
0x1f12   :  { %v3429_v42 = vmul.f32 0.03125, %v3425_v37 }
0x1f13   :  { %v3428_v31 = vpop.xlane.xlu1 %3427 }
0x1f14   :  { %v3431_v32 = vsub.f32 %v6430_v12, %v3429_v42  ;;  %v3430_v35 = vmul.f32 0.03125, %v3428_v31 }
0x1f16   :  { %v3432_v18 = vsub.f32 %v6433_v52, %v3430_v35  ;;  %v3433_v17 = vmul.f32 %v3431_v32, %v3431_v32 }
0x1f18   :  { %3437 = vrot.lane.b32.xlu0 %v3433_v17, %s5657_s5  ;;  %v3434_v7 = vmul.f32 %v3432_v18, %v3432_v18 }
0x1f1a   :  { %3439 = vrot.lane.b32.xlu1 %v3434_v7, %s5657_s5 }
0x1f8a   :  { %v3438_v5 = vpop.permute.xlu0 %3437 }
0x1f8b   :  { %v3443_v28 = vsel %vm1221_vm4, %v3438_v5, 0.0 }
0x1f8c   :  { %v3440_v21 = vpop.permute.xlu1 %3439  ;;  %3444 = vadd.xlane.f32.xlu0 %v3443_v28 }
0x1f8d   :  { %v3446_v43 = vsel %vm1221_vm4, %v3440_v21, 0.0 }
0x1f8e   :  { %3447 = vadd.xlane.f32.xlu1 %v3446_v43 }
0x2019   :  { %v3445_v48 = vpop.xlane.xlu0 %3444 }
0x201a   :  { %v3449_v38 = vmul.f32 0.03125, %v3445_v48 }
0x201b   :  { %v3448_v39 = vpop.xlane.xlu1 %3447 }
0x201c   :  { %v3451_v40 = vadd.f32 1e-05, %v3449_v38  ;;  %v3450_v6 = vmul.f32 0.03125, %v3448_v39 }
0x201e   :  { %5297 = vrsqrt.f32 %v3451_v40  ;;  %v3452_v41 = vadd.f32 1e-05, %v3450_v6 }
0x2020   :  { %5299 = vrsqrt.f32 %v3452_v41 }
0x2028   :  { %v5298_v44 = vpop.eup %5297 }
0x2029   :  { %v3455_v45 = vmul.f32 %v5298_v44, %v3431_v32 }
0x202a   :  { %v5300_v50 = vpop.eup %5299 }
0x202b   :  { %v3457_v20 = vmul.f32 %v3455_v45, %v6252_v34  ;;  %v3456_v46 = vmul.f32 %v5300_v50, %v3432_v18 }
0x202d   :  { %v3459_v47 = vadd.f32 %v3457_v20, %v6254_v36  ;;  %v3458_v49 = vmul.f32 %v3456_v46, %v6252_v34 }
0x202f   :  { %3462 = vrot.lane.b32.xlu0 %v3459_v47, %s5657_s5  ;;  %v3460_v51 = vadd.f32 %v3458_v49, %v6254_v36 }
0x2031   :  { %3537 = vrot.lane.b32.xlu1 %v3460_v51, %s5657_s5 }
0x20a1   :  { %v3463_v60 = vpop.permute.xlu0 %3462 }
0x20a2   :  { %4951 = vmatmul.mubr.msk.f32.vlgmr.msra.gmra.mrb[32].mxu0 %vm243_vm0, %v3463_v60 }
0x20a3   :  { %v3538_v54 = vpop.permute.xlu1 %3537  ;;  %5168 = vmatpush3.bf16.msra.mxu0 %v6262_v53  ;;  %4972 = vmatprep.mubr.msk.f32.mxu0 %vm5656_vm1, %v5655_v8 }
0x20a4   :  { %4962 = vmatmul.mubr.msk.f32.vlgmr.msra.gmra.mrb[34].mxu1 %vm243_vm0, %v3538_v54  ;;  %5169 = vmatprep.subr.bf16.mxu0 %v5659_v25 }
0x20a5   :  { %5174 = vmatpush3.bf16.msra.mxu1 %v6262_v53  ;;  %4983 = vmatprep.mubr.msk.f32.mxu1 %vm5656_vm1, %v5655_v8 }
0x20a6   :  { %5175 = vmatprep.subr.bf16.mxu1 %v5659_v25 }
0x20a7   :  { %5171 = vmatpush3.bf16.msra.mxu0 %v6274_v57 }
0x20a8   :  { %5178 = vmatprep.subr.bf16.mxu0 %v5659_v25 }
0x20a9   :  { %5177 = vmatpush3.bf16.msra.mxu1 %v6274_v57 }
0x20aa   :  { %5184 = vmatprep.subr.bf16.mxu1 %v5659_v25 }
0x2175   :  { %v3532_v34 = vpop.f32.mrb[32].mxu0 }
0x2176   :  { %v3533_v36 = vadd.f32 %v6280_v59, %v3532_v34  ;;  %v4952_v55 = vpop.f32.mrb[33].mxu0 }
0x2177   :  { %v3607_v58 = vpop.f32.mrb[34].mxu1 }
0x2178   :  { %v3611_v23 = vmax.f32 %v3533_v36, 0.0  ;;  %v3608_v53 = vadd.f32 %v6280_v59, %v3607_v58  ;;  %v4963_v61 = vpop.f32.mrb[35].mxu1 }
0x217a   :  { %v3612_v62 = vmax.f32 %v3608_v53, 0.0  ;;  %4973 = vmatmul.mubr.msk.f32.vlgmr.msra.gmra.mrb[34].mxu0 %vm243_vm0, %v3611_v23 }
0x217b   :  { %5180 = vmatpush3.bf16.msra.mxu0 %v6059_v24  ;;  %4994 = vmatprep.mubr.msk.f32.mxu0 %vm5656_vm1, %v5655_v8 }
0x217c   :  { %4984 = vmatmul.mubr.msk.f32.vlgmr.msra.gmra.mrb[36].mxu1 %vm243_vm0, %v3612_v62  ;;  %5181 = vmatprep.subr.bf16.mxu0 %v5659_v25 }
0x217d   :  { %5186 = vmatpush3.bf16.msra.mxu1 %v6059_v24  ;;  %5005 = vmatprep.mubr.msk.f32.mxu1 %vm5656_vm1, %v5655_v8 }
0x217e   :  { %5187 = vmatprep.subr.bf16.mxu1 %v5659_v25 }
0x217f   :  { %5183 = vmatpush3.bf16.msra.mxu0 %v6064_v29 }
0x2180   :  { %5008 = vmatprep.subr.mxu0 %v5655_v8 }
0x2181   :  { %5189 = vmatpush3.bf16.msra.mxu1 %v6064_v29 }
0x2182   :  { %5013 = vmatprep.subr.mxu1 %v5655_v8 }
0x224d   :  { %v3682_v57 = vpop.f32.mrb[34].mxu0 }
0x224e   :  { %3761 = vrot.lane.b32.xlu0 %v3682_v57, %s5660_s16  ;;  %v4974_v59 = vpop.f32.mrb[35].mxu0 }
0x224f   :  { %v3755_v63 = vpop.f32.mrb[36].mxu1 }
0x2250   :  { %3763 = vrot.lane.b32.xlu1 %v3755_v63, %s5660_s16  ;;  %v4985_v24 = vpop.f32.mrb[37].mxu1 }
0x22c0   :  { %v3762_v0 = vpop.permute.xlu0 %3761 }
0x22c1   :  { %v3767_v1 = vadd.f32 %v3762_v0, %v6430_v12 }
0x22c2   :  { %v3764_v25 = vpop.permute.xlu1 %3763 }
0x22c3   :  { %v3769_v4 = vadd.f32 %v3767_v1, %v6302_v26  ;;  %v3768_v11 = vadd.f32 %v3764_v25, %v6433_v52 }
0x22c5   :  { %v3770_v29 = vadd.f32 %v3768_v11, %v6302_v26  ;;  %3773 = vrot.lane.b32.xlu0 %v3769_v4, %s5657_s5 }
0x22c7   :  { %3775 = vrot.lane.b32.xlu1 %v3770_v29, %s5657_s5 }
0x2337   :  { %v3774_v15 = vpop.permute.xlu0 %3773 }
0x2338   :  { %v3779_v56 = vsel %vm1221_vm4, %v3774_v15, 0.0 }
0x2339   :  { %v3776_v16 = vpop.permute.xlu1 %3775  ;;  %3780 = vadd.xlane.f32.xlu0 %v3779_v56 }
0x233a   :  { %v3782_v27 = vsel %vm1221_vm4, %v3776_v16, 0.0 }
0x233b   :  { %3783 = vadd.xlane.f32.xlu1 %v3782_v27 }
0x23c6   :  { %v3781_v12 = vpop.xlane.xlu0 %3780 }
0x23c7   :  { %v3785_v30 = vmul.f32 0.03125, %v3781_v12 }
0x23c8   :  { %v3784_v33 = vpop.xlane.xlu1 %3783 }
0x23c9   :  { %v3787_v37 = vsub.f32 %v3769_v4, %v3785_v30  ;;  %v3786_v42 = vmul.f32 0.03125, %v3784_v33 }
0x23cb   :  { %v3788_v52 = vsub.f32 %v3770_v29, %v3786_v42  ;;  %v3789_v31 = vmul.f32 %v3787_v37, %v3787_v37 }
0x23cd   :  { %3793 = vrot.lane.b32.xlu0 %v3789_v31, %s5657_s5  ;;  %v3790_v26 = vmul.f32 %v3788_v52, %v3788_v52 }
0x23cf   :  { %3795 = vrot.lane.b32.xlu1 %v3790_v26, %s5657_s5 }
0x243f   :  { %v3794_v32 = vpop.permute.xlu0 %3793 }
0x2440   :  { %v3799_v35 = vsel %vm1221_vm4, %v3794_v32, 0.0 }
0x2441   :  { %v3796_v18 = vpop.permute.xlu1 %3795  ;;  %3800 = vadd.xlane.f32.xlu0 %v3799_v35 }
0x2442   :  { %v3802_v17 = vsel %vm1221_vm4, %v3796_v18, 0.0 }
0x2443   :  { %3803 = vadd.xlane.f32.xlu1 %v3802_v17 }
0x24ce   :  { %v3801_v7 = vpop.xlane.xlu0 %3800 }
0x24cf   :  { %v3805_v5 = vmul.f32 0.03125, %v3801_v7 }
0x24d0   :  { %v3804_v28 = vpop.xlane.xlu1 %3803 }
0x24d1   :  { %v3807_v21 = vadd.f32 1e-05, %v3805_v5  ;;  %v3806_v43 = vmul.f32 0.03125, %v3804_v28 }
0x24d3   :  { %5301 = vrsqrt.f32 %v3807_v21  ;;  %v3808_v48 = vadd.f32 1e-05, %v3806_v43 }
0x24d5   :  { %5303 = vrsqrt.f32 %v3808_v48 }
0x24dd   :  { %v5302_v38 = vpop.eup %5301 }
0x24de   :  { %v3811_v39 = vmul.f32 %v5302_v38, %v3787_v37 }
0x24df   :  { %v5304_v40 = vpop.eup %5303 }
0x24e0   :  { %v3813_v6 = vmul.f32 %v3811_v39, %v6333_v10  ;;  %v3812_v41 = vmul.f32 %v5304_v40, %v3788_v52 }
0x24e2   :  { %v3815_v44 = vadd.f32 %v3813_v6, %v6335_v14  ;;  %v3814_v45 = vmul.f32 %v3812_v41, %v6333_v10 }
0x24e4   :  { %3818 = vrot.lane.b32.xlu0 %v3815_v44, %s5657_s5  ;;  %v3816_v50 = vadd.f32 %v3814_v45, %v6335_v14  ;;  %v5313_v14 = vld [vmem:[#allocation20] ss:$0 sm:$0xff] }
0x24e6   :  { %3893 = vrot.lane.b32.xlu1 %v3816_v50, %s5657_s5 }
0x2556   :  { %v3819_v20 = vpop.permute.xlu0 %3818 }
0x2557   :  { %4995 = vmatmul.mubr.msk.f32.vlgmr.msra.gmra.mrb[36].mxu0 %vm243_vm0, %v3819_v20 }
0x2558   :  { %v3894_v46 = vpop.permute.xlu1 %3893  ;;  %5009 = vmatpush3.xpose.msk.msra.mxu0 %vm243_vm0, %v6098_v9  ;;  %5010 = vmatprep.mubr.msk.f32.mxu0 %vm5656_vm1, %v5655_v8  ;;  %v4171_v9 = vld [vmem:[#allocation8 + $0x8] sm:$0xff] }
0x2559   :  { %5006 = vmatmul.mubr.msk.f32.vlgmr.msra.gmra.mrb[38].mxu1 %vm243_vm0, %v3894_v46  ;;  %4176 = vmatprep.subr.mxu0 %v4171_v9 }
0x255a   :  { %5014 = vmatpush3.xpose.msk.msra.mxu1 %vm243_vm0, %v6094_v2  ;;  %5015 = vmatprep.mubr.msk.f32.mxu1 %vm5656_vm1, %v5655_v8  ;;  %v4170_v2 = vld [vmem:[#allocation8] sm:$0xff] }
0x255b   :  { %4251 = vmatprep.subr.mxu1 %v4171_v9 }
0x262a   :  { %v3888_v10 = vpop.f32.mrb[36].mxu0 }
0x262b   :  { %v3889_v47 = vadd.f32 %v5313_v14, %v3888_v10  ;;  %v4996_v49 = vpop.f32.mrb[37].mxu0 }
0x262c   :  { %v3963_v51 = vpop.f32.mrb[38].mxu1 }
0x262d   :  { %v3964_v60 = vadd.f32 %v5313_v14, %v3963_v51  ;;  %v5007_v54 = vpop.f32.mrb[39].mxu1  ;;  %5011 = vmatmul.mubr.msk.f32.vlgmr.msra.gmra.mrb[38].mxu0 %vm243_vm0, %v3889_v47 }
0x262e   :  { %4240 = vmatprep.mubr.f32.mxu0 %v5655_v8  ;;  %4177 = vmatpush1.msra.mxu0 %v4170_v2 }
0x262f   :  { %5016 = vmatmul.mubr.msk.f32.vlgmr.msra.gmra.mrb[40].mxu1 %vm243_vm0, %v3964_v60 }
0x2630   :  { %4315 = vmatprep.mubr.f32.mxu1 %v5655_v8  ;;  %4252 = vmatpush1.msra.mxu1 %v4170_v2 }
0x2700   :  { %v4036_v34 = vpop.f32.mrb[38].mxu0 }
0x2701   :  { %v4113_v36 = vmul.f32 0.17677669, %v4036_v34  ;;  %v5012_v55 = vpop.f32.mrb[39].mxu0 }
0x2702   :  { %v4109_v58 = vpop.f32.mrb[40].mxu1 }
0x2703   :  { %v4115_v23 = vsel %vm1564_vm5, %v4113_v36, -inf  ;;  %v4114_v53 = vmul.f32 0.17677669, %v4109_v58  ;;  %v5017_v61 = vpop.f32.mrb[41].mxu1 }
0x2704   :  { %v4116_v62 = vrot.slane %v4115_v23, 4 }
0x2705   :  { %v4122_v57 = vsel %vm1564_vm5, %v4114_v53, -inf }
0x2706   :  { %v4117_v59 = vmax.f32 %v4115_v23, %v4116_v62  ;;  %v4123_v63 = vrot.slane %v4122_v57, 4 }
0x2708   :  { %v4118_v8 = vrot.slane %v4117_v59, 2  ;;  %v4124_v24 = vmax.f32 %v4122_v57, %v4123_v63 }
0x270a   :  { %v4119_v0 = vmax.f32 %v4117_v59, %v4118_v8  ;;  %v4125_v1 = vrot.slane %v4124_v24, 2 }
0x270c   :  { %v4120_v25 = vrot.slane %v4119_v0, 1  ;;  %v4126_v4 = vmax.f32 %v4124_v24, %v4125_v1 }
0x270e   :  { %v4121_v11 = vmax.f32 %v4119_v0, %v4120_v25  ;;  %v4127_v29 = vrot.slane %v4126_v4, 1 }
0x2710   :  { %v4129_v15 = vsub.f32 %v4113_v36, %v4121_v11  ;;  %v4128_v56 = vmax.f32 %v4126_v4, %v4127_v29 }
0x2712   :  { %v4131_v16 = vmul.f32 1.442695, %v4129_v15  ;;  %v4130_v27 = vsub.f32 %v4114_v53, %v4128_v56 }
0x2714   :  { %5305 = vpow2.f32 %v4131_v16  ;;  %v4133_v12 = vmul.f32 1.442695, %v4130_v27 }
0x2716   :  { %5307 = vpow2.f32 %v4133_v12 }
0x271e   :  { %v5306_v30 = vpop.eup %5305 }
0x271f   :  { %v4135_v33 = vsel %vm1564_vm5, %v5306_v30, 0.0 }
0x2720   :  { %v5308_v37 = vpop.eup %5307  ;;  %v4136_v42 = vrot.slane %v4135_v33, 4 }
0x2721   :  { %v4142_v52 = vsel %vm1564_vm5, %v5308_v37, 0.0 }
0x2722   :  { %v4137_v31 = vadd.f32 %v4136_v42, %v4135_v33  ;;  %v4143_v26 = vrot.slane %v4142_v52, 4 }
0x2724   :  { %v4138_v32 = vrot.slane %v4137_v31, 2  ;;  %v4144_v35 = vadd.f32 %v4143_v26, %v4142_v52 }
0x2726   :  { %v4139_v18 = vadd.f32 %v4138_v32, %v4137_v31  ;;  %v4145_v17 = vrot.slane %v4144_v35, 2 }
0x2728   :  { %v4140_v7 = vrot.slane %v4139_v18, 1  ;;  %v4146_v5 = vadd.f32 %v4145_v17, %v4144_v35 }
0x272a   :  { %v4141_v28 = vadd.f32 %v4140_v7, %v4139_v18  ;;  %v4147_v21 = vrot.slane %v4146_v5, 1 }
0x272c   :  { %5309 = vrcp.f32 %v4141_v28  ;;  %v4148_v43 = vadd.f32 %v4147_v21, %v4146_v5 }
0x272e   :  { %5311 = vrcp.f32 %v4148_v43 }
0x2736   :  { %v5310_v48 = vpop.eup %5309 }
0x2737   :  { %v4151_v38 = vmul.f32 %v5310_v48, %v5306_v30 }
0x2738   :  { %v5312_v39 = vpop.eup %5311 }
0x2739   :  { %v4153_v40 = vadd.f32 1e-08, %v4151_v38  ;;  %v4152_v6 = vmul.f32 %v5312_v39, %v5308_v37 }
0x273b   :  { %v4155_v41 = vmul.f32 %v4153_v40, %v6120_v3  ;;  %v4154_v44 = vadd.f32 1e-08, %v4152_v6 }
0x273d   :  { %v4157_v45 = vmul.f32 1.2, %v4155_v41  ;;  %v4156_v50 = vmul.f32 %v4154_v44, %v6125_v13 }
0x273f   :  { %v4158_v20 = vmul.f32 1.2, %v4156_v50  ;;  %v4478_v46 = vadd.f32 -0.1, %v4157_v45 }
0x2741   :  { %v4161_v10 = vmax.f32 %v4478_v46, 0.0  ;;  %v4479_v14 = vadd.f32 -0.1, %v4158_v20 }
0x2743   :  { %v4163_v47 = vmin.f32 %v4161_v10, 1.0  ;;  %v4162_v49 = vmax.f32 %v4479_v14, 0.0 }
0x2745   :  { %4168 = vst.msk [vmem:[%s6574_s18 - $0x1] sm:$0xe] %vm4167_vm6, %v4163_v47  ;;  %v4173_v51 = vrot.slane %v4163_v47, 1  ;;  %v4164_v60 = vmin.f32 %v4162_v49, 1.0 }
0x2746   :  { %4165 = vst.msk [vmem:[#allocation23] sm:$0xf] %vm1564_vm5, %v4163_v47 }
0x2747   :  { %4480 = vmatmul.mubr.msk.f32.vlgmr.msra.gmra.mrb[40].mxu0 %vm499_vm2, %v4173_v51  ;;  %4169 = vst.msk [vmem:[%s6574_s18 + $0x3] sm:$0xe] %vm4167_vm6, %v4164_v60  ;;  %v4248_v3 = vrot.slane %v4164_v60, 1 }
0x2748   :  { %4166 = vst.msk [vmem:[#allocation23 + $0x4] sm:$0xf] %vm1564_vm5, %v4164_v60 }
0x2749   :  { %4481 = vmatmul.mubr.msk.f32.vlgmr.msra.gmra.mrb[42].mxu1 %vm499_vm2, %v4248_v3 }
0x274a   :  { %5611 = shalt.err (!%p5608_p10)
}
0x274b   :  { %s5612_s1 = scalar_lea.hbm %s6575_s19, 128 }
0x274c   :  { %p5613_p11 = scmp.ne.s32.totalorder %s6575_s19, %s5612_s1  ;;  %p5616_p12 = scmp.lt.u32.totalorder %s5612_s1, %s6575_s19 }
0x274e   :  { %p5618_p13 = pnand %p5616_p12, %p5613_p11 }
0x2750   :  { %5621 = shalt.err (!%p5618_p13)
}
0x2751   :  { %s5662_s4 = smov 4   ;;  %v4482_v13 = vld.sshfl [vmem:[#allocation5] sm:$0x33 pattern:$0x75316420]  ;;  %v4338_v54 = vsub.s32 1, %v5988_v19 }
0x2752   :  { %4381 = dma.vmem_to_hbm [thread:$0]  %s4376_s20, 128, %s6575_s19, [#allocation4], %s5658_s13, %s5658_s13, %s5662_s4   ;;  %v4331_v9 = vcombine.high %v4482_v13, %v4482_v13  ;;  %v4335_v2 = vrot.slane %v4482_v13, %v5993_v22 }
0x2753   :  { %v4339_v34 = vrot.slane %v4482_v13, %v4338_v54 }
0x2754   :  { %v4343_v36 = vrot.slane %v4331_v9, %v5993_v22  ;;  %v4347_v58 = vrot.slane %v4331_v9, %v4338_v54 }
0x281a   :  { %v4242_v55 = vpop.f32.mrb[40].mxu0 }
0x281b   :  { %v4352_v23 = vmul.f32 %v4335_v2, %v4242_v55  ;;  %v4244_v53 = vpop.f32.mrb[41].mxu0 }
0x281c   :  { %v4353_v61 = vmul.f32 %v4339_v34, %v4244_v53  ;;  %v4317_v62 = vpop.f32.mrb[42].mxu1 }
0x281d   :  { %v4354_v57 = vmul.f32 %v4343_v36, %v4317_v62  ;;  %v4319_v59 = vpop.f32.mrb[43].mxu1 }
0x281e   :  { %v4360_v63 = vcombine.low %v4352_v23, %v4353_v61  ;;  %v4355_v8 = vmul.f32 %v4347_v58, %v4319_v59 }
0x2820   :  { %4364 = vst [vmem:[%s6573_s17] sm:$0x77] %v4360_v63  ;;  %v4361_v19 = vcombine.low %v4354_v57, %v4355_v8 }
0x2822   :  { %4365 = vst [vmem:[%s6573_s17 + $0x8] sm:$0x77] %v4361_v19 }
0x2823   :  { %5636 = dma.done.wait [#allocation4], 128  }
0x2824   :  { %5637 = vsyncadd [#allocation4], 4294967168 }
0x2825   :  { %4389 = vsyncpa [#allocation3], 1 }
0x2826   :  { %4390 = vsyncpa [#allocation6], 1 }
0x2827   :  { %4391 = vsyncpa [#allocation9], 1 }
0x2828   :  { %4392 = vsyncpa [#allocation12], 1 }
0x2829   :  { %4393 = vsyncpa [#allocation15], 1 }
0x282a   :  { %4394 = vsyncpa [#allocation18], 1 }
0x282b   :  { %4395 = vsyncpa [#allocation21], 1 }
0x282c   :  { %4396 = vsyncpa [#allocation4], 1 }

</bundles_post_ra>
